<compile_context>
chip_gen: v6e
topology: v6e:2x2x1
jax: 0.10.0
libtpu: 0.0.40
codegen_flags: <defaults>
</compile_context>

<pallas_src>
import functools

import jax
import jax.numpy as jnp
from jax.experimental import pallas as pl
from jax.experimental.pallas import tpu as pltpu

# ---- model hyper-parameters (small, consistent with the module's __init__) ----
BATCH     = 2
SEQ       = 8          # max_src_len
D_MODEL   = 32
NUM_HEADS = 4
HEAD_DIM  = D_MODEL // NUM_HEADS
D_FF      = 64
MAX_RPE   = 4          # encoder_max_rpe
NUM_RPE   = 2 * MAX_RPE + 1
EPS       = 1e-5       # nn.LayerNorm default eps

# Production choice on v6e/v7x: bf16 MXU operands with f32 accumulate.
# Default False so the tight f32 tolerance in the self-test holds; flip it
# together with a looser tolerance. Elementwise math (softmax / LayerNorm /
# ReLU) stays f32 regardless (v5e has no bf16 VPU/EUP).
USE_BF16_MXU = False

PREC = jax.lax.Precision.HIGHEST


def _mm(a, b):
    """2-D MXU matmul, f32 accumulate (optionally bf16 operands on v6e/v7x)."""
    if USE_BF16_MXU:
        a = a.astype(jnp.bfloat16)
        b = b.astype(jnp.bfloat16)
    return jnp.dot(a, b, precision=PREC, preferred_element_type=jnp.float32)


def _bmm(eq, a, b):
    """Batched MXU contraction in canonical leading-batch form ('bqd,bkd->bqk'
    / 'bqk,bkd->bqd'), f32 accumulate."""
    if USE_BF16_MXU:
        a = a.astype(jnp.bfloat16)
        b = b.astype(jnp.bfloat16)
    return jnp.einsum(eq, a, b, precision=PREC,
                      preferred_element_type=jnp.float32)


def _layer_norm(x, gamma, beta):
    mu  = jnp.mean(x, axis=-1, keepdims=True)
    var = jnp.mean((x - mu) ** 2, axis=-1, keepdims=True)
    return (x - mu) * jax.lax.rsqrt(var + EPS) * gamma + beta


def encoder_layer_kernel(src_ref, maskn_ref,
                         wqkv_ref, bqkv_ref, wo_ref, bo_ref,
                         relk_ref, relv_ref,
                         g1_ref, be1_ref,
                         wff1_ref, bff1_ref, wff2_ref, bff2_ref,
                         g2_ref, be2_ref,
                         out_ref,
                         *, batch, seq, num_heads, head_dim):
    """One grid step = the whole layer: MHA(RPE) + LN + FFN + LN over B*S rows."""
    B, S, H, HD = batch, seq, num_heads, head_dim
    D = H * HD
    N = B * H                                              # batched attention maps

    x = src_ref[...]                                       # [B*S, D]

    # ---- fused Q/K/V projection: a single MXU matmul over all B*S rows ----
    qkv = _mm(x, wqkv_ref[...]) + bqkv_ref[...]            # [B*S, 3D]
    inv_scale = 1.0 / jnp.sqrt(jnp.float32(HD))
    q = qkv[:, :D] * inv_scale                             # fold 1/sqrt(HD) once
    k = qkv[:, D:2 * D]
    v = qkv[:, 2 * D:]

    # ---- split heads once: [B*S, D] -> [B*H, S, HD] (heads onto the batch axis)
    def to_heads(t):
        return jnp.transpose(t.reshape(B, S, H, HD), (0, 2, 1, 3)).reshape(N, S, HD)

    qh = to_heads(q)
    kh = to_heads(k)
    vh = to_heads(v)

    # ---- content-content scores, batched over all B*H heads ----
    a1 = _bmm('nqd,nkd->nqk', qh, kh)                      # [N, S, S]

    # ---- content-position scores via the dense rel_k table.
    # rel_k is [S_q, S_k, HD]; keep the contraction in the canonical
    # leading-batch form by making the query position the batch dim.
    qT = jnp.transpose(qh, (1, 0, 2))                      # [S, N, HD]
    a2 = _bmm('qnd,qkd->qnk', qT, relk_ref[...])           # [S, N, S]
    a2 = jnp.transpose(a2, (1, 0, 2))                      # [N, S, S]

    keep = (maskn_ref[...] > 0.0)[:, None, :]              # [N, 1, S] key mask
    scores = jnp.where(keep, a1 + a2, jnp.float32(-1e10))

    # ---- numerically-stable softmax; exact divide (EUP approx not needed) ----
    m = jnp.max(scores, axis=-1, keepdims=True)
    e = jnp.exp(scores - m)
    attn = e / jnp.sum(e, axis=-1, keepdims=True)          # [N, S, S]

    # ---- weighted values + value-side RPE (dense rel_v table) ----
    w = _bmm('nqk,nkd->nqd', attn, vh)                     # [N, S, HD]
    attnT = jnp.transpose(attn, (1, 0, 2))                 # [S, N, S]
    wrel = _bmm('qnk,qkd->qnd', attnT, relv_ref[...])      # [S, N, HD]
    w = w + jnp.transpose(wrel, (1, 0, 2))

    # ---- merge heads back to [B*S, D] and apply ONE output projection (K=32)
    ctx = jnp.transpose(w.reshape(B, H, S, HD), (0, 2, 1, 3)).reshape(B * S, D)
    attn_out = _mm(ctx, wo_ref[...]) + bo_ref[...]

    # residual + LayerNorm 1 (dropout = identity in eval)
    x1 = _layer_norm(x + attn_out, g1_ref[...], be1_ref[...])

    # position-wise feed-forward over all B*S rows: ReLU(x W1 + b1) W2 + b2
    h1 = jnp.maximum(_mm(x1, wff1_ref[...]) + bff1_ref[...], 0.0)
    ff = _mm(h1, wff2_ref[...]) + bff2_ref[...]

    # residual + LayerNorm 2
    # Note: D_MODEL=32 -> masked partial-lane stores; keep D a multiple of 128
    # when scaling the model for lane-dense vst.
    out_ref[...] = _layer_norm(x1 + ff, g2_ref[...], be2_ref[...])


def encoder_layer(src, mask, params):
    B, S, D = src.shape
    H, HD = NUM_HEADS, HEAD_DIM

    src2 = src.reshape(B * S, D)                           # lane-denser [B*S, D]
    # key-keep mask expanded over heads: row b*H + h = mask[b, 0, :]
    mask_n = jnp.broadcast_to(mask.reshape(B, 1, S), (B, H, S)).reshape(B * H, S)

    # fused QKV weight/bias (one [D, 3D] matmul in the kernel instead of three)
    wqkv = jnp.concatenate([params["wq"], params["wk"], params["wv"]], axis=1)
    bqkv = jnp.concatenate([params["bq"], params["bk"], params["bv"]], axis=1)

    # dense Shaw RPE tables [S, S, HD]; S^2*HD*4 = 2 KB each at these sizes.
    # TODO(synk): add a size switch back to the bucket/table form for large S.
    dist = jnp.arange(S)[:, None] - jnp.arange(S)[None, :]
    idx = jnp.clip(-dist, -MAX_RPE, MAX_RPE) + MAX_RPE
    rel_k = params["emb_k"][idx]
    rel_v = params["emb_v"][idx]

    flat = (wqkv, bqkv, params["wo"], params["bo"], rel_k, rel_v,
            params["g1"], params["be1"],
            params["wff1"], params["bff1"], params["wff2"], params["bff2"],
            params["g2"], params["be2"])

    def _full(a):
        n = a.ndim
        return pl.BlockSpec(a.shape, lambda i, n=n: (0,) * n)

    kernel = functools.partial(
        encoder_layer_kernel, batch=B, seq=S, num_heads=H, head_dim=HD)

    out2 = pl.pallas_call(
        kernel,
        out_shape=jax.ShapeDtypeStruct((B * S, D), jnp.float32),
        # Single fused grid step: the grid is a serial loop on one TensorCore;
        # at B*S=16 rows extra steps / a second core only add overhead.
        grid=(1,),
        in_specs=[_full(a) for a in (src2, mask_n, *flat)],
        out_specs=pl.BlockSpec((B * S, D), lambda i: (0, 0)),
        compiler_params=pltpu.CompilerParams(dimension_semantics=("arbitrary",)),
    )(src2, mask_n, *flat)
    return out2.reshape(B, S, D)


# ---------------- parameter setup (deterministic, synthetic) ----------------
def make_params(key):
    ks = jax.random.split(key, 16)

    def lin(kw, fan_in, fan_out):
        return (jax.random.normal(kw, (fan_in, fan_out), jnp.float32)
                / jnp.sqrt(jnp.float32(fan_in)))

    def bias(kb, n):
        return 0.01 * jax.random.normal(kb, (1, n), jnp.float32)

    # relative-position embedding tables, shared across heads (Shaw et al.)
    emb_k = 0.1 * jax.random.normal(ks[12], (NUM_RPE, HEAD_DIM), jnp.float32)
    emb_v = 0.1 * jax.random.normal(ks[13], (NUM_RPE, HEAD_DIM), jnp.float32)

    return dict(
        wq=lin(ks[0], D_MODEL, D_MODEL), bq=bias(ks[1], D_MODEL),
        wk=lin(ks[2], D_MODEL, D_MODEL), bk=bias(ks[3], D_MODEL),
        wv=lin(ks[4], D_MODEL, D_MODEL), bv=bias(ks[5], D_MODEL),
        wo=lin(ks[6], D_MODEL, D_MODEL), bo=bias(ks[7], D_MODEL),
        emb_k=emb_k,              # [2R+1, HEAD_DIM]
        emb_v=emb_v,              # [2R+1, HEAD_DIM]
        g1=jnp.ones((1, D_MODEL), jnp.float32), be1=jnp.zeros((1, D_MODEL), jnp.float32),
        wff1=lin(ks[8], D_MODEL, D_FF), bff1=bias(ks[9], D_FF),
        wff2=lin(ks[10], D_FF, D_MODEL), bff2=bias(ks[11], D_MODEL),
        g2=jnp.ones((1, D_MODEL), jnp.float32), be2=jnp.zeros((1, D_MODEL), jnp.float32),
    )


# ---------------- pure-JAX reference for correctness checking ----------------
def ref_forward(src, mask, p):
    dist = jnp.arange(SEQ)[:, None] - jnp.arange(SEQ)[None, :]
    idx = jnp.clip(-dist, -MAX_RPE, MAX_RPE) + MAX_RPE       # [S, S] table index
    rel_k = p["emb_k"][idx]                                  # [S, S, HD]
    rel_v = p["emb_v"][idx]

    outs = []
    for b in range(src.shape[0]):
        s = src[b]
        msk = mask[b, 0]
        q = s @ p["wq"] + p["bq"][0]
        k = s @ p["wk"] + p["bk"][0]
        v = s @ p["wv"] + p["bv"][0]
        inv_scale = 1.0 / jnp.sqrt(jnp.float32(HEAD_DIM))
        heads = []
        for h in range(NUM_HEADS):
            sl = slice(h * HEAD_DIM, (h + 1) * HEAD_DIM)
            qh, kh, vh = q[:, sl], k[:, sl], v[:, sl]
            a1 = qh @ kh.T
            a2 = jnp.sum(qh[:, None, :] * rel_k, axis=-1)
            sc = (a1 + a2) * inv_scale
            sc = jnp.where(msk[None, :] > 0, sc, -1e10)
            attn = jax.nn.softmax(sc, axis=-1)
            heads.append(attn @ vh + jnp.sum(attn[:, :, None] * rel_v, axis=1))
        ctx = jnp.concatenate(heads, axis=-1)
        attn_out = ctx @ p["wo"] + p["bo"][0]
        x = _layer_norm(s + attn_out, p["g1"][0], p["be1"][0])
        ff = jnp.maximum(x @ p["wff1"] + p["bff1"][0], 0.0) @ p["wff2"] + p["bff2"][0]
        outs.append(_layer_norm(x + ff, p["g2"][0], p["be2"][0]))
    return jnp.stack(outs)


if __name__ == "__main__":
    # Make the pure-JAX reference use full f32 matmul precision as well, so the
    # comparison isolates real mismatches rather than default bf16-pass noise.
    jax.config.update("jax_default_matmul_precision", "highest")

    key = jax.random.PRNGKey(0)
    k_src, k_par = jax.random.split(key)

    src = jax.random.normal(k_src, (BATCH, SEQ, D_MODEL), jnp.float32)
    # src_mask: 1 = attend, 0 = masked. Mask out the last two keys of batch 1.
    mask = jnp.ones((BATCH, 1, SEQ), jnp.float32).at[1, 0, SEQ - 2:].set(0.0)

    params = make_params(k_par)

    out = jax.block_until_ready(encoder_layer(src, mask, params))
    ref = jax.block_until_ready(ref_forward(src, mask, params))

    assert out.shape == (BATCH, SEQ, D_MODEL)
    err = jnp.max(jnp.abs(out - ref))
    assert jnp.allclose(out, ref, atol=2e-3, rtol=2e-3), f"max abs err {err}"

    print("KERNEL_OK")
</pallas_src>

<mosaic_0001>
module attributes {stable_mosaic.version = 11 : i64} {
  func.func @encoder_layer_kernel(%arg0: i32, %arg1: memref<16x32xf32, #tpu.memory_space<vmem>>, %arg2: memref<8x8xf32, #tpu.memory_space<vmem>>, %arg3: memref<32x96xf32, #tpu.memory_space<vmem>>, %arg4: memref<1x96xf32, #tpu.memory_space<vmem>>, %arg5: memref<32x32xf32, #tpu.memory_space<vmem>>, %arg6: memref<1x32xf32, #tpu.memory_space<vmem>>, %arg7: memref<8x8x8xf32, #tpu.memory_space<vmem>>, %arg8: memref<8x8x8xf32, #tpu.memory_space<vmem>>, %arg9: memref<1x32xf32, #tpu.memory_space<vmem>>, %arg10: memref<1x32xf32, #tpu.memory_space<vmem>>, %arg11: memref<32x64xf32, #tpu.memory_space<vmem>>, %arg12: memref<1x64xf32, #tpu.memory_space<vmem>>, %arg13: memref<64x32xf32, #tpu.memory_space<vmem>>, %arg14: memref<1x32xf32, #tpu.memory_space<vmem>>, %arg15: memref<1x32xf32, #tpu.memory_space<vmem>>, %arg16: memref<1x32xf32, #tpu.memory_space<vmem>>, %arg17: memref<16x32xf32, #tpu.memory_space<vmem>>) attributes {dimension_semantics = [#tpu.dimension_semantics<arbitrary>], iteration_bounds = array<i64: 1>, scalar_prefetch = 0 : i64, scratch_operands = 0 : i64, tpu.core_type = #tpu.core_type<tc>, window_params = [{pipeline_mode = #tpu.pipeline_mode<synchronous>, transform_indices = @transform_0, window_bounds = array<i64: 16, 32>}, {pipeline_mode = #tpu.pipeline_mode<synchronous>, transform_indices = @transform_1, window_bounds = array<i64: 8, 8>}, {pipeline_mode = #tpu.pipeline_mode<synchronous>, transform_indices = @transform_2, window_bounds = array<i64: 32, 96>}, {pipeline_mode = #tpu.pipeline_mode<synchronous>, transform_indices = @transform_3, window_bounds = array<i64: 1, 96>}, {pipeline_mode = #tpu.pipeline_mode<synchronous>, transform_indices = @transform_4, window_bounds = array<i64: 32, 32>}, {pipeline_mode = #tpu.pipeline_mode<synchronous>, transform_indices = @transform_5, window_bounds = array<i64: 1, 32>}, {pipeline_mode = #tpu.pipeline_mode<synchronous>, transform_indices = @transform_6, window_bounds = array<i64: 8, 8, 8>}, {pipeline_mode = #tpu.pipeline_mode<synchronous>, transform_indices = @transform_7, window_bounds = array<i64: 8, 8, 8>}, {pipeline_mode = #tpu.pipeline_mode<synchronous>, transform_indices = @transform_8, window_bounds = array<i64: 1, 32>}, {pipeline_mode = #tpu.pipeline_mode<synchronous>, transform_indices = @transform_9, window_bounds = array<i64: 1, 32>}, {pipeline_mode = #tpu.pipeline_mode<synchronous>, transform_indices = @transform_10, window_bounds = array<i64: 32, 64>}, {pipeline_mode = #tpu.pipeline_mode<synchronous>, transform_indices = @transform_11, window_bounds = array<i64: 1, 64>}, {pipeline_mode = #tpu.pipeline_mode<synchronous>, transform_indices = @transform_12, window_bounds = array<i64: 64, 32>}, {pipeline_mode = #tpu.pipeline_mode<synchronous>, transform_indices = @transform_13, window_bounds = array<i64: 1, 32>}, {pipeline_mode = #tpu.pipeline_mode<synchronous>, transform_indices = @transform_14, window_bounds = array<i64: 1, 32>}, {pipeline_mode = #tpu.pipeline_mode<synchronous>, transform_indices = @transform_15, window_bounds = array<i64: 1, 32>}, {pipeline_mode = #tpu.pipeline_mode<synchronous>, transform_indices = @transform_16, window_bounds = array<i64: 16, 32>}]} {
    %c0 = arith.constant 0 : index
    %c0_0 = arith.constant 0 : index
    %0 = vector.load %arg1[%c0, %c0_0] : memref<16x32xf32, #tpu.memory_space<vmem>>, vector<16x32xf32>
    %c0_1 = arith.constant 0 : index
    %c0_2 = arith.constant 0 : index
    %1 = vector.load %arg3[%c0_1, %c0_2] : memref<32x96xf32, #tpu.memory_space<vmem>>, vector<32x96xf32>
    %cst = arith.constant dense<0.000000e+00> : vector<16x96xf32>
    %2 = tpu.matmul %0, %1, %cst {dimension_numbers = #tpu.dot_dimension_numbers<[1], [0], [0], [1], [0, 0, 1, 1], [], []>, precision = #tpu.contract_precision<fp32>} : vector<16x32xf32>, vector<32x96xf32>, vector<16x96xf32> -> vector<16x96xf32>
    %c0_3 = arith.constant 0 : index
    %c0_4 = arith.constant 0 : index
    %3 = vector.load %arg4[%c0_3, %c0_4] : memref<1x96xf32, #tpu.memory_space<vmem>>, vector<1x96xf32>
    %4 = vector.broadcast %3 : vector<1x96xf32> to vector<16x96xf32>
    %5 = arith.addf %2, %4 : vector<16x96xf32>
    %cst_5 = arith.constant 8.000000e+00 : f32
    %6 = math.sqrt %cst_5 : f32
    %cst_6 = arith.constant 1.000000e+00 : f32
    %7 = arith.divf %cst_6, %6 : f32
    %8 = vector.extract_strided_slice %5 {offsets = [0, 0], sizes = [16, 32], strides = [1, 1]} : vector<16x96xf32> to vector<16x32xf32>
    %9 = vector.broadcast %7 : f32 to vector<16x32xf32>
    %10 = arith.mulf %8, %9 : vector<16x32xf32>
    %11 = vector.extract_strided_slice %5 {offsets = [0, 32], sizes = [16, 32], strides = [1, 1]} : vector<16x96xf32> to vector<16x32xf32>
    %12 = vector.extract_strided_slice %5 {offsets = [0, 64], sizes = [16, 32], strides = [1, 1]} : vector<16x96xf32> to vector<16x32xf32>
    %13 = vector.shape_cast %10 : vector<16x32xf32> to vector<2x8x4x8xf32>
    %14 = tpu.transpose %13, [0, 2, 1, 3] : vector<2x8x4x8xf32> -> vector<2x4x8x8xf32>
    %15 = vector.shape_cast %14 : vector<2x4x8x8xf32> to vector<8x8x8xf32>
    %16 = vector.shape_cast %11 : vector<16x32xf32> to vector<2x8x4x8xf32>
    %17 = tpu.transpose %16, [0, 2, 1, 3] : vector<2x8x4x8xf32> -> vector<2x4x8x8xf32>
    %18 = vector.shape_cast %17 : vector<2x4x8x8xf32> to vector<8x8x8xf32>
    %19 = vector.shape_cast %12 : vector<16x32xf32> to vector<2x8x4x8xf32>
    %20 = tpu.transpose %19, [0, 2, 1, 3] : vector<2x8x4x8xf32> -> vector<2x4x8x8xf32>
    %21 = vector.shape_cast %20 : vector<2x4x8x8xf32> to vector<8x8x8xf32>
    "tpu.trace_start"() <{level = 10 : i32, message = "nqd,nkd->nqk"}> : () -> ()
    %cst_7 = arith.constant dense<0.000000e+00> : vector<8x8x8xf32>
    %22 = tpu.matmul %15, %18, %cst_7 {dimension_numbers = #tpu.dot_dimension_numbers<[2], [2], [1], [1], [0, 0, 0, 1, 1, 1], [0], [0]>, precision = #tpu.contract_precision<fp32>} : vector<8x8x8xf32>, vector<8x8x8xf32>, vector<8x8x8xf32> -> vector<8x8x8xf32>
    "tpu.trace_stop"() : () -> ()
    %23 = tpu.transpose %15, [1, 0, 2] : vector<8x8x8xf32> -> vector<8x8x8xf32>
    %c0_8 = arith.constant 0 : index
    %c0_9 = arith.constant 0 : index
    %c0_10 = arith.constant 0 : index
    %24 = vector.load %arg7[%c0_8, %c0_9, %c0_10] : memref<8x8x8xf32, #tpu.memory_space<vmem>>, vector<8x8x8xf32>
    "tpu.trace_start"() <{level = 10 : i32, message = "qnd,qkd->qnk"}> : () -> ()
    %cst_11 = arith.constant dense<0.000000e+00> : vector<8x8x8xf32>
    %25 = tpu.matmul %23, %24, %cst_11 {dimension_numbers = #tpu.dot_dimension_numbers<[2], [2], [1], [1], [0, 0, 0, 1, 1, 1], [0], [0]>, precision = #tpu.contract_precision<fp32>} : vector<8x8x8xf32>, vector<8x8x8xf32>, vector<8x8x8xf32> -> vector<8x8x8xf32>
    "tpu.trace_stop"() : () -> ()
    %26 = tpu.transpose %25, [1, 0, 2] : vector<8x8x8xf32> -> vector<8x8x8xf32>
    %c0_12 = arith.constant 0 : index
    %c0_13 = arith.constant 0 : index
    %27 = vector.load %arg2[%c0_12, %c0_13] : memref<8x8xf32, #tpu.memory_space<vmem>>, vector<8x8xf32>
    %cst_14 = arith.constant 0.000000e+00 : f32
    %28 = vector.broadcast %cst_14 : f32 to vector<8x8xf32>
    %29 = arith.cmpf ogt, %27, %28 : vector<8x8xf32>
    %30 = vector.shape_cast %29 : vector<8x8xi1> to vector<8x1x8xi1>
    %31 = arith.addf %22, %26 : vector<8x8x8xf32>
    %cst_15 = arith.constant -1.000000e+10 : f32
    %32 = vector.shape_cast %30 : vector<8x1x8xi1> to vector<8x1x8xi1>
    %33 = vector.broadcast %32 : vector<8x1x8xi1> to vector<8x8x8xi1>
    %34 = vector.broadcast %cst_15 : f32 to vector<8x8x8xf32>
    %35 = arith.select %33, %31, %34 : vector<8x8x8xi1>, vector<8x8x8xf32>
    %cst_16 = arith.constant dense<0xFF800000> : vector<8x8xf32>
    %36 = vector.multi_reduction <maximumf>, %35, %cst_16 [2] : vector<8x8x8xf32> to vector<8x8xf32>
    %37 = vector.shape_cast %36 : vector<8x8xf32> to vector<8x8x1xf32>
    %38 = vector.broadcast %37 : vector<8x8x1xf32> to vector<8x8x8xf32>
    %39 = arith.subf %35, %38 : vector<8x8x8xf32>
    %40 = math.exp %39 : vector<8x8x8xf32>
    %cst_17 = arith.constant dense<0.000000e+00> : vector<8x8xf32>
    %41 = vector.multi_reduction <add>, %40, %cst_17 [2] : vector<8x8x8xf32> to vector<8x8xf32>
    %42 = vector.shape_cast %41 : vector<8x8xf32> to vector<8x8x1xf32>
    %43 = vector.broadcast %42 : vector<8x8x1xf32> to vector<8x8x8xf32>
    %44 = arith.divf %40, %43 : vector<8x8x8xf32>
    "tpu.trace_start"() <{level = 10 : i32, message = "nqk,nkd->nqd"}> : () -> ()
    %cst_18 = arith.constant dense<0.000000e+00> : vector<8x8x8xf32>
    %45 = tpu.matmul %44, %21, %cst_18 {dimension_numbers = #tpu.dot_dimension_numbers<[2], [1], [1], [2], [0, 0, 0, 1, 1, 2], [0], [0]>, precision = #tpu.contract_precision<fp32>} : vector<8x8x8xf32>, vector<8x8x8xf32>, vector<8x8x8xf32> -> vector<8x8x8xf32>
    "tpu.trace_stop"() : () -> ()
    %46 = tpu.transpose %44, [1, 0, 2] : vector<8x8x8xf32> -> vector<8x8x8xf32>
    %c0_19 = arith.constant 0 : index
    %c0_20 = arith.constant 0 : index
    %c0_21 = arith.constant 0 : index
    %47 = vector.load %arg8[%c0_19, %c0_20, %c0_21] : memref<8x8x8xf32, #tpu.memory_space<vmem>>, vector<8x8x8xf32>
    "tpu.trace_start"() <{level = 10 : i32, message = "qnk,qkd->qnd"}> : () -> ()
    %cst_22 = arith.constant dense<0.000000e+00> : vector<8x8x8xf32>
    %48 = tpu.matmul %46, %47, %cst_22 {dimension_numbers = #tpu.dot_dimension_numbers<[2], [1], [1], [2], [0, 0, 0, 1, 1, 2], [0], [0]>, precision = #tpu.contract_precision<fp32>} : vector<8x8x8xf32>, vector<8x8x8xf32>, vector<8x8x8xf32> -> vector<8x8x8xf32>
    "tpu.trace_stop"() : () -> ()
    %49 = tpu.transpose %48, [1, 0, 2] : vector<8x8x8xf32> -> vector<8x8x8xf32>
    %50 = arith.addf %45, %49 : vector<8x8x8xf32>
    %51 = vector.shape_cast %50 : vector<8x8x8xf32> to vector<2x4x8x8xf32>
    %52 = tpu.transpose %51, [0, 2, 1, 3] : vector<2x4x8x8xf32> -> vector<2x8x4x8xf32>
    %53 = vector.shape_cast %52 : vector<2x8x4x8xf32> to vector<16x32xf32>
    %c0_23 = arith.constant 0 : index
    %c0_24 = arith.constant 0 : index
    %54 = vector.load %arg5[%c0_23, %c0_24] : memref<32x32xf32, #tpu.memory_space<vmem>>, vector<32x32xf32>
    %cst_25 = arith.constant dense<0.000000e+00> : vector<16x32xf32>
    %55 = tpu.matmul %53, %54, %cst_25 {dimension_numbers = #tpu.dot_dimension_numbers<[1], [0], [0], [1], [0, 0, 1, 1], [], []>, precision = #tpu.contract_precision<fp32>} : vector<16x32xf32>, vector<32x32xf32>, vector<16x32xf32> -> vector<16x32xf32>
    %c0_26 = arith.constant 0 : index
    %c0_27 = arith.constant 0 : index
    %56 = vector.load %arg6[%c0_26, %c0_27] : memref<1x32xf32, #tpu.memory_space<vmem>>, vector<1x32xf32>
    %57 = vector.broadcast %56 : vector<1x32xf32> to vector<16x32xf32>
    %58 = arith.addf %55, %57 : vector<16x32xf32>
    %59 = arith.addf %0, %58 : vector<16x32xf32>
    %c0_28 = arith.constant 0 : index
    %c0_29 = arith.constant 0 : index
    %60 = vector.load %arg9[%c0_28, %c0_29] : memref<1x32xf32, #tpu.memory_space<vmem>>, vector<1x32xf32>
    %c0_30 = arith.constant 0 : index
    %c0_31 = arith.constant 0 : index
    %61 = vector.load %arg10[%c0_30, %c0_31] : memref<1x32xf32, #tpu.memory_space<vmem>>, vector<1x32xf32>
    %cst_32 = arith.constant dense<0.000000e+00> : vector<16xf32>
    %62 = vector.multi_reduction <add>, %59, %cst_32 [1] : vector<16x32xf32> to vector<16xf32>
    %63 = vector.shape_cast %62 : vector<16xf32> to vector<16x1xf32>
    %cst_33 = arith.constant 3.200000e+01 : f32
    %64 = vector.broadcast %cst_33 : f32 to vector<16x1xf32>
    %65 = arith.divf %63, %64 : vector<16x1xf32>
    %66 = vector.broadcast %65 : vector<16x1xf32> to vector<16x32xf32>
    %67 = arith.subf %59, %66 : vector<16x32xf32>
    %68 = arith.mulf %67, %67 : vector<16x32xf32>
    %cst_34 = arith.constant dense<0.000000e+00> : vector<16xf32>
    %69 = vector.multi_reduction <add>, %68, %cst_34 [1] : vector<16x32xf32> to vector<16xf32>
    %70 = vector.shape_cast %69 : vector<16xf32> to vector<16x1xf32>
    %cst_35 = arith.constant 3.200000e+01 : f32
    %71 = vector.broadcast %cst_35 : f32 to vector<16x1xf32>
    %72 = arith.divf %70, %71 : vector<16x1xf32>
    %73 = vector.broadcast %65 : vector<16x1xf32> to vector<16x32xf32>
    %74 = arith.subf %59, %73 : vector<16x32xf32>
    %cst_36 = arith.constant 9.99999974E-6 : f32
    %75 = vector.broadcast %cst_36 : f32 to vector<16x1xf32>
    %76 = arith.addf %72, %75 : vector<16x1xf32>
    %77 = math.rsqrt %76 : vector<16x1xf32>
    %78 = vector.broadcast %77 : vector<16x1xf32> to vector<16x32xf32>
    %79 = arith.mulf %74, %78 : vector<16x32xf32>
    %80 = vector.broadcast %60 : vector<1x32xf32> to vector<16x32xf32>
    %81 = arith.mulf %79, %80 : vector<16x32xf32>
    %82 = vector.broadcast %61 : vector<1x32xf32> to vector<16x32xf32>
    %83 = arith.addf %81, %82 : vector<16x32xf32>
    %c0_37 = arith.constant 0 : index
    %c0_38 = arith.constant 0 : index
    %84 = vector.load %arg11[%c0_37, %c0_38] : memref<32x64xf32, #tpu.memory_space<vmem>>, vector<32x64xf32>
    %cst_39 = arith.constant dense<0.000000e+00> : vector<16x64xf32>
    %85 = tpu.matmul %83, %84, %cst_39 {dimension_numbers = #tpu.dot_dimension_numbers<[1], [0], [0], [1], [0, 0, 1, 1], [], []>, precision = #tpu.contract_precision<fp32>} : vector<16x32xf32>, vector<32x64xf32>, vector<16x64xf32> -> vector<16x64xf32>
    %c0_40 = arith.constant 0 : index
    %c0_41 = arith.constant 0 : index
    %86 = vector.load %arg12[%c0_40, %c0_41] : memref<1x64xf32, #tpu.memory_space<vmem>>, vector<1x64xf32>
    %87 = vector.broadcast %86 : vector<1x64xf32> to vector<16x64xf32>
    %88 = arith.addf %85, %87 : vector<16x64xf32>
    %cst_42 = arith.constant 0.000000e+00 : f32
    %89 = vector.broadcast %cst_42 : f32 to vector<16x64xf32>
    %90 = arith.maximumf %88, %89 : vector<16x64xf32>
    %c0_43 = arith.constant 0 : index
    %c0_44 = arith.constant 0 : index
    %91 = vector.load %arg13[%c0_43, %c0_44] : memref<64x32xf32, #tpu.memory_space<vmem>>, vector<64x32xf32>
    %cst_45 = arith.constant dense<0.000000e+00> : vector<16x32xf32>
    %92 = tpu.matmul %90, %91, %cst_45 {dimension_numbers = #tpu.dot_dimension_numbers<[1], [0], [0], [1], [0, 0, 1, 1], [], []>, precision = #tpu.contract_precision<fp32>} : vector<16x64xf32>, vector<64x32xf32>, vector<16x32xf32> -> vector<16x32xf32>
    %c0_46 = arith.constant 0 : index
    %c0_47 = arith.constant 0 : index
    %93 = vector.load %arg14[%c0_46, %c0_47] : memref<1x32xf32, #tpu.memory_space<vmem>>, vector<1x32xf32>
    %94 = vector.broadcast %93 : vector<1x32xf32> to vector<16x32xf32>
    %95 = arith.addf %92, %94 : vector<16x32xf32>
    %96 = arith.addf %83, %95 : vector<16x32xf32>
    %c0_48 = arith.constant 0 : index
    %c0_49 = arith.constant 0 : index
    %97 = vector.load %arg15[%c0_48, %c0_49] : memref<1x32xf32, #tpu.memory_space<vmem>>, vector<1x32xf32>
    %c0_50 = arith.constant 0 : index
    %c0_51 = arith.constant 0 : index
    %98 = vector.load %arg16[%c0_50, %c0_51] : memref<1x32xf32, #tpu.memory_space<vmem>>, vector<1x32xf32>
    %cst_52 = arith.constant dense<0.000000e+00> : vector<16xf32>
    %99 = vector.multi_reduction <add>, %96, %cst_52 [1] : vector<16x32xf32> to vector<16xf32>
    %100 = vector.shape_cast %99 : vector<16xf32> to vector<16x1xf32>
    %cst_53 = arith.constant 3.200000e+01 : f32
    %101 = vector.broadcast %cst_53 : f32 to vector<16x1xf32>
    %102 = arith.divf %100, %101 : vector<16x1xf32>
    %103 = vector.broadcast %102 : vector<16x1xf32> to vector<16x32xf32>
    %104 = arith.subf %96, %103 : vector<16x32xf32>
    %105 = arith.mulf %104, %104 : vector<16x32xf32>
    %cst_54 = arith.constant dense<0.000000e+00> : vector<16xf32>
    %106 = vector.multi_reduction <add>, %105, %cst_54 [1] : vector<16x32xf32> to vector<16xf32>
    %107 = vector.shape_cast %106 : vector<16xf32> to vector<16x1xf32>
    %cst_55 = arith.constant 3.200000e+01 : f32
    %108 = vector.broadcast %cst_55 : f32 to vector<16x1xf32>
    %109 = arith.divf %107, %108 : vector<16x1xf32>
    %110 = vector.broadcast %102 : vector<16x1xf32> to vector<16x32xf32>
    %111 = arith.subf %96, %110 : vector<16x32xf32>
    %cst_56 = arith.constant 9.99999974E-6 : f32
    %112 = vector.broadcast %cst_56 : f32 to vector<16x1xf32>
    %113 = arith.addf %109, %112 : vector<16x1xf32>
    %114 = math.rsqrt %113 : vector<16x1xf32>
    %115 = vector.broadcast %114 : vector<16x1xf32> to vector<16x32xf32>
    %116 = arith.mulf %111, %115 : vector<16x32xf32>
    %117 = vector.broadcast %97 : vector<1x32xf32> to vector<16x32xf32>
    %118 = arith.mulf %116, %117 : vector<16x32xf32>
    %119 = vector.broadcast %98 : vector<1x32xf32> to vector<16x32xf32>
    %120 = arith.addf %118, %119 : vector<16x32xf32>
    %c0_57 = arith.constant 0 : index
    %c0_58 = arith.constant 0 : index
    %121 = vector.load %arg17[%c0_57, %c0_58] : memref<16x32xf32, #tpu.memory_space<vmem>>, vector<16x32xf32>
    tpu.vector_store %arg17[%c0_57, %c0_58], %120 {strides = array<i32>} : memref<16x32xf32, #tpu.memory_space<vmem>>, vector<16x32xf32>,
    return
  }
  func.func @transform_0(%arg0: i32) -> (i32, i32) {
    %c0_i32 = arith.constant 0 : i32
    %c0_i32_0 = arith.constant 0 : i32
    %c0_i32_1 = arith.constant 0 : i32
    return %c0_i32, %c0_i32_0 : i32, i32
  }
  func.func @transform_1(%arg0: i32) -> (i32, i32) {
    %c0_i32 = arith.constant 0 : i32
    %c0_i32_0 = arith.constant 0 : i32
    %c0_i32_1 = arith.constant 0 : i32
    return %c0_i32, %c0_i32_0 : i32, i32
  }
  func.func @transform_2(%arg0: i32) -> (i32, i32) {
    %c0_i32 = arith.constant 0 : i32
    %c0_i32_0 = arith.constant 0 : i32
    %c0_i32_1 = arith.constant 0 : i32
    return %c0_i32, %c0_i32_0 : i32, i32
  }
  func.func @transform_3(%arg0: i32) -> (i32, i32) {
    %c0_i32 = arith.constant 0 : i32
    %c0_i32_0 = arith.constant 0 : i32
    %c0_i32_1 = arith.constant 0 : i32
    return %c0_i32, %c0_i32_0 : i32, i32
  }
  func.func @transform_4(%arg0: i32) -> (i32, i32) {
    %c0_i32 = arith.constant 0 : i32
    %c0_i32_0 = arith.constant 0 : i32
    %c0_i32_1 = arith.constant 0 : i32
    return %c0_i32, %c0_i32_0 : i32, i32
  }
  func.func @transform_5(%arg0: i32) -> (i32, i32) {
    %c0_i32 = arith.constant 0 : i32
    %c0_i32_0 = arith.constant 0 : i32
    %c0_i32_1 = arith.constant 0 : i32
    return %c0_i32, %c0_i32_0 : i32, i32
  }
  func.func @transform_6(%arg0: i32) -> (i32, i32, i32) {
    %c0_i32 = arith.constant 0 : i32
    %c0_i32_0 = arith.constant 0 : i32
    %c0_i32_1 = arith.constant 0 : i32
    %c0_i32_2 = arith.constant 0 : i32
    return %c0_i32, %c0_i32_0, %c0_i32_1 : i32, i32, i32
  }
  func.func @transform_7(%arg0: i32) -> (i32, i32, i32) {
    %c0_i32 = arith.constant 0 : i32
    %c0_i32_0 = arith.constant 0 : i32
    %c0_i32_1 = arith.constant 0 : i32
    %c0_i32_2 = arith.constant 0 : i32
    return %c0_i32, %c0_i32_0, %c0_i32_1 : i32, i32, i32
  }
  func.func @transform_8(%arg0: i32) -> (i32, i32) {
    %c0_i32 = arith.constant 0 : i32
    %c0_i32_0 = arith.constant 0 : i32
    %c0_i32_1 = arith.constant 0 : i32
    return %c0_i32, %c0_i32_0 : i32, i32
  }
  func.func @transform_9(%arg0: i32) -> (i32, i32) {
    %c0_i32 = arith.constant 0 : i32
    %c0_i32_0 = arith.constant 0 : i32
    %c0_i32_1 = arith.constant 0 : i32
    return %c0_i32, %c0_i32_0 : i32, i32
  }
  func.func @transform_10(%arg0: i32) -> (i32, i32) {
    %c0_i32 = arith.constant 0 : i32
    %c0_i32_0 = arith.constant 0 : i32
    %c0_i32_1 = arith.constant 0 : i32
    return %c0_i32, %c0_i32_0 : i32, i32
  }
  func.func @transform_11(%arg0: i32) -> (i32, i32) {
    %c0_i32 = arith.constant 0 : i32
    %c0_i32_0 = arith.constant 0 : i32
    %c0_i32_1 = arith.constant 0 : i32
    return %c0_i32, %c0_i32_0 : i32, i32
  }
  func.func @transform_12(%arg0: i32) -> (i32, i32) {
    %c0_i32 = arith.constant 0 : i32
    %c0_i32_0 = arith.constant 0 : i32
    %c0_i32_1 = arith.constant 0 : i32
    return %c0_i32, %c0_i32_0 : i32, i32
  }
  func.func @transform_13(%arg0: i32) -> (i32, i32) {
    %c0_i32 = arith.constant 0 : i32
    %c0_i32_0 = arith.constant 0 : i32
    %c0_i32_1 = arith.constant 0 : i32
    return %c0_i32, %c0_i32_0 : i32, i32
  }
  func.func @transform_14(%arg0: i32) -> (i32, i32) {
    %c0_i32 = arith.constant 0 : i32
    %c0_i32_0 = arith.constant 0 : i32
    %c0_i32_1 = arith.constant 0 : i32
    return %c0_i32, %c0_i32_0 : i32, i32
  }
  func.func @transform_15(%arg0: i32) -> (i32, i32) {
    %c0_i32 = arith.constant 0 : i32
    %c0_i32_0 = arith.constant 0 : i32
    %c0_i32_1 = arith.constant 0 : i32
    return %c0_i32, %c0_i32_0 : i32, i32
  }
  func.func @transform_16(%arg0: i32) -> (i32, i32) {
    %c0_i32 = arith.constant 0 : i32
    %c0_i32_0 = arith.constant 0 : i32
    %c0_i32_1 = arith.constant 0 : i32
    return %c0_i32, %c0_i32_0 : i32, i32
  }
}

</mosaic_0001>

<bundles_post_ra>
// kernel: tpu_custom_call.1
= control target key start
LH: loop header
LB: loop body
LE: loop exit
PB: predicated region body
PF: predicated region fallthrough
CT: control target
= control target key end

     0   :  { %s23654_s0 = inlined_call_operand.hbm [shape: f32[16,32], index: 0, kind: input, shape index: {}]   ;;  %s23655_s1 = inlined_call_operand.vmem [shape: f32[8,8], index: 1, kind: input, shape index: {}]   ;;  %s23656_s2 = inlined_call_operand.vmem [shape: f32[32,96], index: 2, kind: input, shape index: {}]   ;;  %s23657_s3 = inlined_call_operand.vmem [shape: f32[1,96], index: 3, kind: input, shape index: {}]   ;;  %s23658_s4 = inlined_call_operand.hbm [shape: f32[32,32], index: 4, kind: input, shape index: {}]   ;;  %s23659_s5 = inlined_call_operand.vmem [shape: f32[1,32], index: 5, kind: input, shape index: {}]   ;;  %s23660_s6 = inlined_call_operand.vmem [shape: f32[8,8,8], index: 6, kind: input, shape index: {}]   ;;  %s23661_s7 = inlined_call_operand.hbm [shape: f32[8,8,8], index: 7, kind: input, shape index: {}]   ;;  %s23662_s8 = inlined_call_operand.vmem [shape: f32[1,32], index: 8, kind: input, shape index: {}]   ;;  %s23663_s9 = inlined_call_operand.vmem [shape: f32[1,32], index: 9, kind: input, shape index: {}]   ;;  %s23664_s10 = inlined_call_operand.hbm [shape: f32[32,64], index: 10, kind: input, shape index: {}]   ;;  %s23665_s11 = inlined_call_operand.vmem [shape: f32[1,64], index: 11, kind: input, shape index: {}]   ;;  %s23666_s12 = inlined_call_operand.vmem [shape: f32[64,32], index: 12, kind: input, shape index: {}]   ;;  %s23667_s13 = inlined_call_operand.vmem [shape: f32[1,32], index: 13, kind: input, shape index: {}]   ;;  %s23668_s14 = inlined_call_operand.vmem [shape: f32[1,32], index: 14, kind: input, shape index: {}]   ;;  %s23669_s15 = inlined_call_operand.vmem [shape: f32[1,32], index: 15, kind: input, shape index: {}]   ;;  %s23670_s16 = inlined_call_operand.hbm [shape: f32[16,32], index: 16, kind: output, shape index: {}]  }
   0x1   :  { %23671 = sst [smem:[#allocation15_spill]] %s23654_s0 }
   0x2   :  { %21 = vsyncpa [#allocation3], 0 }
   0x3   :  { %22 = vsyncpa [#allocation6], 0 }
   0x4   :  { %23 = vsyncpa [#allocation9], 0 }
   0x5   :  { %24 = vsyncpa [#allocation4], 0  ;;  %s20876_s21 = smov [#allocation5]   ;;  %s20877_s23 = smov [#allocation2]  }
   0x6   :  { %s48_s22 = sshll.u32 %s20876_s21, 4  ;;  %s30_s24 = sshll.u32 %s20877_s23, 4  ;;  %s49_s22 = int_to_ptr.vmem [resolvable:$true] %s48_s22  ;;  %s31_s24 = int_to_ptr.vmem [resolvable:$true] %s30_s24 }
   0x7   :  { %s20776_s25 = scalar_lea.vmem %s49_s22, 512  ;;  %p20781_p1 = scmp.lt.s32.totalorder %s49_s22, %s49_s22 }
   0x8   :  { %p20777_p0 = scmp.ne.s32.totalorder %s49_s22, %s20776_s25  ;;  %p20782_p2 = scmp.lt.s32.totalorder %s20776_s25, %s20776_s25 }
   0xa   :  { %p20783_p3 = por %p20782_p2, %p20781_p1 }
   0xc   :  { %p20784_p4 = pnand %p20783_p3, %p20777_p0 }
   0xe   :  { %20787 = shalt.err (!%p20784_p4)
}
   0xf   :  { %s20878_s26 = smov 128   ;;  %s20879_s27 = smov 8  }
  0x10   :  { %54 = dma.hbm_to_vmem [thread:$0]  %s23658_s4, 512, %s49_s22, [#allocation6], %s20878_s26, %s20878_s26, %s20879_s27  }
  0x11   :  { %s20796_s30 = scalar_lea.vmem %s31_s24, 256  ;;  %p20801_p6 = scmp.lt.s32.totalorder %s31_s24, %s31_s24 }
  0x12   :  { %p20797_p5 = scmp.ne.s32.totalorder %s31_s24, %s20796_s30  ;;  %p20802_p7 = scmp.lt.s32.totalorder %s20796_s30, %s20796_s30 }
  0x14   :  { %p20803_p8 = por %p20802_p7, %p20801_p6 }
  0x16   :  { %p20804_p9 = pnand %p20803_p8, %p20797_p5 }
  0x18   :  { %20807 = shalt.err (!%p20804_p9)
}
  0x19   :  { %s23672_s18 = sld [smem:[#allocation15_spill]]  ;;  %s20880_s19 = smov [#allocation7]  }
  0x1a   :  { %s64_s20 = sshll.u32 %s20880_s19, 4  ;;  %s20881_s21 = smov [#allocation8]   ;;  %s65_s20 = int_to_ptr.vmem [resolvable:$true] %s64_s20 }
  0x1b   :  { %s80_s23 = sshll.u32 %s20881_s21, 4  ;;  %s20816_s4 = scalar_lea.vmem %s65_s20, 1024  ;;  %s81_s23 = int_to_ptr.vmem [resolvable:$true] %s80_s23 }
  0x1c   :  { %p20817_p10 = scmp.ne.s32.totalorder %s65_s20, %s20816_s4  ;;  %p20821_p11 = scmp.lt.s32.totalorder %s65_s20, %s65_s20 }
  0x1d   :  { %p20822_p12 = scmp.lt.s32.totalorder %s20816_s4, %s20816_s4 }
  0x1f   :  { %36 = dma.hbm_to_vmem [thread:$0]  %s23672_s18, 256, %s31_s24, [#allocation3], %s20878_s26, %s20878_s26, %s20879_s27  }
  0x20   :  { %p20823_p13 = por %p20822_p12, %p20821_p11 }
  0x22   :  { %p20824_p0 = pnand %p20823_p13, %p20817_p10 }
  0x24   :  { %20827 = shalt.err (!%p20824_p0)
}
  0x25   :  { %70 = dma.hbm_to_vmem [thread:$0]  %s23661_s7, 1024, %s65_s20, [#allocation6], %s20878_s26, %s20878_s26, %s20879_s27  }
  0x26   :  { %s20836_s24 = scalar_lea.vmem %s81_s23, 512  ;;  %p20841_p2 = scmp.lt.s32.totalorder %s81_s23, %s81_s23 }
  0x27   :  { %p20837_p1 = scmp.ne.s32.totalorder %s81_s23, %s20836_s24  ;;  %p20842_p3 = scmp.lt.s32.totalorder %s20836_s24, %s20836_s24 }
  0x29   :  { %p20843_p4 = por %p20842_p3, %p20841_p2 }
  0x2b   :  { %p20844_p5 = pnand %p20843_p4, %p20837_p1 }
  0x2d   :  { %20847 = shalt.err (!%p20844_p5)
}
  0x2e   :  { %86 = dma.hbm_to_vmem [thread:$0]  %s23664_s10, 512, %s81_s23, [#allocation9], %s20878_s26, %s20878_s26, %s20879_s27  }
  0x2f   :  { %20868 = dma.done.wait [#allocation3], 256  }
  0x30   :  { %20869 = vsyncadd [#allocation3], 4294967040 }
  0x31   :  { %20870 = dma.done.wait [#allocation6], 1536  }
  0x32   :  { %20871 = vsyncadd [#allocation6], 4294965760 }
  0x33   :  { %20872 = dma.done.wait [#allocation9], 512  }
  0x34   :  { %20873 = vsyncadd [#allocation9], 4294966784  ;;  %vm122_vm0 = vcmask 261120   ;;  %v114_v0 = vld [vmem:[%s23656_s2 + $0x18] sm:$0xff]  ;;  %v113_v1 = vld [vmem:[%s23656_s2 + $0x10] sm:$0xff]  ;;  %s20883_s23 = smov 120  }
  0x35   :  { %v112_v2 = vld [vmem:[%s23656_s2 + $0x8] sm:$0xff]  ;;  %v21014_v3 = vand.u32 4294901760, %v114_v0  ;;  %v21016_v4 = vand.u32 4294901760, %v113_v1  ;;  %v111_v6 = vld [vmem:[%s23656_s2] sm:$0xff]  ;;  %s20884_s4 = smov 104   ;;  %vm1701_vm1 = vcmask 64512  }
  0x36   :  { %v21018_v5 = vand.u32 4294901760, %v112_v2  ;;  %v109_v7 = vld [vmem:[#allocation2] sm:$0xff]  ;;  %v110_v8 = vld [vmem:[#allocation2 + $0x8] sm:$0xff]  ;;  %v21023_v9 = vand.u32 4294901760, %v111_v6  ;;  %vm20886_vm2 = vmmov 0   ;;  %s20887_s24 = smov 96  }
  0x37   :  { %v124_v10 = vsel %vm122_vm0, %v109_v7, 0  ;;  %v127_v11 = vsel %vm122_vm0, %v110_v8, 0  ;;  %19434 = vmatprep.subr.mxu0 %v21014_v3  ;;  %v244_v12 = vsub.f32 %v114_v0, %v21014_v3  ;;  %v251_v14 = vsub.f32 %v113_v1, %v21016_v4  ;;  %v18850_v39 = vld [vmem:[%s23657_s3] ss:$0 sm:$0xff]  ;;  %s20882_s3 = smov 112   ;;  %s20893_s22 = smov 16  }
  0x38   :  { %v21029_v13 = vand.u32 4294901760, %v124_v10  ;;  %v21032_v15 = vand.u32 4294901760, %v127_v11  ;;  %19435 = vmatpush3.msra.mxu0 %v21014_v3  ;;  %v258_v16 = vsub.f32 %v112_v2, %v21018_v5  ;;  %v265_v17 = vsub.f32 %v111_v6, %v21023_v9  ;;  %v1693_v1 = vld [vmem:[%s23660_s6] sm:$0xff]  ;;  %s20894_s25 = smov 24   ;;  %s20895_s7 = smov [#allocation10]  }
  0x39   :  { %19436 = vmatprep.subr.mxu0 %v21016_v4  ;;  %v245_v18 = vand.u32 4294901760, %v244_v12  ;;  %v252_v20 = vand.u32 4294901760, %v251_v14  ;;  %v1706_v2 = vsel %vm1701_vm1, %v1693_v1, 0  ;;  %s18836_s30 = sshll.u32 %s20895_s7, 4  ;;  %s18837_s30 = int_to_ptr.vmem [resolvable:$true] %s18836_s30 }
  0x3a   :  { %v199_v19 = vsub.f32 %v124_v10, %v21029_v13  ;;  %v209_v21 = vsub.f32 %v127_v11, %v21032_v15  ;;  %19453 = vmatprep.mubr.f32.mxu1 %v21029_v13  ;;  %19437 = vmatpush3.msra.mxu0 %v21016_v4  ;;  %v259_v22 = vand.u32 4294901760, %v258_v16  ;;  %v266_v23 = vand.u32 4294901760, %v265_v17  ;;  %p20853_p7 = scmp.lt.s32.totalorder %s18837_s30, %s18837_s30 }
  0x3b   :  { %19438 = vmatprep.subr.mxu0 %v21018_v5  ;;  %v246_v24 = vsub.f32 %v244_v12, %v245_v18  ;;  %v253_v26 = vsub.f32 %v251_v14, %v252_v20  ;;  %v684_v11 = vlaneseq }
  0x3c   :  { %v200_v25 = vand.u32 4294901760, %v199_v19  ;;  %v210_v27 = vand.u32 4294901760, %v209_v21  ;;  %19439 = vmatpush3.msra.mxu0 %v21018_v5  ;;  %v260_v28 = vsub.f32 %v258_v16, %v259_v22  ;;  %v267_v29 = vsub.f32 %v265_v17, %v266_v23 }
  0x3d   :  { %19440 = vmatprep.subr.mxu0 %v21023_v9  ;;  %v247_v30 = vand.u32 4294901760, %v246_v24  ;;  %v254_v32 = vand.u32 4294901760, %v253_v26 }
  0x3e   :  { %v201_v31 = vsub.f32 %v199_v19, %v200_v25  ;;  %v211_v33 = vsub.f32 %v209_v21, %v210_v27  ;;  %19441 = vmatpush3.msra.mxu0 %v21023_v9  ;;  %v261_v36 = vand.u32 4294901760, %v260_v28  ;;  %v268_v37 = vand.u32 4294901760, %v267_v29 }
  0x3f   :  { %19445 = vmatprep.subr.mxu1 %v247_v30  ;;  %19456 = vmatprep.subr.mxu0 %v244_v12 }
  0x40   :  { %v202_v34 = vand.u32 4294901760, %v201_v31  ;;  %v212_v35 = vand.u32 4294901760, %v211_v33  ;;  %19446 = vmatpush3.msra.mxu1 %v247_v30 }
  0x41   :  { %19447 = vmatprep.subr.mxu1 %v254_v32 }
  0x42   :  { %19442 = vmatprep.mubr.f32.mxu0 %v202_v34  ;;  %19448 = vmatpush3.msra.mxu1 %v254_v32 }
  0x43   :  { %19443 = vmatmul.mubr.f32.vlgmr.msra.gmra.mxu0 %v212_v35  ;;  %19449 = vmatprep.subr.mxu1 %v261_v36 }
  0x44   :  { %19457 = vmatpush3.msra.mxu0 %v244_v12  ;;  %19450 = vmatpush3.msra.mxu1 %v261_v36 }
  0x45   :  { %19458 = vmatprep.subr.mxu0 %v251_v14  ;;  %19451 = vmatprep.subr.mxu1 %v268_v37 }
  0x46   :  { %19459 = vmatpush3.msra.mxu0 %v251_v14  ;;  %19452 = vmatpush3.msra.mxu1 %v268_v37  ;;  %v20889_v14 = vmov 1934713408  }
  0x47   :  { %19460 = vmatprep.subr.mxu0 %v258_v16  ;;  %19454 = vmatmul.mubr.f32.vlgmr.msra.gmra.mxu1 %v21032_v15 }
  0x48   :  { %19461 = vmatpush3.msra.mxu0 %v258_v16  ;;  %19467 = vmatprep.subr.mxu1 %v21014_v3 }
  0x49   :  { %19462 = vmatprep.subr.mxu0 %v265_v17  ;;  %19464 = vmatprep.mubr.f32.mxu0 %v199_v19 }
  0x4a   :  { %19463 = vmatpush3.msra.mxu0 %v265_v17  ;;  %19468 = vmatpush3.msra.mxu1 %v21014_v3  ;;  %v21117_v17 = vshrl.u32 %v684_v11, 7 }
  0x4b   :  { %19465 = vmatmul.mubr.f32.vlgmr.msra.gmra.mxu0 %v209_v21  ;;  %19469 = vmatprep.subr.mxu1 %v21016_v4 }
  0x4c   :  { %19478 = vmatprep.subr.mxu0 %v245_v18  ;;  %19470 = vmatpush3.msra.mxu1 %v21016_v4 }
  0x4d   :  { %19479 = vmatpush3.msra.mxu0 %v245_v18  ;;  %19471 = vmatprep.subr.mxu1 %v21018_v5 }
  0x4e   :  { %19480 = vmatprep.subr.mxu0 %v252_v20  ;;  %19472 = vmatpush3.msra.mxu1 %v21018_v5 }
  0x4f   :  { %19481 = vmatpush3.msra.mxu0 %v252_v20  ;;  %19473 = vmatprep.subr.mxu1 %v21023_v9 }
  0x50   :  { %19482 = vmatprep.subr.mxu0 %v259_v22  ;;  %19474 = vmatpush3.msra.mxu1 %v21023_v9 }
  0x51   :  { %19475 = vmatprep.mubr.f32.mxu1 %v200_v25  ;;  %19483 = vmatpush3.msra.mxu0 %v259_v22 }
  0x52   :  { %19476 = vmatmul.mubr.f32.vlgmr.msra.gmra.mxu1 %v210_v27  ;;  %19484 = vmatprep.subr.mxu0 %v266_v23 }
  0x53   :  { %19489 = vmatprep.subr.mxu1 %v21014_v3  ;;  %19485 = vmatpush3.msra.mxu0 %v266_v23 }
  0x54   :  { %19486 = vmatprep.mubr.f32.mxu0 %v21029_v13  ;;  %19490 = vmatpush3.msra.mxu1 %v21014_v3  ;;  %v21090_v3 = vand.u32 4294901760, %v1706_v2 }
  0x55   :  { %19487 = vmatmul.mubr.f32.vlgmr.msra.gmra.mxu0 %v21032_v15  ;;  %19491 = vmatprep.subr.mxu1 %v21016_v4 }
  0x56   :  { %19497 = vmatprep.mubr.f32.mxu1 %v21029_v13  ;;  %19492 = vmatpush3.msra.mxu1 %v21016_v4  ;;  %v20885_v4 = vmov 0.0  }
  0x57   :  { %19493 = vmatprep.subr.mxu1 %v21018_v5  ;;  %19500 = vmatprep.subr.mxu0 %v20885_v4 }
  0x58   :  { %19494 = vmatpush3.msra.mxu1 %v21018_v5  ;;  %v21096_v5 = vsub.f32 %v1706_v2, %v21090_v3  ;;  %19502 = vmatprep.mubr.msk.f32.mxu0 %vm20886_vm2, %v20885_v4 }
  0x59   :  { %19495 = vmatprep.subr.mxu1 %v21023_v9  ;;  %19501 = vmatpush3.xpose.msra.mxu0 %v21090_v3 }
  0x5a   :  { %19496 = vmatpush3.msra.mxu1 %v21023_v9  ;;  %v1817_v6 = vand.u32 4294901760, %v21096_v5  ;;  %19510 = vmatprep.subr.mxu0 %v20885_v4  ;;  %v20888_v9 = vmov 1983009808  }
  0x5b   :  { %19498 = vmatmul.mubr.f32.vlgmr.msra.gmra.mxu1 %v21032_v15  ;;  %19505 = vmatprep.subr.mxu1 %v20885_v4  ;;  %v682_v10 = vunpack.c.l.s4 %v20888_v9  ;;  %v714_v15 = vunpack.c.l.s4 %v20889_v14  ;;  %v1694_v9 = vld [vmem:[%s23660_s6 + $0x8] sm:$0xff] }
  0x5c   :  { %19507 = vmatprep.mubr.msk.f32.mxu1 %vm20886_vm2, %v20885_v4  ;;  %v1818_v7 = vsub.f32 %v21096_v5, %v1817_v6 }
  0x5d   :  { %v683_v16 = vunpack.c.0.s8 %v682_v10  ;;  %v715_v20 = vunpack.c.0.s8 %v714_v15 }
  0x5e   :  { %v1819_v8 = vand.u32 4294901760, %v1818_v7 }
  0x5f   :  { %v21120_v21 = vsub.s32 %v683_v16, %v21117_v17  ;;  %v21125_v30 = vsub.s32 %v715_v20, %v21117_v17  ;;  %v2158_v20 = vsel %vm1701_vm1, %v1694_v9, 0 }
  0x60   :  { %19506 = vmatpush3.xpose.msra.mxu1 %v1819_v8 }
  0x61   :  { %19515 = vmatprep.subr.mxu1 %v20885_v4 }
 0x103   :  { %v19444_v38 = vpop.f32.mrf.mxu0 }
 0x104   :  { %v215_v42 = vadd.f32 %v19444_v38, %v18850_v39 }
 0x105   :  { %v204_v40 = vpop.f32.mrf.mxu0 }
 0x106   :  { %v205_v43 = vadd.f32 %v18850_v39, %v204_v40 }
 0x107   :  { %v19455_v41 = vpop.f32.mrf.mxu1 }
 0x108   :  { %v312_v46 = vadd.f32 %v19455_v41, %v215_v42 }
 0x109   :  { %v305_v44 = vpop.f32.mrf.mxu1 }
 0x10a   :  { %v306_v48 = vadd.f32 %v305_v44, %v205_v43 }
 0x10b   :  { %v19466_v45 = vpop.f32.mrf.mxu0 }
 0x10c   :  { %v399_v50 = vadd.f32 %v19466_v45, %v312_v46 }
 0x10d   :  { %v391_v49 = vpop.f32.mrf.mxu0 }
 0x10e   :  { %v392_v53 = vadd.f32 %v391_v49, %v306_v48 }
 0x112   :  { %v19477_v47 = vpop.f32.mrf.mxu1 }
 0x113   :  { %v484_v54 = vadd.f32 %v19477_v47, %v399_v50 }
 0x114   :  { %v475_v51 = vpop.f32.mrf.mxu1 }
 0x115   :  { %v19488_v52 = vpop.f32.mrf.mxu0  ;;  %v476_v55 = vadd.f32 %v475_v51, %v392_v53 }
 0x116   :  { %v573_v57 = vadd.f32 %v19488_v52, %v484_v54 }
 0x117   :  { %v566_v56 = vpop.f32.mrf.mxu0 }
 0x118   :  { %v567_v59 = vadd.f32 %v566_v56, %v476_v55 }
 0x11b   :  { %v19499_v58 = vpop.f32.mrf.mxu1 }
 0x11c   :  { %v21070_v60 = vadd.f32 %v19499_v58, %v573_v57 }
 0x11d   :  { %v647_v61 = vpop.f32.mrf.mxu1 }
 0x11e   :  { %v21072_v62 = vadd.f32 %v647_v61, %v567_v59  ;;  %v21075_v63 = vmul.f32 0.35355338, %v21070_v60 }
 0x120   :  { %669 = vrot.lane.b32.xlu1 %v21075_v63, %s20882_s3  ;;  %663 = vrot.lane.b32.xlu0 %v21075_v63, %s20883_s23  ;;  %v657_v0 = vmul.f32 0.35355338, %v21072_v62 }
 0x124   :  { %667 = vrot.lane.b32.xlu1 %v657_v0, %s20882_s3  ;;  %661 = vrot.lane.b32.xlu0 %v657_v0, %s20883_s23 }
 0x128   :  { %675 = vrot.lane.b32.xlu1 %v21075_v63, %s20884_s4  ;;  %673 = vrot.lane.b32.xlu0 %v657_v0, %s20884_s4 }
 0x12c   :  { %957 = vrot.lane.b32.xlu1 %v21072_v62, %s20882_s3  ;;  %953 = vrot.lane.b32.xlu0 %v21072_v62, %s20883_s23 }
 0x130   :  { %955 = vrot.lane.b32.xlu1 %v21070_v60, %s20883_s23  ;;  %961 = vrot.lane.b32.xlu0 %v21072_v62, %s20884_s4 }
 0x134   :  { %963 = vrot.lane.b32.xlu1 %v21070_v60, %s20884_s4  ;;  %959 = vrot.lane.b32.xlu0 %v21070_v60, %s20882_s3 }
 0x138   :  { %965 = vrot.lane.b32.xlu0 %v21072_v62, %s20887_s24 }
 0x192   :  { %v21115_v12 = vpop.permute.xlu1 %669  ;;  %v664_v13 = vpop.permute.xlu0 %663 }
 0x193   :  { %v747_v22 = vcombine.low %v21075_v63, %v21115_v12  ;;  %v748_v53 = vcombine.high %v21075_v63, %v21115_v12 }
 0x195   :  { %v755_v31 = vrot.slane %v747_v22, %v21120_v21  ;;  %v762_v14 = vrot.slane %v748_v53, %v21120_v21 }
 0x196   :  { %v668_v18 = vpop.permute.xlu1 %667  ;;  %v662_v19 = vpop.permute.xlu0 %661 }
 0x197   :  { %v679_v23 = vcombine.low %v657_v0, %v668_v18  ;;  %v680_v24 = vcombine.high %v657_v0, %v668_v18 }
 0x199   :  { %v687_v35 = vrot.slane %v679_v23, %v21120_v21  ;;  %v694_v36 = vrot.slane %v680_v24, %v21120_v21 }
 0x19a   :  { %v676_v25 = vpop.permute.xlu1 %675  ;;  %v674_v26 = vpop.permute.xlu0 %673 }
 0x19b   :  { %v763_v27 = vcombine.low %v664_v13, %v676_v25  ;;  %v695_v28 = vcombine.low %v662_v19, %v674_v26  ;;  %v696_v29 = vcombine.high %v662_v19, %v674_v26  ;;  %v764_v45 = vcombine.high %v664_v13, %v676_v25 }
 0x19d   :  { %v771_v32 = vrot.slane %v763_v27, %v21120_v21  ;;  %v703_v33 = vrot.slane %v695_v28, %v21120_v21  ;;  %v710_v34 = vrot.slane %v696_v29, %v21120_v21  ;;  %v778_v63 = vrot.slane %v764_v45, %v21120_v21 }
 0x19e   :  { %v21133_v37 = vpop.permute.xlu1 %957  ;;  %v21135_v38 = vpop.permute.xlu0 %953 }
 0x19f   :  { %v779_v39 = vcombine.low %v755_v31, %v771_v32  ;;  %v780_v40 = vcombine.high %v755_v31, %v771_v32  ;;  %973 = vrot.lane.b32.xlu0 %v21133_v37, %s20887_s24  ;;  %v711_v41 = vcombine.low %v687_v35, %v703_v33  ;;  %v712_v42 = vcombine.high %v687_v35, %v703_v33 }
 0x1a0   :  { %v727_v43 = vcombine.low %v694_v36, %v710_v34  ;;  %v728_v44 = vcombine.high %v694_v36, %v710_v34  ;;  %969 = vrot.lane.b32.xlu1 %v21135_v38, %s20887_s24  ;;  %v795_v22 = vcombine.low %v762_v14, %v778_v63  ;;  %v796_v23 = vcombine.high %v762_v14, %v778_v63 }
 0x1a1   :  { %v787_v46 = vrot.slane %v779_v39, %v21125_v30  ;;  %v794_v47 = vrot.slane %v780_v40, %v21125_v30  ;;  %v719_v48 = vrot.slane %v711_v41, %v21125_v30  ;;  %v726_v49 = vrot.slane %v712_v42, %v21125_v30 }
 0x1a2   :  { %v735_v50 = vrot.slane %v727_v43, %v21125_v30  ;;  %v742_v51 = vrot.slane %v728_v44, %v21125_v30  ;;  %v21147_v52 = vpop.permute.xlu0 %961  ;;  %v21157_v1 = vpop.permute.xlu1 %955  ;;  %v21201_v36 = vand.u32 4294901760, %v2158_v20  ;;  %v803_v39 = vrot.slane %v795_v22, %v21125_v30 }
 0x1a3   :  { %v883_v54 = vcombine.low %v787_v46, %v794_v47  ;;  %v18853_v55 = vcombine.high %v787_v46, %v794_v47  ;;  %967 = vrot.lane.b32.xlu0 %v21070_v60, %s20887_s24  ;;  %v815_v56 = vcombine.low %v719_v48, %v726_v49  ;;  %v18851_v57 = vcombine.high %v719_v48, %v726_v49 }
 0x1a4   :  { %v831_v58 = vcombine.low %v735_v50, %v742_v51  ;;  %v18852_v59 = vcombine.high %v735_v50, %v742_v51  ;;  %977 = vrot.lane.b32.xlu1 %v21147_v52, %s20887_s24  ;;  %v810_v40 = vrot.slane %v796_v23, %v21125_v30  ;;  %v21216_v50 = vsub.f32 %v2158_v20, %v21201_v36 }
 0x1a5   :  { %v890_v61 = vrot.slane %v883_v54, %v21120_v21  ;;  %v898_v0 = vrot.slane %v18853_v55, %v21120_v21  ;;  %v822_v2 = vrot.slane %v815_v56, %v21120_v21  ;;  %v830_v7 = vrot.slane %v18851_v57, %v21120_v21 }
 0x1a6   :  { %v21162_v8 = vpop.permute.xlu0 %959  ;;  %v838_v12 = vrot.slane %v831_v58, %v21120_v21  ;;  %v846_v13 = vrot.slane %v18852_v59, %v21120_v21  ;;  %v21187_v28 = vpop.permute.xlu1 %963  ;;  %v899_v48 = vcombine.low %v803_v39, %v810_v40  ;;  %v18854_v56 = vcombine.high %v803_v39, %v810_v40  ;;  %v1695_v59 = vld [vmem:[%s23660_s6 + $0x10] sm:$0xff]  ;;  %v1696_v40 = vld [vmem:[%s23660_s6 + $0x18] sm:$0xff] }
 0x1a7   :  { %v915_v10 = vcombine.low %v890_v61, %v898_v0  ;;  %v916_v11 = vcombine.high %v890_v61, %v898_v0  ;;  %975 = vrot.lane.b32.xlu0 %v21162_v8, %s20887_s24  ;;  %v847_v15 = vcombine.low %v822_v2, %v830_v7  ;;  %v848_v16 = vcombine.high %v822_v2, %v830_v7 }
 0x1a8   :  { %971 = vrot.lane.b32.xlu1 %v21157_v1, %s20887_s24  ;;  %v863_v26 = vcombine.low %v838_v12, %v846_v13  ;;  %v864_v27 = vcombine.high %v838_v12, %v846_v13  ;;  %v2269_v0 = vand.u32 4294901760, %v21216_v50  ;;  %v906_v63 = vrot.slane %v899_v48, %v21120_v21 }
 0x1a9   :  { %v21175_v18 = vrot.slane %v915_v10, %v21125_v30  ;;  %v21178_v19 = vrot.slane %v916_v11, %v21125_v30  ;;  %v21182_v24 = vrot.slane %v847_v15, %v21125_v30  ;;  %v21185_v25 = vrot.slane %v848_v16, %v21125_v30 }
 0x1aa   :  { %v21208_v43 = vrot.slane %v863_v26, %v21125_v30  ;;  %v21211_v44 = vrot.slane %v864_v27, %v21125_v30  ;;  %v2610_v7 = vsel %vm1701_vm1, %v1695_v59, 0  ;;  %v914_v9 = vrot.slane %v18854_v56, %v21120_v21 }
 0x1ab   :  { %v18867_v29 = vcombine.low %v21175_v18, %v21178_v19  ;;  %v18869_v31 = vcombine.high %v21175_v18, %v21178_v19  ;;  %v18863_v32 = vcombine.low %v21182_v24, %v21185_v25  ;;  %v18865_v33 = vcombine.high %v21182_v24, %v21185_v25 }
 0x1ac   :  { %979 = vrot.lane.b32.xlu1 %v21187_v28, %s20887_s24  ;;  %v879_v51 = vcombine.low %v21182_v24, %v21208_v43  ;;  %v880_v53 = vcombine.high %v21182_v24, %v21208_v43  ;;  %v881_v54 = vcombine.low %v21185_v25, %v21211_v44  ;;  %v882_v55 = vcombine.high %v21185_v25, %v21211_v44 }
 0x1ad   :  { %v1597_v34 = vrot.slane %v18867_v29, %v21120_v21  ;;  %v1613_v35 = vrot.slane %v18869_v31, %v21120_v21  ;;  %v1565_v41 = vrot.slane %v18863_v32, %v21120_v21  ;;  %v1581_v42 = vrot.slane %v18865_v33, %v21120_v21 }
 0x1ae   :  { %v2270_v14 = vsub.f32 %v21216_v50, %v2269_v0  ;;  %v21245_v15 = vand.u32 4294901760, %v2610_v7  ;;  %v931_v22 = vcombine.low %v906_v63, %v914_v9  ;;  %v932_v23 = vcombine.high %v906_v63, %v914_v9 }
 0x1af   :  { %v1653_v45 = vcombine.low %v1597_v34, %v1613_v35  ;;  %v1621_v46 = vcombine.low %v1565_v41, %v1581_v42  ;;  %v1622_v11 = vcombine.high %v1565_v41, %v1581_v42  ;;  %v1654_v12 = vcombine.high %v1597_v34, %v1613_v35 }
 0x1b0   :  { %v2271_v31 = vand.u32 4294901760, %v2270_v14  ;;  %v21260_v32 = vsub.f32 %v2610_v7, %v21245_v15  ;;  %v21267_v35 = vrot.slane %v931_v22, %v21125_v30  ;;  %v21270_v39 = vrot.slane %v932_v23, %v21125_v30  ;;  %v1697_v14 = vld [vmem:[%s23660_s6 + $0x20] sm:$0xff] }
 0x1b1   :  { %v1661_v47 = vrot.slane %v1653_v45, %v21125_v30  ;;  %v1629_v49 = vrot.slane %v1621_v46, %v21125_v30  ;;  %v21251_v26 = vrot.slane %v1622_v11, %v21125_v30  ;;  %v21254_v27 = vrot.slane %v1654_v12, %v21125_v30 }
 0x1b2   :  { %v2721_v41 = vand.u32 4294901760, %v21260_v32  ;;  %v3062_v45 = vsel %vm1701_vm1, %v1696_v40, 0  ;;  %v948_v48 = vcombine.high %v21175_v18, %v21267_v35  ;;  %v18866_v63 = vcombine.high %v21208_v43, %v21211_v44 }
 0x1b3   :  { %v1685_v57 = vcombine.low %v1629_v49, %v1661_v47  ;;  %v1686_v58 = vcombine.high %v1629_v49, %v1661_v47  ;;  %v947_v47 = vcombine.low %v21175_v18, %v21267_v35  ;;  %v949_v49 = vcombine.low %v21178_v19, %v21270_v39 }
 0x1b4   :  { %v2722_v56 = vsub.f32 %v21260_v32, %v2721_v41  ;;  %v950_v7 = vcombine.high %v21178_v19, %v21270_v39  ;;  %v21353_v22 = vrot.slane %v18866_v63, %v21120_v21 }
 0x1b5   :  { %v1703_v61 = vsel %vm1701_vm1, %v1685_v57, 0  ;;  %v2155_v10 = vsel %vm1701_vm1, %v1686_v58, 0  ;;  %v21302_v57 = vand.u32 4294901760, %v3062_v45 }
 0x1b6   :  { %v21232_v2 = vand.u32 4294901760, %v1703_v61  ;;  %v21248_v20 = vand.u32 4294901760, %v2155_v10  ;;  %v2723_v9 = vand.u32 4294901760, %v2722_v56 }
 0x1b8   :  { %v1775_v13 = vsub.f32 %v1703_v61, %v21232_v2  ;;  %19508 = vmatmul.mubr.f32.vlgmr.msra.gmra.mxu1 %v21232_v2  ;;  %v21264_v34 = vsub.f32 %v2155_v10, %v21248_v20  ;;  %v18864_v61 = vcombine.low %v21208_v43, %v21211_v44  ;;  %v21327_v10 = vsub.f32 %v3062_v45, %v21302_v57 }
 0x1b9   :  { %19516 = vmatpush3.xpose.msra.mxu1 %v21090_v3  ;;  %19517 = vmatprep.mubr.msk.f32.mxu1 %vm20886_vm2, %v20885_v4 }
 0x1ba   :  { %v1776_v16 = vand.u32 4294901760, %v1775_v13  ;;  %19525 = vmatprep.subr.mxu1 %v20885_v4  ;;  %v2228_v42 = vand.u32 4294901760, %v21264_v34  ;;  %v3173_v23 = vand.u32 4294901760, %v21327_v10 }
 0x1bc   :  { %19518 = vmatmul.mubr.f32.vlgmr.msra.gmra.mxu1 %v1776_v16  ;;  %v1777_v29 = vsub.f32 %v1775_v13, %v1776_v16  ;;  %v2229_v58 = vsub.f32 %v21264_v34, %v2228_v42  ;;  %v21350_v16 = vrot.slane %v18864_v61, %v21120_v21 }
 0x1bd   :  { %19526 = vmatpush3.xpose.msra.mxu1 %v21090_v3  ;;  %19527 = vmatprep.mubr.msk.f32.mxu1 %vm20886_vm2, %v20885_v4  ;;  %v1687_v3 = vcombine.low %v21251_v26, %v21254_v27 }
 0x1be   :  { %v1778_v33 = vand.u32 4294901760, %v1777_v29  ;;  %19535 = vmatprep.subr.mxu1 %v20885_v4  ;;  %v2230_v11 = vand.u32 4294901760, %v2229_v58 }
 0x1bf   :  { %v2607_v46 = vsel %vm1701_vm1, %v1687_v3, 0  ;;  %v3174_v3 = vsub.f32 %v21327_v10, %v3173_v23 }
 0x1c0   :  { %19503 = vmatmul.mubr.f32.vlgmr.msra.gmra.mxu0 %v1778_v33  ;;  %19528 = vmatmul.mubr.f32.vlgmr.msra.gmra.mxu1 %v21232_v2  ;;  %v21309_v59 = vand.u32 4294901760, %v2607_v46 }
 0x1c1   :  { %19511 = vmatpush3.xpose.msra.mxu0 %v21096_v5  ;;  %19536 = vmatpush3.xpose.msra.mxu1 %v2271_v31  ;;  %v18868_v5 = vcombine.low %v21267_v35, %v21270_v39  ;;  %v1637_v31 = vcombine.low %v21350_v16, %v21353_v22  ;;  %v3175_v45 = vand.u32 4294901760, %v3174_v3  ;;  %v1638_v3 = vcombine.high %v21350_v16, %v21353_v22 }
 0x1c2   :  { %19512 = vmatprep.mubr.msk.f32.mxu0 %vm20886_vm2, %v20885_v4  ;;  %19537 = vmatprep.mubr.msk.f32.mxu1 %vm20886_vm2, %v20885_v4  ;;  %v21334_v12 = vsub.f32 %v2607_v46, %v21309_v59 }
 0x1c3   :  { %19520 = vmatprep.subr.mxu0 %v20885_v4  ;;  %19545 = vmatprep.subr.mxu1 %v20885_v4 }
 0x1c4   :  { %19513 = vmatmul.mubr.f32.vlgmr.msra.gmra.mxu0 %v1775_v13  ;;  %19538 = vmatmul.mubr.f32.vlgmr.msra.gmra.mxu1 %v21248_v20 }
 0x1c5   :  { %19521 = vmatpush3.xpose.msra.mxu0 %v1817_v6  ;;  %19546 = vmatpush3.xpose.msra.mxu1 %v21201_v36  ;;  %v18870_v6 = vcombine.high %v21267_v35, %v21270_v39 }
 0x1c6   :  { %19522 = vmatprep.mubr.msk.f32.mxu0 %vm20886_vm2, %v20885_v4  ;;  %19547 = vmatprep.mubr.msk.f32.mxu1 %vm20886_vm2, %v20885_v4 }
 0x1c7   :  { %19530 = vmatprep.subr.mxu0 %v20885_v4  ;;  %19555 = vmatprep.subr.mxu1 %v20885_v4  ;;  %v21340_v13 = vrot.slane %v18870_v6, %v21120_v21 }
 0x1c8   :  { %19523 = vmatmul.mubr.f32.vlgmr.msra.gmra.mxu0 %v21232_v2  ;;  %19548 = vmatmul.mubr.f32.vlgmr.msra.gmra.mxu1 %v2228_v42  ;;  %v21337_v2 = vrot.slane %v18868_v5, %v21120_v21 }
 0x1c9   :  { %19531 = vmatpush3.xpose.msra.mxu0 %v21201_v36  ;;  %19556 = vmatpush3.xpose.msra.mxu1 %v21201_v36  ;;  %v1688_v36 = vcombine.high %v21251_v26, %v21254_v27  ;;  %v2680_v26 = vand.u32 4294901760, %v21334_v12  ;;  %v3514_v27 = vsel %vm1701_vm1, %v1697_v14, 0 }
 0x1ca   :  { %19532 = vmatprep.mubr.msk.f32.mxu0 %vm20886_vm2, %v20885_v4  ;;  %19557 = vmatprep.mubr.msk.f32.mxu1 %vm20886_vm2, %v20885_v4  ;;  %v1669_v33 = vcombine.low %v21337_v2, %v21340_v13  ;;  %v21379_v40 = vand.u32 4294901760, %v3514_v27 }
 0x1cb   :  { %19540 = vmatprep.subr.mxu0 %v20885_v4  ;;  %19565 = vmatprep.subr.mxu1 %v20885_v4  ;;  %v3059_v29 = vsel %vm1701_vm1, %v1688_v36, 0 }
 0x1cc   :  { %19533 = vmatmul.mubr.f32.vlgmr.msra.gmra.mxu0 %v2230_v11  ;;  %19558 = vmatmul.mubr.f32.vlgmr.msra.gmra.mxu1 %v21248_v20  ;;  %v21386_v42 = vand.u32 4294901760, %v3059_v29  ;;  %v21400_v46 = vsub.f32 %v3514_v27, %v21379_v40 }
 0x1cd   :  { %19541 = vmatpush3.xpose.msra.mxu0 %v21216_v50  ;;  %19566 = vmatpush3.xpose.msra.mxu1 %v2723_v9  ;;  %v21391_v50 = vrot.slane %v1637_v31, %v21125_v30 }
 0x1ce   :  { %19542 = vmatprep.mubr.msk.f32.mxu0 %vm20886_vm2, %v20885_v4  ;;  %19567 = vmatprep.mubr.msk.f32.mxu1 %vm20886_vm2, %v20885_v4  ;;  %v3131_v58 = vsub.f32 %v3059_v29, %v21386_v42  ;;  %v3625_v5 = vand.u32 4294901760, %v21400_v46 }
 0x1cf   :  { %19550 = vmatprep.subr.mxu0 %v20885_v4  ;;  %19575 = vmatprep.subr.mxu1 %v20885_v4 }
 0x1d0   :  { %19543 = vmatmul.mubr.f32.vlgmr.msra.gmra.mxu0 %v21264_v34  ;;  %19568 = vmatmul.mubr.f32.vlgmr.msra.gmra.mxu1 %v21309_v59  ;;  %v2681_v34 = vsub.f32 %v21334_v12, %v2680_v26  ;;  %v3132_v6 = vand.u32 4294901760, %v3131_v58  ;;  %v3626_v9 = vsub.f32 %v21400_v46, %v3625_v5 }
 0x1d1   :  { %19551 = vmatpush3.xpose.msra.mxu0 %v2269_v0  ;;  %19576 = vmatpush3.xpose.msra.mxu1 %v21245_v15  ;;  %v21394_v0 = vrot.slane %v1669_v33, %v21125_v30 }
 0x1d2   :  { %19552 = vmatprep.mubr.msk.f32.mxu0 %vm20886_vm2, %v20885_v4  ;;  %19577 = vmatprep.mubr.msk.f32.mxu1 %vm20886_vm2, %v20885_v4  ;;  %v2682_v56 = vand.u32 4294901760, %v2681_v34  ;;  %v1670_v34 = vcombine.high %v21337_v2, %v21340_v13 }
 0x1d3   :  { %19560 = vmatprep.subr.mxu0 %v20885_v4  ;;  %19585 = vmatprep.subr.mxu1 %v20885_v4 }
 0x1d4   :  { %19553 = vmatmul.mubr.f32.vlgmr.msra.gmra.mxu0 %v21248_v20  ;;  %19578 = vmatmul.mubr.f32.vlgmr.msra.gmra.mxu1 %v2680_v26  ;;  %v1698_v20 = vld [vmem:[%s23660_s6 + $0x28] sm:$0xff]  ;;  %v21497_v16 = vrot.slane %v1670_v34, %v21125_v30  ;;  %v966_v34 = vpop.permute.xlu0 %965 }
 0x1d5   :  { %19561 = vmatpush3.xpose.msra.mxu0 %v21245_v15  ;;  %19586 = vmatpush3.xpose.msra.mxu1 %v21245_v15  ;;  %v1689_v15 = vcombine.low %v21391_v50, %v21394_v0  ;;  %v3966_v61 = vsel %vm1701_vm1, %v1698_v20, 0 }
 0x1d6   :  { %19562 = vmatprep.mubr.msk.f32.mxu0 %vm20886_vm2, %v20885_v4  ;;  %19587 = vmatprep.mubr.msk.f32.mxu1 %vm20886_vm2, %v20885_v4  ;;  %v21433_v11 = vand.u32 4294901760, %v3966_v61 }
 0x1d7   :  { %19570 = vmatprep.subr.mxu0 %v20885_v4  ;;  %19595 = vmatprep.subr.mxu1 %v20885_v4  ;;  %v3511_v63 = vsel %vm1701_vm1, %v1689_v15, 0 }
 0x1d8   :  { %19563 = vmatmul.mubr.f32.vlgmr.msra.gmra.mxu0 %v2682_v56  ;;  %19588 = vmatmul.mubr.f32.vlgmr.msra.gmra.mxu1 %v21309_v59  ;;  %v21439_v36 = vand.u32 4294901760, %v3511_v63 }
 0x1d9   :  { %19571 = vmatpush3.xpose.msra.mxu0 %v21260_v32  ;;  %19596 = vmatpush3.xpose.msra.mxu1 %v3175_v45  ;;  %v3627_v32 = vand.u32 4294901760, %v3626_v9 }
 0x1da   :  { %19572 = vmatprep.mubr.msk.f32.mxu0 %vm20886_vm2, %v20885_v4  ;;  %19597 = vmatprep.mubr.msk.f32.mxu1 %vm20886_vm2, %v20885_v4  ;;  %v3583_v26 = vsub.f32 %v3511_v63, %v21439_v36 }
 0x1db   :  { %19580 = vmatprep.subr.mxu0 %v20885_v4  ;;  %19605 = vmatprep.subr.mxu1 %v20885_v4 }
 0x1dc   :  { %19573 = vmatmul.mubr.f32.vlgmr.msra.gmra.mxu0 %v21334_v12  ;;  %19598 = vmatmul.mubr.f32.vlgmr.msra.gmra.mxu1 %v21386_v42  ;;  %v3133_v12 = vsub.f32 %v3131_v58, %v3132_v6  ;;  %v3584_v29 = vand.u32 4294901760, %v3583_v26 }
 0x1dd   :  { %19581 = vmatpush3.xpose.msra.mxu0 %v2721_v41  ;;  %19606 = vmatpush3.xpose.msra.mxu1 %v21302_v57  ;;  %v21447_v41 = vsub.f32 %v3966_v61, %v21433_v11 }
 0x1de   :  { %19582 = vmatprep.mubr.msk.f32.mxu0 %vm20886_vm2, %v20885_v4  ;;  %19607 = vmatprep.mubr.msk.f32.mxu1 %vm20886_vm2, %v20885_v4  ;;  %v3134_v14 = vand.u32 4294901760, %v3133_v12  ;;  %v3585_v2 = vsub.f32 %v3583_v26, %v3584_v29 }
 0x1df   :  { %19590 = vmatprep.subr.mxu0 %v20885_v4  ;;  %19615 = vmatprep.subr.mxu1 %v20885_v4  ;;  %v4077_v27 = vand.u32 4294901760, %v21447_v41 }
 0x1e0   :  { %19583 = vmatmul.mubr.f32.vlgmr.msra.gmra.mxu0 %v21309_v59  ;;  %19608 = vmatmul.mubr.f32.vlgmr.msra.gmra.mxu1 %v3132_v6  ;;  %v1699_v59 = vld [vmem:[%s23660_s6 + $0x30] sm:$0xff]  ;;  %v3586_v45 = vand.u32 4294901760, %v3585_v2 }
 0x1e1   :  { %19591 = vmatpush3.xpose.msra.mxu0 %v21302_v57  ;;  %19616 = vmatpush3.xpose.msra.mxu1 %v21302_v57  ;;  %v1690_v57 = vcombine.high %v21391_v50, %v21394_v0  ;;  %v4418_v31 = vsel %vm1701_vm1, %v1699_v59, 0  ;;  %v4078_v50 = vsub.f32 %v21447_v41, %v4077_v27 }
 0x1e2   :  { %19592 = vmatprep.mubr.msk.f32.mxu0 %vm20886_vm2, %v20885_v4  ;;  %19617 = vmatprep.mubr.msk.f32.mxu1 %vm20886_vm2, %v20885_v4  ;;  %v21483_v0 = vand.u32 4294901760, %v4418_v31 }
 0x1e3   :  { %19600 = vmatprep.subr.mxu0 %v20885_v4  ;;  %19625 = vmatprep.subr.mxu1 %v20885_v4  ;;  %v3963_v33 = vsel %vm1701_vm1, %v1690_v57, 0  ;;  %v4079_v22 = vand.u32 4294901760, %v4078_v50 }
 0x1e4   :  { %19593 = vmatmul.mubr.f32.vlgmr.msra.gmra.mxu0 %v3134_v14  ;;  %19618 = vmatmul.mubr.f32.vlgmr.msra.gmra.mxu1 %v21386_v42  ;;  %v21489_v13 = vand.u32 4294901760, %v3963_v33 }
 0x1e5   :  { %19601 = vmatpush3.xpose.msra.mxu0 %v21327_v10  ;;  %19626 = vmatpush3.xpose.msra.mxu1 %v3627_v32  ;;  %v21494_v10 = vrot.slane %v1638_v3, %v21125_v30 }
 0x1e6   :  { %19602 = vmatprep.mubr.msk.f32.mxu0 %vm20886_vm2, %v20885_v4  ;;  %19627 = vmatprep.mubr.msk.f32.mxu1 %vm20886_vm2, %v20885_v4  ;;  %v4035_v56 = vsub.f32 %v3963_v33, %v21489_v13 }
 0x1e7   :  { %19610 = vmatprep.subr.mxu0 %v20885_v4  ;;  %19635 = vmatprep.subr.mxu1 %v20885_v4 }
 0x1e8   :  { %19603 = vmatmul.mubr.f32.vlgmr.msra.gmra.mxu0 %v3131_v58  ;;  %19628 = vmatmul.mubr.f32.vlgmr.msra.gmra.mxu1 %v21439_v36  ;;  %v4036_v15 = vand.u32 4294901760, %v4035_v56 }
 0x1e9   :  { %19611 = vmatpush3.xpose.msra.mxu0 %v3173_v23  ;;  %19636 = vmatpush3.xpose.msra.mxu1 %v21379_v40  ;;  %v21503_v23 = vsub.f32 %v4418_v31, %v21483_v0 }
 0x1ea   :  { %19612 = vmatprep.mubr.msk.f32.mxu0 %vm20886_vm2, %v20885_v4  ;;  %19637 = vmatprep.mubr.msk.f32.mxu1 %vm20886_vm2, %v20885_v4  ;;  %v4037_v9 = vsub.f32 %v4035_v56, %v4036_v15 }
 0x1eb   :  { %19620 = vmatprep.subr.mxu0 %v20885_v4  ;;  %19645 = vmatprep.subr.mxu1 %v20885_v4  ;;  %v4529_v58 = vand.u32 4294901760, %v21503_v23 }
 0x1ec   :  { %19613 = vmatmul.mubr.f32.vlgmr.msra.gmra.mxu0 %v21386_v42  ;;  %19638 = vmatmul.mubr.f32.vlgmr.msra.gmra.mxu1 %v3584_v29  ;;  %v1700_v42 = vld [vmem:[%s23660_s6 + $0x38] sm:$0xff]  ;;  %v4038_v32 = vand.u32 4294901760, %v4037_v9 }
 0x1ed   :  { %19621 = vmatpush3.xpose.msra.mxu0 %v21379_v40  ;;  %19646 = vmatpush3.xpose.msra.mxu1 %v21379_v40  ;;  %v1691_v40 = vcombine.low %v21494_v10, %v21497_v16  ;;  %v4870_v20 = vsel %vm1701_vm1, %v1700_v42, 0  ;;  %v4530_v61 = vsub.f32 %v21503_v23, %v4529_v58 }
 0x1ee   :  { %19622 = vmatprep.mubr.msk.f32.mxu0 %vm20886_vm2, %v20885_v4  ;;  %19647 = vmatprep.mubr.msk.f32.mxu1 %vm20886_vm2, %v20885_v4  ;;  %v21535_v63 = vand.u32 4294901760, %v4870_v20 }
 0x1ef   :  { %19630 = vmatprep.subr.mxu0 %v20885_v4  ;;  %19655 = vmatprep.subr.mxu1 %v20885_v4  ;;  %v4415_v6 = vsel %vm1701_vm1, %v1691_v40, 0 }
 0x1f0   :  { %19623 = vmatmul.mubr.f32.vlgmr.msra.gmra.mxu0 %v3586_v45  ;;  %19648 = vmatmul.mubr.f32.vlgmr.msra.gmra.mxu1 %v21439_v36  ;;  %v21541_v12 = vand.u32 4294901760, %v4415_v6 }
 0x1f1   :  { %19631 = vmatpush3.xpose.msra.mxu0 %v21400_v46  ;;  %19656 = vmatpush3.xpose.msra.mxu1 %v4079_v22  ;;  %v4531_v46 = vand.u32 4294901760, %v4530_v61 }
 0x1f2   :  { %19632 = vmatprep.mubr.msk.f32.mxu0 %vm20886_vm2, %v20885_v4  ;;  %19657 = vmatprep.mubr.msk.f32.mxu1 %vm20886_vm2, %v20885_v4  ;;  %v4487_v14 = vsub.f32 %v4415_v6, %v21541_v12 }
 0x1f3   :  { %19640 = vmatprep.subr.mxu0 %v20885_v4  ;;  %19665 = vmatprep.subr.mxu1 %v20885_v4 }
 0x1f4   :  { %19633 = vmatmul.mubr.f32.vlgmr.msra.gmra.mxu0 %v3583_v26  ;;  %19658 = vmatmul.mubr.f32.vlgmr.msra.gmra.mxu1 %v21489_v13  ;;  %v4488_v26 = vand.u32 4294901760, %v4487_v14 }
 0x1f5   :  { %19641 = vmatpush3.xpose.msra.mxu0 %v3625_v5  ;;  %19666 = vmatpush3.xpose.msra.mxu1 %v21433_v11  ;;  %v21549_v5 = vsub.f32 %v4870_v20, %v21535_v63 }
 0x1f6   :  { %19642 = vmatprep.mubr.msk.f32.mxu0 %vm20886_vm2, %v20885_v4  ;;  %19667 = vmatprep.mubr.msk.f32.mxu1 %vm20886_vm2, %v20885_v4  ;;  %v4489_v29 = vsub.f32 %v4487_v14, %v4488_v26 }
 0x1f7   :  { %19650 = vmatprep.subr.mxu0 %v20885_v4  ;;  %19675 = vmatprep.subr.mxu1 %v20885_v4 }
 0x1f8   :  { %19643 = vmatmul.mubr.f32.vlgmr.msra.gmra.mxu0 %v21439_v36  ;;  %19668 = vmatmul.mubr.f32.vlgmr.msra.gmra.mxu1 %v4036_v15  ;;  %v4981_v36 = vand.u32 4294901760, %v21549_v5  ;;  %v5515_v15 = vsel %vm1701_vm1, %v879_v51, 0 }
 0x1f9   :  { %19651 = vmatpush3.xpose.msra.mxu0 %v21433_v11  ;;  %19676 = vmatpush3.xpose.msra.mxu1 %v21433_v11  ;;  %v1692_v11 = vcombine.high %v21494_v10, %v21497_v16  ;;  %v21649_v51 = vand.u32 4294901760, %v5515_v15 }
 0x1fa   :  { %19652 = vmatprep.mubr.msk.f32.mxu0 %vm20886_vm2, %v20885_v4  ;;  %19677 = vmatprep.mubr.msk.f32.mxu1 %vm20886_vm2, %v20885_v4  ;;  %v4982_v59 = vsub.f32 %v21549_v5, %v4981_v36 }
 0x1fb   :  { %19660 = vmatprep.subr.mxu0 %v20885_v4  ;;  %19685 = vmatprep.subr.mxu1 %v20885_v4  ;;  %v4867_v57 = vsel %vm1701_vm1, %v1692_v11, 0 }
 0x1fc   :  { %19653 = vmatmul.mubr.f32.vlgmr.msra.gmra.mxu0 %v4038_v32  ;;  %19678 = vmatmul.mubr.f32.vlgmr.msra.gmra.mxu1 %v21489_v13  ;;  %v21581_v31 = vand.u32 4294901760, %v4867_v57 }
 0x1fd   :  { %19661 = vmatpush3.xpose.msra.mxu0 %v21447_v41  ;;  %19686 = vmatpush3.xpose.msra.mxu1 %v4531_v46  ;;  %v4983_v41 = vand.u32 4294901760, %v4982_v59 }
 0x1fe   :  { %19662 = vmatprep.mubr.msk.f32.mxu0 %vm20886_vm2, %v20885_v4  ;;  %19687 = vmatprep.mubr.msk.f32.mxu1 %vm20886_vm2, %v20885_v4  ;;  %v4939_v33 = vsub.f32 %v4867_v57, %v21581_v31 }
 0x1ff   :  { %19670 = vmatprep.subr.mxu0 %v20885_v4  ;;  %19695 = vmatprep.subr.mxu1 %v20885_v4 }
 0x200   :  { %19663 = vmatmul.mubr.f32.vlgmr.msra.gmra.mxu0 %v4035_v56  ;;  %19688 = vmatmul.mubr.f32.vlgmr.msra.gmra.mxu1 %v21541_v12  ;;  %v4940_v3 = vand.u32 4294901760, %v4939_v33 }
 0x201   :  { %19671 = vmatpush3.xpose.msra.mxu0 %v4077_v27  ;;  %19696 = vmatpush3.xpose.msra.mxu1 %v21483_v0  ;;  %v4490_v27 = vand.u32 4294901760, %v4489_v29 }
 0x202   :  { %19672 = vmatprep.mubr.msk.f32.mxu0 %vm20886_vm2, %v20885_v4  ;;  %19697 = vmatprep.mubr.msk.f32.mxu1 %vm20886_vm2, %v20885_v4  ;;  %v4941_v50 = vsub.f32 %v4939_v33, %v4940_v3 }
 0x203   :  { %19680 = vmatprep.subr.mxu0 %v20885_v4  ;;  %19705 = vmatprep.subr.mxu1 %v20885_v4 }
 0x204   :  { %19673 = vmatmul.mubr.f32.vlgmr.msra.gmra.mxu0 %v21489_v13  ;;  %19698 = vmatmul.mubr.f32.vlgmr.msra.gmra.mxu1 %v4488_v26  ;;  %v4942_v13 = vand.u32 4294901760, %v4941_v50 }
 0x205   :  { %19681 = vmatpush3.xpose.msra.mxu0 %v21483_v0  ;;  %19706 = vmatpush3.xpose.msra.mxu1 %v21483_v0 }
 0x206   :  { %19682 = vmatprep.mubr.msk.f32.mxu0 %vm20886_vm2, %v20885_v4  ;;  %19707 = vmatprep.mubr.msk.f32.mxu1 %vm20886_vm2, %v20885_v4 }
 0x207   :  { %19690 = vmatprep.subr.mxu0 %v20885_v4  ;;  %19715 = vmatprep.subr.mxu1 %v20885_v4 }
 0x208   :  { %19683 = vmatmul.mubr.f32.vlgmr.msra.gmra.mxu0 %v4490_v27  ;;  %19708 = vmatmul.mubr.f32.vlgmr.msra.gmra.mxu1 %v21541_v12 }
 0x209   :  { %19691 = vmatpush3.xpose.msra.mxu0 %v21503_v23  ;;  %19716 = vmatpush3.xpose.msra.mxu1 %v4983_v41 }
 0x20a   :  { %19692 = vmatprep.mubr.msk.f32.mxu0 %vm20886_vm2, %v20885_v4  ;;  %19717 = vmatprep.mubr.msk.f32.mxu1 %vm20886_vm2, %v20885_v4 }
 0x20b   :  { %19700 = vmatprep.subr.mxu0 %v20885_v4  ;;  %19725 = vmatprep.subr.mxu1 %v20885_v4 }
 0x20c   :  { %19693 = vmatmul.mubr.f32.vlgmr.msra.gmra.mxu0 %v4487_v14  ;;  %19718 = vmatmul.mubr.f32.vlgmr.msra.gmra.mxu1 %v21581_v31 }
 0x20d   :  { %19701 = vmatpush3.xpose.msra.mxu0 %v4529_v58  ;;  %19726 = vmatpush3.xpose.msra.mxu1 %v21535_v63 }
 0x20e   :  { %19702 = vmatprep.mubr.msk.f32.mxu0 %vm20886_vm2, %v20885_v4  ;;  %19727 = vmatprep.mubr.msk.f32.mxu1 %vm20886_vm2, %v20885_v4 }
 0x20f   :  { %19710 = vmatprep.subr.mxu0 %v20885_v4  ;;  %19735 = vmatprep.subr.mxu1 %v20885_v4 }
 0x210   :  { %19703 = vmatmul.mubr.f32.vlgmr.msra.gmra.mxu0 %v21541_v12  ;;  %19728 = vmatmul.mubr.f32.vlgmr.msra.gmra.mxu1 %v4940_v3 }
 0x211   :  { %19711 = vmatpush3.xpose.msra.mxu0 %v21535_v63  ;;  %19736 = vmatpush3.xpose.msra.mxu1 %v21535_v63  ;;  %v974_v2 = vpop.permute.xlu0 %973 }
 0x212   :  { %v970_v0 = vpop.permute.xlu1 %969  ;;  %19712 = vmatprep.mubr.msk.f32.mxu0 %vm20886_vm2, %v20885_v4  ;;  %19737 = vmatprep.mubr.msk.f32.mxu1 %vm20886_vm2, %v20885_v4  ;;  %v989_v10 = vcombine.low %v966_v34, %v974_v2  ;;  %v990_v16 = vcombine.high %v966_v34, %v974_v2 }
 0x213   :  { %19720 = vmatprep.subr.mxu0 %v20885_v4  ;;  %19745 = vmatprep.subr.mxu1 %v20885_v4 }
 0x214   :  { %19713 = vmatmul.mubr.f32.vlgmr.msra.gmra.mxu0 %v4942_v13  ;;  %19738 = vmatmul.mubr.f32.vlgmr.msra.gmra.mxu1 %v21581_v31  ;;  %v997_v56 = vrot.slane %v989_v10, %v21120_v21  ;;  %v1004_v40 = vrot.slane %v990_v16, %v21120_v21  ;;  %v5967_v13 = vsel %vm1701_vm1, %v880_v53, 0 }
 0x215   :  { %19721 = vmatpush3.xpose.msra.mxu0 %v21549_v5  ;;  %19722 = vmatprep.mubr.msk.f32.mxu0 %vm20886_vm2, %v20885_v4  ;;  %v968_v3 = vpop.permute.xlu0 %967 }
 0x216   :  { %v978_v22 = vpop.permute.xlu1 %977  ;;  %19730 = vmatprep.subr.mxu0 %v20885_v4  ;;  %19747 = vmatprep.mubr.msk.f32.mxu1 %vm20886_vm2, %v20885_v4 }
 0x217   :  { %v1005_v23 = vcombine.low %v970_v0, %v978_v22  ;;  %v1006_v45 = vcombine.high %v970_v0, %v978_v22 }
 0x218   :  { %19723 = vmatmul.mubr.f32.vlgmr.msra.gmra.mxu0 %v4939_v33 }
 0x219   :  { %v1013_v42 = vrot.slane %v1005_v23, %v21120_v21  ;;  %v1020_v58 = vrot.slane %v1006_v45, %v21120_v21  ;;  %19731 = vmatpush3.xpose.msra.mxu0 %v4981_v36  ;;  %19732 = vmatprep.mubr.msk.f32.mxu0 %vm20886_vm2, %v20885_v4  ;;  %v976_v23 = vpop.permute.xlu0 %975 }
 0x21a   :  { %19740 = vmatprep.subr.mxu0 %v20885_v4  ;;  %v972_v41 = vpop.permute.xlu1 %971  ;;  %v1057_v43 = vcombine.low %v968_v3, %v976_v23 }
 0x21b   :  { %v1021_v20 = vcombine.low %v997_v56, %v1013_v42  ;;  %v1022_v6 = vcombine.high %v997_v56, %v1013_v42  ;;  %v1037_v61 = vcombine.low %v1004_v40, %v1020_v58  ;;  %v1038_v63 = vcombine.high %v1004_v40, %v1020_v58 }
 0x21c   :  { %19733 = vmatmul.mubr.f32.vlgmr.msra.gmra.mxu0 %v21581_v31  ;;  %v21656_v31 = vsub.f32 %v5515_v15, %v21649_v51  ;;  %v21669_v56 = vand.u32 4294901760, %v5967_v13 }
 0x21d   :  { %v1029_v9 = vrot.slane %v1021_v20, %v21125_v30  ;;  %v1036_v12 = vrot.slane %v1022_v6, %v21125_v30  ;;  %v1045_v46 = vrot.slane %v1037_v61, %v21125_v30  ;;  %v1052_v5 = vrot.slane %v1038_v63, %v21125_v30  ;;  %19742 = vmatprep.mubr.msk.f32.mxu0 %vm20886_vm2, %v20885_v4 }
 0x21e   :  { %v5588_v0 = vand.u32 4294901760, %v21656_v31  ;;  %v980_v10 = vpop.permute.xlu1 %979  ;;  %v1058_v6 = vcombine.high %v968_v3, %v976_v23  ;;  %v21678_v63 = vsub.f32 %v5967_v13, %v21669_v56 }
 0x21f   :  { %v1125_v32 = vcombine.low %v1029_v9, %v1036_v12  ;;  %v18855_v14 = vcombine.high %v1029_v9, %v1036_v12  ;;  %v1141_v11 = vcombine.low %v1045_v46, %v1052_v5  ;;  %v18856_v36 = vcombine.high %v1045_v46, %v1052_v5 }
 0x220   :  { %v5589_v45 = vsub.f32 %v21656_v31, %v5588_v0  ;;  %v1073_v40 = vcombine.low %v972_v41, %v980_v10  ;;  %v1074_v20 = vcombine.high %v972_v41, %v980_v10 }
 0x221   :  { %v1132_v26 = vrot.slane %v1125_v32, %v21120_v21  ;;  %v1140_v57 = vrot.slane %v18855_v14, %v21120_v21  ;;  %v1148_v59 = vrot.slane %v1141_v11, %v21120_v21  ;;  %v1156_v29 = vrot.slane %v18856_v36, %v21120_v21 }
 0x222   :  { %v5590_v61 = vand.u32 4294901760, %v5589_v45  ;;  %v1081_v9 = vrot.slane %v1073_v40, %v21120_v21  ;;  %v1088_v5 = vrot.slane %v1074_v20, %v21120_v21  ;;  %v1065_v11 = vrot.slane %v1057_v43, %v21120_v21 }
 0x223   :  { %v1157_v27 = vcombine.low %v1132_v26, %v1140_v57  ;;  %v1173_v33 = vcombine.low %v1148_v59, %v1156_v29  ;;  %v1158_v58 = vcombine.high %v1132_v26, %v1140_v57  ;;  %v1174_v15 = vcombine.high %v1148_v59, %v1156_v29 }
 0x224   :  { %v1072_v26 = vrot.slane %v1058_v6, %v21120_v21  ;;  %v6040_v57 = vand.u32 4294901760, %v21678_v63  ;;  %v6419_v59 = vsel %vm1701_vm1, %v881_v54, 0  ;;  %v1089_v29 = vcombine.low %v1065_v11, %v1081_v9 }
 0x225   :  { %v1165_v34 = vrot.slane %v1157_v27, %v21125_v30  ;;  %v1181_v50 = vrot.slane %v1173_v33, %v21125_v30  ;;  %v21685_v32 = vrot.slane %v1158_v58, %v21125_v30  ;;  %v21688_v14 = vrot.slane %v1174_v15, %v21125_v30 }
 0x226   :  { %v1090_v41 = vcombine.high %v1065_v11, %v1081_v9  ;;  %v1105_v3 = vcombine.low %v1072_v26, %v1088_v5  ;;  %v6041_v54 = vsub.f32 %v21678_v63, %v6040_v57  ;;  %v1097_v13 = vrot.slane %v1089_v29, %v21125_v30 }
 0x227   :  { %v1189_v2 = vcombine.low %v1165_v34, %v1181_v50  ;;  %v1190_v16 = vcombine.high %v1165_v34, %v1181_v50  ;;  %v1106_v34 = vcombine.high %v1072_v26, %v1088_v5  ;;  %v1191_v50 = vcombine.low %v21685_v32, %v21688_v14 }
 0x228   :  { %v1104_v10 = vrot.slane %v1090_v41, %v21125_v30  ;;  %v6042_v40 = vand.u32 4294901760, %v6041_v54  ;;  %v6871_v9 = vsel %vm1701_vm1, %v882_v55, 0 }
 0x229   :  { %v5518_v22 = vsel %vm1701_vm1, %v1189_v2, 0  ;;  %v5970_v24 = vsel %vm1701_vm1, %v1190_v16, 0  ;;  %v21710_v2 = vand.u32 4294901760, %v6419_v59  ;;  %v1120_v23 = vrot.slane %v1106_v34, %v21125_v30 }
 0x22a   :  { %v21671_v42 = vand.u32 4294901760, %v5518_v22  ;;  %v21681_v46 = vand.u32 4294901760, %v5970_v24  ;;  %v6422_v45 = vsel %vm1701_vm1, %v1191_v50, 0  ;;  %v1193_v15 = vcombine.low %v1097_v13, %v1104_v10 }
 0x22b   :  { %v21727_v58 = vsub.f32 %v6419_v59, %v21710_v2  ;;  %v18857_v43 = vcombine.high %v1097_v13, %v1104_v10 }
 0x22c   :  { %19741 = vmatpush3.xpose.msra.mxu0 %v21671_v42  ;;  %v5628_v53 = vsub.f32 %v5518_v22, %v21671_v42  ;;  %v6080_v33 = vsub.f32 %v5970_v24, %v21681_v46  ;;  %v1113_v22 = vrot.slane %v1105_v3, %v21125_v30  ;;  %v21731_v24 = vand.u32 4294901760, %v6422_v45 }
 0x22d   :  { %19750 = vmatprep.subr.mxu0 %v20885_v4  ;;  %v21754_v5 = vrot.slane %v18857_v43, %v21120_v21 }
 0x22e   :  { %v5629_v12 = vand.u32 4294901760, %v5628_v53  ;;  %v6081_v16 = vand.u32 4294901760, %v6080_v33  ;;  %v18858_v6 = vcombine.high %v1113_v22, %v1120_v23 }
 0x22f   :  { %19743 = vmatmul.mubr.f32.vlgmr.msra.gmra.mxu0 %v5590_v61  ;;  %v6492_v61 = vand.u32 4294901760, %v21727_v58 }
 0x230   :  { %19751 = vmatpush3.xpose.msra.mxu0 %v5628_v53  ;;  %19752 = vmatprep.mubr.msk.f32.mxu0 %vm20886_vm2, %v20885_v4  ;;  %v5630_v36 = vsub.f32 %v5628_v53, %v5629_v12  ;;  %v6082_v20 = vsub.f32 %v6080_v33, %v6081_v16  ;;  %v1209_v53 = vcombine.low %v1113_v22, %v1120_v23 }
 0x231   :  { %19760 = vmatprep.subr.mxu0 %v20885_v4  ;;  %v21760_v44 = vrot.slane %v18858_v6, %v21120_v21  ;;  %v6493_v55 = vsub.f32 %v21727_v58, %v6492_v61 }
 0x232   :  { %v5631_v27 = vand.u32 4294901760, %v5630_v36  ;;  %v21757_v25 = vrot.slane %v1209_v53, %v21120_v21 }
 0x233   :  { %19753 = vmatmul.mubr.f32.vlgmr.msra.gmra.mxu0 %v21656_v31  ;;  %v21746_v31 = vrot.slane %v1193_v15, %v21120_v21  ;;  %v6494_v26 = vand.u32 4294901760, %v6493_v55 }
 0x234   :  { %19746 = vmatpush3.xpose.msra.mxu1 %v5631_v27  ;;  %19761 = vmatpush3.xpose.msra.mxu0 %v5629_v12  ;;  %v1192_v12 = vcombine.high %v21685_v32, %v21688_v14  ;;  %v21771_v32 = vand.u32 4294901760, %v6871_v9  ;;  %v1241_v11 = vcombine.low %v21757_v25, %v21760_v44 }
 0x235   :  { %19762 = vmatprep.mubr.msk.f32.mxu0 %vm20886_vm2, %v20885_v4  ;;  %19755 = vmatprep.subr.mxu1 %v20885_v4  ;;  %v1225_v14 = vcombine.low %v21746_v31, %v21754_v5 }
 0x236   :  { %19770 = vmatprep.subr.mxu0 %v20885_v4  ;;  %v6874_v36 = vsel %vm1701_vm1, %v1192_v12, 0  ;;  %v21789_v59 = vsub.f32 %v6871_v9, %v21771_v32 }
 0x237   :  { %19748 = vmatmul.mubr.f32.vlgmr.msra.gmra.mxu1 %v21649_v51  ;;  %19763 = vmatmul.mubr.f32.vlgmr.msra.gmra.mxu0 %v21649_v51  ;;  %v21793_v41 = vand.u32 4294901760, %v6874_v36  ;;  %v21798_v27 = vrot.slane %v1225_v14, %v21125_v30 }
 0x238   :  { %19756 = vmatpush3.xpose.msra.mxu1 %v21671_v42  ;;  %19771 = vmatpush3.xpose.msra.mxu0 %v21681_v46  ;;  %v6944_v3 = vand.u32 4294901760, %v21789_v59 }
 0x239   :  { %19757 = vmatprep.mubr.msk.f32.mxu1 %vm20886_vm2, %v20885_v4  ;;  %19772 = vmatprep.mubr.msk.f32.mxu0 %vm20886_vm2, %v20885_v4 }
 0x23a   :  { %19765 = vmatprep.subr.mxu1 %v20885_v4  ;;  %19780 = vmatprep.subr.mxu0 %v20885_v4  ;;  %v6945_v50 = vsub.f32 %v21789_v59, %v6944_v3 }
 0x23b   :  { %19758 = vmatmul.mubr.f32.vlgmr.msra.gmra.mxu1 %v5588_v0  ;;  %19773 = vmatmul.mubr.f32.vlgmr.msra.gmra.mxu0 %v6042_v40  ;;  %v6083_v0 = vand.u32 4294901760, %v6082_v20  ;;  %v1242_v20 = vcombine.high %v21757_v25, %v21760_v44 }
 0x23c   :  { %19766 = vmatpush3.xpose.msra.mxu1 %v21671_v42  ;;  %19781 = vmatpush3.xpose.msra.mxu0 %v6080_v33  ;;  %v6532_v42 = vsub.f32 %v6422_v45, %v21731_v24  ;;  %v21801_v33 = vrot.slane %v1241_v11, %v21125_v30  ;;  %v6946_v13 = vand.u32 4294901760, %v6945_v50 }
 0x23d   :  { %19767 = vmatprep.mubr.msk.f32.mxu1 %vm20886_vm2, %v20885_v4  ;;  %19782 = vmatprep.mubr.msk.f32.mxu0 %vm20886_vm2, %v20885_v4 }
 0x23e   :  { %19775 = vmatprep.subr.mxu1 %v20885_v4  ;;  %19790 = vmatprep.subr.mxu0 %v20885_v4  ;;  %v1257_v34 = vcombine.low %v21798_v27, %v21801_v33  ;;  %v1258_v15 = vcombine.high %v21798_v27, %v21801_v33 }
 0x23f   :  { %19768 = vmatmul.mubr.f32.vlgmr.msra.gmra.mxu1 %v21649_v51  ;;  %19783 = vmatmul.mubr.f32.vlgmr.msra.gmra.mxu0 %v21678_v63  ;;  %v6533_v51 = vand.u32 4294901760, %v6532_v42 }
 0x240   :  { %19776 = vmatpush3.xpose.msra.mxu1 %v6083_v0  ;;  %19791 = vmatpush3.xpose.msra.mxu0 %v6081_v16  ;;  %v7326_v54 = vsel %vm1701_vm1, %v1257_v34, 0 }
 0x241   :  { %19777 = vmatprep.mubr.msk.f32.mxu1 %vm20886_vm2, %v20885_v4  ;;  %19792 = vmatprep.mubr.msk.f32.mxu0 %vm20886_vm2, %v20885_v4  ;;  %v6534_v29 = vsub.f32 %v6532_v42, %v6533_v51  ;;  %v21845_v22 = vand.u32 4294901760, %v7326_v54 }
 0x242   :  { %19785 = vmatprep.subr.mxu1 %v20885_v4  ;;  %19800 = vmatprep.subr.mxu0 %v20885_v4 }
 0x243   :  { %19778 = vmatmul.mubr.f32.vlgmr.msra.gmra.mxu1 %v21669_v56  ;;  %19793 = vmatmul.mubr.f32.vlgmr.msra.gmra.mxu0 %v21669_v56  ;;  %v6535_v63 = vand.u32 4294901760, %v6534_v29  ;;  %v7436_v40 = vsub.f32 %v7326_v54, %v21845_v22 }
 0x244   :  { %19786 = vmatpush3.xpose.msra.mxu1 %v21681_v46  ;;  %19801 = vmatpush3.xpose.msra.mxu0 %v21731_v24 }
 0x245   :  { %19787 = vmatprep.mubr.msk.f32.mxu1 %vm20886_vm2, %v20885_v4  ;;  %19802 = vmatprep.mubr.msk.f32.mxu0 %vm20886_vm2, %v20885_v4 }
 0x246   :  { %19795 = vmatprep.subr.mxu1 %v20885_v4  ;;  %19810 = vmatprep.subr.mxu0 %v20885_v4 }
 0x247   :  { %19788 = vmatmul.mubr.f32.vlgmr.msra.gmra.mxu1 %v6040_v57  ;;  %19803 = vmatmul.mubr.f32.vlgmr.msra.gmra.mxu0 %v6494_v26  ;;  %v6984_v57 = vsub.f32 %v6874_v36, %v21793_v41 }
 0x248   :  { %19796 = vmatpush3.xpose.msra.mxu1 %v21681_v46  ;;  %19811 = vmatpush3.xpose.msra.mxu0 %v6532_v42  ;;  %v7323_v46 = vsel %vm1701_vm1, %v947_v47, 0 }
 0x249   :  { %19797 = vmatprep.mubr.msk.f32.mxu1 %vm20886_vm2, %v20885_v4  ;;  %19812 = vmatprep.mubr.msk.f32.mxu0 %vm20886_vm2, %v20885_v4  ;;  %v21827_v47 = vand.u32 4294901760, %v7323_v46 }
 0x24a   :  { %19805 = vmatprep.subr.mxu1 %v20885_v4  ;;  %19820 = vmatprep.subr.mxu0 %v20885_v4 }
 0x24b   :  { %19798 = vmatmul.mubr.f32.vlgmr.msra.gmra.mxu1 %v21669_v56  ;;  %19813 = vmatmul.mubr.f32.vlgmr.msra.gmra.mxu0 %v21727_v58  ;;  %v6985_v56 = vand.u32 4294901760, %v6984_v57  ;;  %v21841_v10 = vsub.f32 %v7323_v46, %v21827_v47  ;;  %v7775_v58 = vsel %vm1701_vm1, %v948_v48, 0  ;;  %v7437_v48 = vand.u32 4294901760, %v7436_v40 }
 0x24c   :  { %19806 = vmatpush3.xpose.msra.mxu1 %v6535_v63  ;;  %19821 = vmatpush3.xpose.msra.mxu0 %v6533_v51  ;;  %v21873_v35 = vand.u32 4294901760, %v7775_v58 }
 0x24d   :  { %19807 = vmatprep.mubr.msk.f32.mxu1 %vm20886_vm2, %v20885_v4  ;;  %19822 = vmatprep.mubr.msk.f32.mxu0 %vm20886_vm2, %v20885_v4  ;;  %v6986_v16 = vsub.f32 %v6984_v57, %v6985_v56  ;;  %v7396_v23 = vand.u32 4294901760, %v21841_v10  ;;  %v7438_v6 = vsub.f32 %v7436_v40, %v7437_v48 }
 0x24e   :  { %19815 = vmatprep.subr.mxu1 %v20885_v4  ;;  %19830 = vmatprep.subr.mxu0 %v20885_v4  ;;  %v21891_v53 = vsub.f32 %v7775_v58, %v21873_v35 }
 0x24f   :  { %19808 = vmatmul.mubr.f32.vlgmr.msra.gmra.mxu1 %v21710_v2  ;;  %19823 = vmatmul.mubr.f32.vlgmr.msra.gmra.mxu0 %v21710_v2  ;;  %v6987_v45 = vand.u32 4294901760, %v6986_v16  ;;  %v7397_v18 = vsub.f32 %v21841_v10, %v7396_v23  ;;  %v7439_v42 = vand.u32 4294901760, %v7438_v6 }
 0x250   :  { %19816 = vmatpush3.xpose.msra.mxu1 %v21731_v24  ;;  %19831 = vmatpush3.xpose.msra.mxu0 %v21793_v41  ;;  %v7848_v0 = vand.u32 4294901760, %v21891_v53 }
 0x251   :  { %19817 = vmatprep.mubr.msk.f32.mxu1 %vm20886_vm2, %v20885_v4  ;;  %19832 = vmatprep.mubr.msk.f32.mxu0 %vm20886_vm2, %v20885_v4  ;;  %v7398_v43 = vand.u32 4294901760, %v7397_v18 }
 0x252   :  { %19825 = vmatprep.subr.mxu1 %v20885_v4  ;;  %19840 = vmatprep.subr.mxu0 %v20885_v4  ;;  %v7849_v44 = vsub.f32 %v21891_v53, %v7848_v0 }
 0x253   :  { %19818 = vmatmul.mubr.f32.vlgmr.msra.gmra.mxu1 %v6492_v61  ;;  %19833 = vmatmul.mubr.f32.vlgmr.msra.gmra.mxu0 %v6946_v13 }
 0x254   :  { %19826 = vmatpush3.xpose.msra.mxu1 %v21731_v24  ;;  %19841 = vmatpush3.xpose.msra.mxu0 %v6984_v57  ;;  %v7778_v24 = vsel %vm1701_vm1, %v1258_v15, 0  ;;  %v7850_v51 = vand.u32 4294901760, %v7849_v44 }
 0x255   :  { %19827 = vmatprep.mubr.msk.f32.mxu1 %vm20886_vm2, %v20885_v4  ;;  %19842 = vmatprep.mubr.msk.f32.mxu0 %vm20886_vm2, %v20885_v4  ;;  %v21895_v61 = vand.u32 4294901760, %v7778_v24 }
 0x256   :  { %19835 = vmatprep.subr.mxu1 %v20885_v4  ;;  %19850 = vmatprep.subr.mxu0 %v20885_v4 }
 0x257   :  { %19828 = vmatmul.mubr.f32.vlgmr.msra.gmra.mxu1 %v21710_v2  ;;  %19843 = vmatmul.mubr.f32.vlgmr.msra.gmra.mxu0 %v21789_v59  ;;  %v1226_v2 = vcombine.high %v21746_v31, %v21754_v5  ;;  %v21903_v31 = vrot.slane %v1242_v20, %v21125_v30  ;;  %v7888_v12 = vsub.f32 %v7778_v24, %v21895_v61  ;;  %v8227_v5 = vsel %vm1701_vm1, %v949_v49, 0 }
 0x258   :  { %19836 = vmatpush3.xpose.msra.mxu1 %v6987_v45  ;;  %19851 = vmatpush3.xpose.msra.mxu0 %v6985_v56  ;;  %v21929_v49 = vand.u32 4294901760, %v8227_v5 }
 0x259   :  { %19837 = vmatprep.mubr.msk.f32.mxu1 %vm20886_vm2, %v20885_v4  ;;  %19852 = vmatprep.mubr.msk.f32.mxu0 %vm20886_vm2, %v20885_v4  ;;  %v21900_v9 = vrot.slane %v1226_v2, %v21125_v30  ;;  %v7889_v55 = vand.u32 4294901760, %v7888_v12 }
 0x25a   :  { %19845 = vmatprep.subr.mxu1 %v20885_v4  ;;  %19860 = vmatprep.subr.mxu0 %v20885_v4  ;;  %v21943_v14 = vsub.f32 %v8227_v5, %v21929_v49 }
 0x25b   :  { %19838 = vmatmul.mubr.f32.vlgmr.msra.gmra.mxu1 %v21771_v32  ;;  %19853 = vmatmul.mubr.f32.vlgmr.msra.gmra.mxu0 %v21771_v32  ;;  %v1259_v25 = vcombine.low %v21900_v9, %v21903_v31  ;;  %v7890_v11 = vsub.f32 %v7888_v12, %v7889_v55  ;;  %v1260_v27 = vcombine.high %v21900_v9, %v21903_v31 }
 0x25c   :  { %19846 = vmatpush3.xpose.msra.mxu1 %v21793_v41  ;;  %19861 = vmatpush3.xpose.msra.mxu0 %v21845_v22  ;;  %v8300_v26 = vand.u32 4294901760, %v21943_v14 }
 0x25d   :  { %19847 = vmatprep.mubr.msk.f32.mxu1 %vm20886_vm2, %v20885_v4  ;;  %19862 = vmatprep.mubr.msk.f32.mxu0 %vm20886_vm2, %v20885_v4  ;;  %v7891_v59 = vand.u32 4294901760, %v7890_v11  ;;  %v8682_v33 = vsel %vm1701_vm1, %v1260_v27, 0 }
 0x25e   :  { %19855 = vmatprep.subr.mxu1 %v20885_v4  ;;  %19870 = vmatprep.subr.mxu0 %v20885_v4  ;;  %v8301_v19 = vsub.f32 %v21943_v14, %v8300_v26  ;;  %v21993_v46 = vand.u32 4294901760, %v8682_v33 }
 0x25f   :  { %19848 = vmatmul.mubr.f32.vlgmr.msra.gmra.mxu1 %v6944_v3  ;;  %19863 = vmatmul.mubr.f32.vlgmr.msra.gmra.mxu0 %v7398_v43 }
 0x260   :  { %19856 = vmatpush3.xpose.msra.mxu1 %v21793_v41  ;;  %19871 = vmatpush3.xpose.msra.mxu0 %v7436_v40  ;;  %v8679_v41 = vsel %vm1701_vm1, %v950_v7, 0  ;;  %v8302_v3 = vand.u32 4294901760, %v8301_v19  ;;  %v8792_v54 = vsub.f32 %v8682_v33, %v21993_v46 }
 0x261   :  { %19857 = vmatprep.mubr.msk.f32.mxu1 %vm20886_vm2, %v20885_v4  ;;  %19872 = vmatprep.mubr.msk.f32.mxu0 %vm20886_vm2, %v20885_v4  ;;  %v21975_v39 = vand.u32 4294901760, %v8679_v41 }
 0x262   :  { %19865 = vmatprep.subr.mxu1 %v20885_v4  ;;  %19880 = vmatprep.subr.mxu0 %v20885_v4 }
 0x263   :  { %19858 = vmatmul.mubr.f32.vlgmr.msra.gmra.mxu1 %v21771_v32  ;;  %19873 = vmatmul.mubr.f32.vlgmr.msra.gmra.mxu0 %v21841_v10  ;;  %v8230_v32 = vsel %vm1701_vm1, %v1259_v25, 0  ;;  %v21989_v63 = vsub.f32 %v8679_v41, %v21975_v39 }
 0x264   :  { %19866 = vmatpush3.xpose.msra.mxu1 %v7439_v42  ;;  %19881 = vmatpush3.xpose.msra.mxu0 %v7437_v48  ;;  %v21947_v36 = vand.u32 4294901760, %v8230_v32 }
 0x265   :  { %19867 = vmatprep.mubr.msk.f32.mxu1 %vm20886_vm2, %v20885_v4  ;;  %19882 = vmatprep.mubr.msk.f32.mxu0 %vm20886_vm2, %v20885_v4  ;;  %v8752_v50 = vand.u32 4294901760, %v21989_v63 }
 0x266   :  { %19875 = vmatprep.subr.mxu1 %v20885_v4  ;;  %19890 = vmatprep.subr.mxu0 %v20885_v4  ;;  %v8340_v29 = vsub.f32 %v8230_v32, %v21947_v36 }
 0x267   :  { %19868 = vmatmul.mubr.f32.vlgmr.msra.gmra.mxu1 %v21827_v47  ;;  %19883 = vmatmul.mubr.f32.vlgmr.msra.gmra.mxu0 %v21827_v47  ;;  %v8753_v10 = vsub.f32 %v21989_v63, %v8752_v50 }
 0x268   :  { %19876 = vmatpush3.xpose.msra.mxu1 %v21845_v22  ;;  %19891 = vmatpush3.xpose.msra.mxu0 %v21895_v61  ;;  %v8341_v7 = vand.u32 4294901760, %v8340_v29 }
 0x269   :  { %19877 = vmatprep.mubr.msk.f32.mxu1 %vm20886_vm2, %v20885_v4  ;;  %19892 = vmatprep.mubr.msk.f32.mxu0 %vm20886_vm2, %v20885_v4  ;;  %v8754_v58 = vand.u32 4294901760, %v8753_v10 }
 0x26a   :  { %19885 = vmatprep.subr.mxu1 %v20885_v4  ;;  %19900 = vmatprep.subr.mxu0 %v20885_v4  ;;  %v8342_v57 = vsub.f32 %v8340_v29, %v8341_v7 }
 0x26b   :  { %19878 = vmatmul.mubr.f32.vlgmr.msra.gmra.mxu1 %v7396_v23  ;;  %19893 = vmatmul.mubr.f32.vlgmr.msra.gmra.mxu0 %v7850_v51 }
 0x26c   :  { %19886 = vmatpush3.xpose.msra.mxu1 %v21845_v22  ;;  %19901 = vmatpush3.xpose.msra.mxu0 %v7888_v12  ;;  %v8343_v56 = vand.u32 4294901760, %v8342_v57  ;;  %v8793_v22 = vand.u32 4294901760, %v8792_v54 }
 0x26d   :  { %19887 = vmatprep.mubr.msk.f32.mxu1 %vm20886_vm2, %v20885_v4  ;;  %19902 = vmatprep.mubr.msk.f32.mxu0 %vm20886_vm2, %v20885_v4 }
 0x26e   :  { %19895 = vmatprep.subr.mxu1 %v20885_v4  ;;  %19910 = vmatprep.subr.mxu0 %v20885_v4 }
 0x26f   :  { %19888 = vmatmul.mubr.f32.vlgmr.msra.gmra.mxu1 %v21827_v47  ;;  %19903 = vmatmul.mubr.f32.vlgmr.msra.gmra.mxu0 %v21891_v53 }
 0x270   :  { %19896 = vmatpush3.xpose.msra.mxu1 %v7891_v59  ;;  %19911 = vmatpush3.xpose.msra.mxu0 %v7889_v55 }
 0x271   :  { %19897 = vmatprep.mubr.msk.f32.mxu1 %vm20886_vm2, %v20885_v4  ;;  %19912 = vmatprep.mubr.msk.f32.mxu0 %vm20886_vm2, %v20885_v4 }
 0x272   :  { %19905 = vmatprep.subr.mxu1 %v20885_v4  ;;  %19920 = vmatprep.subr.mxu0 %v20885_v4 }
 0x273   :  { %19898 = vmatmul.mubr.f32.vlgmr.msra.gmra.mxu1 %v21873_v35  ;;  %19913 = vmatmul.mubr.f32.vlgmr.msra.gmra.mxu0 %v21873_v35 }
 0x274   :  { %19906 = vmatpush3.xpose.msra.mxu1 %v21895_v61  ;;  %19921 = vmatpush3.xpose.msra.mxu0 %v21947_v36 }
 0x275   :  { %19907 = vmatprep.mubr.msk.f32.mxu1 %vm20886_vm2, %v20885_v4  ;;  %19922 = vmatprep.mubr.msk.f32.mxu0 %vm20886_vm2, %v20885_v4 }
 0x276   :  { %19915 = vmatprep.subr.mxu1 %v20885_v4  ;;  %19930 = vmatprep.subr.mxu0 %v20885_v4 }
 0x277   :  { %19908 = vmatmul.mubr.f32.vlgmr.msra.gmra.mxu1 %v7848_v0  ;;  %19923 = vmatmul.mubr.f32.vlgmr.msra.gmra.mxu0 %v8302_v3 }
 0x278   :  { %19916 = vmatpush3.xpose.msra.mxu1 %v21895_v61  ;;  %19931 = vmatpush3.xpose.msra.mxu0 %v8340_v29  ;;  %v1856_v34 = vpop.f32.mrf.mxu1 }
 0x279   :  { %19917 = vmatprep.mubr.msk.f32.mxu1 %vm20886_vm2, %v20885_v4  ;;  %19932 = vmatprep.mubr.msk.f32.mxu0 %vm20886_vm2, %v20885_v4 }
 0x27a   :  { %v19509_v47 = vpop.f32.mrf.mxu1  ;;  %19925 = vmatprep.subr.mxu1 %v20885_v4  ;;  %19940 = vmatprep.subr.mxu0 %v20885_v4 }
 0x27b   :  { %19918 = vmatmul.mubr.f32.vlgmr.msra.gmra.mxu1 %v21873_v35  ;;  %19933 = vmatmul.mubr.f32.vlgmr.msra.gmra.mxu0 %v21943_v14  ;;  %v8794_v35 = vsub.f32 %v8792_v54, %v8793_v22 }
 0x27c   :  { %19926 = vmatpush3.xpose.msra.mxu1 %v8343_v56  ;;  %19941 = vmatpush3.xpose.msra.mxu0 %v8341_v7  ;;  %v2004_v13 = vpop.f32.mrf.mxu1 }
 0x27d   :  { %19927 = vmatprep.mubr.msk.f32.mxu1 %vm20886_vm2, %v20885_v4  ;;  %19942 = vmatprep.mubr.msk.f32.mxu0 %vm20886_vm2, %v20885_v4  ;;  %v8795_v53 = vand.u32 4294901760, %v8794_v35 }
 0x27e   :  { %v19519_v16 = vpop.f32.mrf.mxu1  ;;  %19935 = vmatprep.subr.mxu1 %v20885_v4  ;;  %19950 = vmatprep.subr.mxu0 %v20885_v4 }
 0x27f   :  { %19928 = vmatmul.mubr.f32.vlgmr.msra.gmra.mxu1 %v21929_v49  ;;  %19943 = vmatmul.mubr.f32.vlgmr.msra.gmra.mxu0 %v21929_v49 }
 0x280   :  { %19936 = vmatpush3.xpose.msra.mxu1 %v21947_v36  ;;  %19951 = vmatpush3.xpose.msra.mxu0 %v21993_v46  ;;  %v1780_v23 = vpop.f32.mrf.mxu0  ;;  %v2150_v45 = vpop.f32.mrf.mxu1 }
 0x281   :  { %v1857_v40 = vadd.f32 %v1856_v34, %v1780_v23  ;;  %19937 = vmatprep.mubr.msk.f32.mxu1 %vm20886_vm2, %v20885_v4  ;;  %19952 = vmatprep.mubr.msk.f32.mxu0 %vm20886_vm2, %v20885_v4 }
 0x282   :  { %v19504_v15 = vpop.f32.mrf.mxu0  ;;  %v19529_v18 = vpop.f32.mrf.mxu1  ;;  %19945 = vmatprep.subr.mxu1 %v20885_v4  ;;  %19960 = vmatprep.subr.mxu0 %v20885_v4 }
 0x283   :  { %19938 = vmatmul.mubr.f32.vlgmr.msra.gmra.mxu1 %v8300_v26  ;;  %19953 = vmatmul.mubr.f32.vlgmr.msra.gmra.mxu0 %v8754_v58 }
 0x284   :  { %19946 = vmatpush3.xpose.msra.mxu1 %v21947_v36  ;;  %19961 = vmatpush3.xpose.msra.mxu0 %v8792_v54  ;;  %v1930_v48 = vpop.f32.mrf.mxu0  ;;  %v2308_v2 = vpop.f32.mrf.mxu1 }
 0x285   :  { %v1931_v20 = vadd.f32 %v1930_v48, %v1857_v40  ;;  %19947 = vmatprep.mubr.msk.f32.mxu1 %vm20886_vm2, %v20885_v4  ;;  %19962 = vmatprep.mubr.msk.f32.mxu0 %vm20886_vm2, %v20885_v4 }
 0x286   :  { %v19514_v24 = vpop.f32.mrf.mxu0  ;;  %v19539_v43 = vpop.f32.mrf.mxu1  ;;  %19955 = vmatprep.subr.mxu1 %v20885_v4  ;;  %19970 = vmatprep.subr.mxu0 %v20885_v4 }
 0x287   :  { %19948 = vmatmul.mubr.f32.vlgmr.msra.gmra.mxu1 %v21929_v49  ;;  %19963 = vmatmul.mubr.f32.vlgmr.msra.gmra.mxu0 %v21989_v63  ;;  %v2005_v6 = vadd.f32 %v2004_v13, %v1931_v20 }
 0x288   :  { %19956 = vmatpush3.xpose.msra.mxu1 %v8795_v53  ;;  %19971 = vmatpush3.xpose.msra.mxu0 %v8793_v22  ;;  %v2078_v61 = vpop.f32.mrf.mxu0  ;;  %v2456_v9 = vpop.f32.mrf.mxu1 }
 0x289   :  { %v2079_v31 = vadd.f32 %v2078_v61, %v2005_v6  ;;  %19957 = vmatprep.mubr.msk.f32.mxu1 %vm20886_vm2, %v20885_v4  ;;  %19972 = vmatprep.mubr.msk.f32.mxu0 %vm20886_vm2, %v20885_v4 }
 0x28a   :  { %v19524_v0 = vpop.f32.mrf.mxu0  ;;  %v19549_v42 = vpop.f32.mrf.mxu1  ;;  %19965 = vmatprep.subr.mxu1 %v20885_v4  ;;  %19980 = vmatprep.subr.mxu0 %v20885_v4 }
 0x28b   :  { %v22044_v12 = vadd.f32 %v2150_v45, %v2079_v31  ;;  %19958 = vmatmul.mubr.f32.vlgmr.msra.gmra.mxu1 %v21975_v39  ;;  %19973 = vmatmul.mubr.f32.vlgmr.msra.gmra.mxu0 %v21975_v39 }
 0x28c   :  { %19966 = vmatpush3.xpose.msra.mxu1 %v21993_v46  ;;  %v2232_v5 = vpop.f32.mrf.mxu0  ;;  %v2602_v25 = vpop.f32.mrf.mxu1  ;;  %19967 = vmatprep.mubr.msk.f32.mxu1 %vm20886_vm2, %v20885_v4 }
 0x28d   :  { %v2309_v44 = vadd.f32 %v2308_v2, %v2232_v5  ;;  %19975 = vmatprep.subr.mxu1 %v20885_v4  ;;  %19982 = vmatprep.mubr.msk.f32.mxu0 %vm20886_vm2, %v20885_v4 }
 0x28e   :  { %v19534_v49 = vpop.f32.mrf.mxu0  ;;  %v19559_v55 = vpop.f32.mrf.mxu1 }
 0x28f   :  { %19968 = vmatmul.mubr.f32.vlgmr.msra.gmra.mxu1 %v8752_v50 }
 0x290   :  { %19976 = vmatpush3.xpose.msra.mxu1 %v21993_v46  ;;  %v2382_v32 = vpop.f32.mrf.mxu0  ;;  %v2760_v51 = vpop.f32.mrf.mxu1  ;;  %19977 = vmatprep.mubr.msk.f32.mxu1 %vm20886_vm2, %v20885_v4 }
 0x291   :  { %v2383_v14 = vadd.f32 %v2382_v32, %v2309_v44  ;;  %19985 = vmatprep.subr.mxu1 %v20885_v4 }
 0x292   :  { %v19544_v11 = vpop.f32.mrf.mxu0  ;;  %v19569_v36 = vpop.f32.mrf.mxu1 }
 0x293   :  { %19978 = vmatmul.mubr.f32.vlgmr.msra.gmra.mxu1 %v21975_v39  ;;  %v2457_v26 = vadd.f32 %v2456_v9, %v2383_v14 }
 0x294   :  { %v2530_v59 = vpop.f32.mrf.mxu0  ;;  %v2908_v29 = vpop.f32.mrf.mxu1  ;;  %19987 = vmatprep.mubr.msk.f32.mxu1 %vm20886_vm2, %v20885_v4 }
 0x295   :  { %v2531_v41 = vadd.f32 %v2530_v59, %v2457_v26 }
 0x296   :  { %v19554_v27 = vpop.f32.mrf.mxu0  ;;  %v19579_v19 = vpop.f32.mrf.mxu1 }
 0x297   :  { %v2603_v7 = vadd.f32 %v2602_v25, %v2531_v41 }
 0x298   :  { %v2684_v33 = vpop.f32.mrf.mxu0  ;;  %v3054_v3 = vpop.f32.mrf.mxu1 }
 0x299   :  { %v2761_v63 = vadd.f32 %v2760_v51, %v2684_v33 }
 0x29a   :  { %v19564_v57 = vpop.f32.mrf.mxu0  ;;  %v19589_v46 = vpop.f32.mrf.mxu1 }
 0x29c   :  { %v2834_v34 = vpop.f32.mrf.mxu0  ;;  %v3212_v50 = vpop.f32.mrf.mxu1 }
 0x29d   :  { %v2835_v47 = vadd.f32 %v2834_v34, %v2761_v63 }
 0x29e   :  { %v19574_v56 = vpop.f32.mrf.mxu0  ;;  %v19599_v39 = vpop.f32.mrf.mxu1 }
 0x29f   :  { %v2909_v54 = vadd.f32 %v2908_v29, %v2835_v47 }
 0x2a0   :  { %v2982_v13 = vpop.f32.mrf.mxu0  ;;  %v3360_v10 = vpop.f32.mrf.mxu1 }
 0x2a1   :  { %v2983_v16 = vadd.f32 %v2982_v13, %v2909_v54 }
 0x2a2   :  { %v19584_v22 = vpop.f32.mrf.mxu0  ;;  %v19609_v23 = vpop.f32.mrf.mxu1 }
 0x2a3   :  { %v3055_v45 = vadd.f32 %v3054_v3, %v2983_v16 }
 0x2a4   :  { %v3136_v40 = vpop.f32.mrf.mxu0  ;;  %v3506_v58 = vpop.f32.mrf.mxu1 }
 0x2a5   :  { %v5318_v15 = vcombine.low %v22044_v12, %v3055_v45  ;;  %v5319_v18 = vcombine.high %v22044_v12, %v3055_v45  ;;  %v3213_v2 = vadd.f32 %v3212_v50, %v3136_v40 }
 0x2a6   :  { %v19594_v35 = vpop.f32.mrf.mxu0  ;;  %v19619_v48 = vpop.f32.mrf.mxu1 }
 0x2a7   :  { %v22070_v14 = vrot.slane %v5318_v15, %v21120_v21  ;;  %v22073_v11 = vrot.slane %v5319_v18, %v21120_v21 }
 0x2a8   :  { %v3286_v20 = vpop.f32.mrf.mxu0  ;;  %v3664_v24 = vpop.f32.mrf.mxu1 }
 0x2a9   :  { %v3287_v43 = vadd.f32 %v3286_v20, %v3213_v2 }
 0x2aa   :  { %v19604_v53 = vpop.f32.mrf.mxu0  ;;  %v19629_v6 = vpop.f32.mrf.mxu1 }
 0x2ab   :  { %v3361_v61 = vadd.f32 %v3360_v10, %v3287_v43 }
 0x2ac   :  { %v3434_v9 = vpop.f32.mrf.mxu0  ;;  %v22065_v31 = vpop.f32.mrf.mxu1 }
 0x2ad   :  { %v3435_v0 = vadd.f32 %v3434_v9, %v3361_v61 }
 0x2ae   :  { %v19614_v42 = vpop.f32.mrf.mxu0  ;;  %v19639_v5 = vpop.f32.mrf.mxu1 }
 0x2af   :  { %v3507_v25 = vadd.f32 %v3506_v58, %v3435_v0 }
 0x2b0   :  { %v3588_v44 = vpop.f32.mrf.mxu0  ;;  %v22067_v49 = vpop.f32.mrf.mxu1 }
 0x2b1   :  { %v5334_v12 = vcombine.low %v2603_v7, %v3507_v25  ;;  %v5335_v55 = vcombine.high %v2603_v7, %v3507_v25 }
 0x2b2   :  { %v19624_v32 = vpop.f32.mrf.mxu0  ;;  %v19649_v51 = vpop.f32.mrf.mxu1 }
 0x2b3   :  { %v22076_v36 = vrot.slane %v5334_v12, %v21120_v21  ;;  %v22079_v26 = vrot.slane %v5335_v55, %v21120_v21  ;;  %v3665_v12 = vadd.f32 %v3664_v24, %v3588_v44 }
 0x2b4   :  { %v3738_v59 = vpop.f32.mrf.mxu0  ;;  %v4116_v29 = vpop.f32.mrf.mxu1 }
 0x2b5   :  { %v5382_v41 = vcombine.low %v22070_v14, %v22076_v36  ;;  %v5383_v27 = vcombine.high %v22070_v14, %v22076_v36  ;;  %v5398_v19 = vcombine.low %v22073_v11, %v22079_v26  ;;  %v5399_v3 = vcombine.high %v22073_v11, %v22079_v26 }
 0x2b6   :  { %v19634_v7 = vpop.f32.mrf.mxu0  ;;  %v19659_v33 = vpop.f32.mrf.mxu1 }
 0x2b8   :  { %v3886_v63 = vpop.f32.mrf.mxu0  ;;  %v4264_v57 = vpop.f32.mrf.mxu1 }
 0x2ba   :  { %v19644_v46 = vpop.f32.mrf.mxu0  ;;  %v19669_v34 = vpop.f32.mrf.mxu1 }
 0x2bb   :  { %v3739_v46 = vadd.f32 %v3738_v59, %v3665_v12 }
 0x2bc   :  { %v4040_v50 = vpop.f32.mrf.mxu0  ;;  %v4410_v47 = vpop.f32.mrf.mxu1 }
 0x2bd   :  { %v4117_v0 = vadd.f32 %v4116_v29, %v4040_v50 }
 0x2be   :  { %v19654_v56 = vpop.f32.mrf.mxu0  ;;  %v19679_v39 = vpop.f32.mrf.mxu1 }
 0x2c0   :  { %v4190_v54 = vpop.f32.mrf.mxu0  ;;  %v4568_v13 = vpop.f32.mrf.mxu1 }
 0x2c1   :  { %v4191_v55 = vadd.f32 %v4190_v54, %v4117_v0  ;;  %v20890_v54 = vmov 1966171168  }
 0x2c2   :  { %v19664_v10 = vpop.f32.mrf.mxu0  ;;  %v19689_v16 = vpop.f32.mrf.mxu1 }
 0x2c3   :  { %v4265_v39 = vadd.f32 %v4264_v57, %v4191_v55 }
 0x2c4   :  { %v4338_v22 = vpop.f32.mrf.mxu0  ;;  %v4716_v23 = vpop.f32.mrf.mxu1 }
 0x2c5   :  { %v4339_v50 = vadd.f32 %v4338_v22, %v4265_v39  ;;  %v5454_v22 = vld [vmem:[%s23655_s1] sm:$0xff]  ;;  %s20892_s1 = smov 64  }
 0x2c6   :  { %v19674_v45 = vpop.f32.mrf.mxu0  ;;  %v19699_v40 = vpop.f32.mrf.mxu1  ;;  %vm5455_vm3 = vcmp.gt.f32.partialorder %v5454_v22, 0.0 }
 0x2c7   :  { %v3813_v40 = vadd.f32 %v22065_v31, %v3739_v46 }
 0x2c8   :  { %v4492_v58 = vpop.f32.mrf.mxu0  ;;  %v4862_v15 = vpop.f32.mrf.mxu1 }
 0x2c9   :  { %v4569_v42 = vadd.f32 %v4568_v13, %v4492_v58  ;;  %v3887_v24 = vadd.f32 %v3886_v63, %v3813_v40 }
 0x2ca   :  { %v19684_v18 = vpop.f32.mrf.mxu0  ;;  %v19709_v35 = vpop.f32.mrf.mxu1 }
 0x2cb   :  { %v5459_v35 = vunpack.c.l.s4 %v20890_v54  ;;  %v22097_v57 = vadd.f32 %v22067_v49, %v3887_v24 }
 0x2cc   :  { %v4642_v48 = vpop.f32.mrf.mxu0  ;;  %v5020_v2 = vpop.f32.mrf.mxu1 }
 0x2cd   :  { %v4643_v32 = vadd.f32 %v4642_v48, %v4569_v42  ;;  %v22092_v48 = vadd.f32 %v4410_v47, %v4339_v50  ;;  %v5390_v42 = vrot.slane %v5382_v41, %v21125_v30 }
 0x2ce   :  { %v19694_v20 = vpop.f32.mrf.mxu0  ;;  %v19719_v43 = vpop.f32.mrf.mxu1 }
 0x2cf   :  { %v4717_v10 = vadd.f32 %v4716_v23, %v4643_v32  ;;  %v5460_v23 = vunpack.c.0.s8 %v5459_v35 }
 0x2d0   :  { %v4790_v53 = vpop.f32.mrf.mxu0  ;;  %v5168_v6 = vpop.f32.mrf.mxu1 }
 0x2d1   :  { %v4791_v13 = vadd.f32 %v4790_v53, %v4717_v10 }
 0x2d2   :  { %v19704_v61 = vpop.f32.mrf.mxu0  ;;  %v19729_v9 = vpop.f32.mrf.mxu1 }
 0x2d3   :  { %v22094_v59 = vadd.f32 %v4862_v15, %v4791_v13  ;;  %v22108_v15 = vsub.s32 %v5460_v23, %v21117_v17 }
 0x2d4   :  { %v4944_v5 = vpop.f32.mrf.mxu0  ;;  %v5314_v25 = vpop.f32.mrf.mxu1 }
 0x2d5   :  { %v5021_v33 = vadd.f32 %v5020_v2, %v4944_v5  ;;  %v5350_v63 = vcombine.low %v22097_v57, %v22094_v59  ;;  %v20891_v2 = vmov 0  }
 0x2d6   :  { %v19714_v51 = vpop.f32.mrf.mxu0  ;;  %v19739_v7 = vpop.f32.mrf.mxu1  ;;  %v22112_v20 = vsel %vm5455_vm3, 1, %v20891_v2 }
 0x2d7   :  { %v5358_v49 = vrot.slane %v5350_v63, %v21120_v21  ;;  %v5464_v53 = vrot.slane %v22112_v20, %v22108_v15  ;;  %v22123_v7 = vsub.s32 0, %v21117_v17 }
 0x2d8   :  { %v5094_v34 = vpop.f32.mrf.mxu0 }
 0x2d9   :  { %v5095_v56 = vadd.f32 %v5094_v34, %v5021_v33  ;;  %v5480_v0 = vrot.slane %v5464_v53, %v22108_v15  ;;  %v5472_v39 = vcombine.high %v5464_v53, %v5464_v53 }
 0x2da   :  { %v19724_v16 = vpop.f32.mrf.mxu0 }
 0x2db   :  { %v5169_v45 = vadd.f32 %v5168_v6, %v5095_v56  ;;  %vm5506_vm4 = vcmp.ne.s32.totalorder %v5480_v0, 0  ;;  %v22128_v50 = vrot.slane %v5472_v39, %v22108_v15 }
 0x2dc   :  { %v5242_v18 = vpop.f32.mrf.mxu0  ;;  %v9130_v46 = vsel %vm5506_vm4, 1, %v20891_v2 }
 0x2dd   :  { %v5243_v29 = vadd.f32 %v5242_v18, %v5169_v45  ;;  %v9141_v41 = vrot.slane %v9130_v46, %v22123_v7  ;;  %vm5507_vm6 = vcmp.ne.s32.totalorder %v22128_v50, 0 }
 0x2de   :  { %v19734_v58 = vpop.f32.mrf.mxu0 }
 0x2df   :  { %v22090_v44 = vadd.f32 %v5314_v25, %v5243_v29  ;;  %vm9170_vm5 = vcmp.eq.s32.totalorder %v9141_v41, 1 }
 0x2e1   :  { %v5366_v31 = vcombine.low %v22092_v48, %v22090_v44 }
 0x2e3   :  { %v5374_v47 = vrot.slane %v5366_v31, %v21120_v21 }
 0x2e5   :  { %v5414_v43 = vcombine.low %v5358_v49, %v5374_v47 }
 0x2e7   :  { %v5422_v61 = vrot.slane %v5414_v43, %v21125_v30 }
 0x2e9   :  { %v5446_v25 = vcombine.low %v5390_v42, %v5422_v61  ;;  %v5447_v24 = vcombine.high %v5390_v42, %v5422_v61 }
 0x2ef   :  { %v5592_v6 = vpop.f32.mrf.mxu0 }
 0x2f0   :  { %v5593_v55 = vadd.f32 %v5592_v6, %v5446_v25 }
 0x2f1   :  { %v19744_v9 = vpop.f32.mrf.mxu0 }
 0x2f2   :  { %v5415_v9 = vcombine.high %v5358_v49, %v5374_v47  ;;  %v5397_v47 = vrot.slane %v5383_v27, %v21125_v30 }
 0x2f3   :  { %v5742_v5 = vpop.f32.mrf.mxu0 }
 0x2f5   :  { %v19754_v12 = vpop.f32.mrf.mxu0 }
 0x2f7   :  { %v5668_v32 = vpop.f32.mrf.mxu1  ;;  %v5890_v51 = vpop.f32.mrf.mxu0 }
 0x2f8   :  { %v5669_v33 = vadd.f32 %v5668_v32, %v5593_v55 }
 0x2f9   :  { %v19749_v34 = vpop.f32.mrf.mxu1  ;;  %v19764_v56 = vpop.f32.mrf.mxu0 }
 0x2fa   :  { %v5743_v10 = vadd.f32 %v5742_v5, %v5669_v33  ;;  %v9131_v5 = vsel %vm5507_vm6, 1, %v20891_v2  ;;  %v5429_v33 = vrot.slane %v5415_v9, %v21125_v30  ;;  %v5502_v56 = vcombine.high %v5480_v0, %v5480_v0 }
 0x2fb   :  { %v5816_v16 = vpop.f32.mrf.mxu1  ;;  %v6044_v45 = vpop.f32.mrf.mxu0  ;;  %v9145_v32 = vrot.slane %v9131_v5, %v22123_v7  ;;  %v5351_v9 = vcombine.high %v22097_v57, %v22094_v59 }
 0x2fc   :  { %v5817_v40 = vadd.f32 %v5816_v16, %v5743_v10  ;;  %v6045_v22 = vadd.f32 %v6044_v45, %v5447_v24  ;;  %v5448_v16 = vcombine.low %v5397_v47, %v5429_v33  ;;  %vm5508_vm8 = vcmp.ne.s32.totalorder %v5502_v56, 0 }
 0x2fd   :  { %v19759_v18 = vpop.f32.mrf.mxu1  ;;  %v19774_v29 = vpop.f32.mrf.mxu0  ;;  %vm9171_vm7 = vcmp.eq.s32.totalorder %v9145_v32, 1  ;;  %v9132_v14 = vsel %vm5508_vm8, 1, %v20891_v2 }
 0x2fe   :  { %v5891_v13 = vadd.f32 %v5890_v51, %v5817_v40 }
 0x2ff   :  { %v5962_v17 = vpop.f32.mrf.mxu1  ;;  %v6194_v58 = vpop.f32.mrf.mxu0 }
 0x300   :  { %v5963_v54 = vadd.f32 %v5962_v17, %v5891_v13 }
 0x301   :  { %v19769_v35 = vpop.f32.mrf.mxu1  ;;  %v19784_v31 = vpop.f32.mrf.mxu0 }
 0x302   :  { %v22131_v23 = vsel %vm9170_vm5, %v5963_v54, -1e+10  ;;  %v9149_v31 = vrot.slane %v9132_v14, %v22123_v7 }
 0x303   :  { %v6120_v63 = vpop.f32.mrf.mxu1  ;;  %v6342_v43 = vpop.f32.mrf.mxu0  ;;  %v9186_v53 = vsel %vm1701_vm1, %v22131_v23, -inf }
 0x304   :  { %v6121_v6 = vadd.f32 %v6120_v63, %v6045_v22  ;;  %9187 = vmax.xlane.f32.xlu0 %v9186_v53  ;;  %v5367_v22 = vcombine.high %v22092_v48, %v22090_v44  ;;  %vm9172_vm9 = vcmp.eq.s32.totalorder %v9149_v31, 1  ;;  %v5457_v48 = vcombine.high %v22112_v20, %v22112_v20 }
 0x305   :  { %v19779_v25 = vpop.f32.mrf.mxu1  ;;  %v19794_v61 = vpop.f32.mrf.mxu0 }
 0x306   :  { %v6195_v42 = vadd.f32 %v6194_v58, %v6121_v6  ;;  %v5504_v6 = vcombine.high %v22128_v50, %v22128_v50  ;;  %v22160_v50 = vrot.slane %v5351_v9, %v21120_v21 }
 0x307   :  { %v6268_v12 = vpop.f32.mrf.mxu1  ;;  %v6496_v55 = vpop.f32.mrf.mxu0 }
 0x308   :  { %v6269_v51 = vadd.f32 %v6268_v12, %v6195_v42  ;;  %v6497_v18 = vadd.f32 %v6496_v55, %v5448_v16  ;;  %v22155_v42 = vrot.slane %v5367_v22, %v21120_v21  ;;  %v5449_v12 = vcombine.high %v5397_v47, %v5429_v33 }
 0x309   :  { %v19789_v46 = vpop.f32.mrf.mxu1  ;;  %v19804_v34 = vpop.f32.mrf.mxu0  ;;  %vm5509_vm10 = vcmp.ne.s32.totalorder %v5504_v6, 0 }
 0x30a   :  { %v6343_v49 = vadd.f32 %v6342_v43, %v6269_v51  ;;  %v5430_v33 = vcombine.low %v22160_v50, %v22155_v42  ;;  %v9133_v47 = vsel %vm5509_vm10, 1, %v20891_v2 }
 0x30b   :  { %v6414_v39 = vpop.f32.mrf.mxu1  ;;  %v6646_v10 = vpop.f32.mrf.mxu0 }
 0x30c   :  { %v6415_v45 = vadd.f32 %v6414_v39, %v6343_v49  ;;  %v5471_v39 = vrot.slane %v5457_v48, %v22108_v15 }
 0x30d   :  { %v19799_v41 = vpop.f32.mrf.mxu1  ;;  %v19814_v40 = vpop.f32.mrf.mxu0 }
 0x30e   :  { %v22142_v29 = vsel %vm9171_vm7, %v6415_v45, -1e+10  ;;  %v9153_v41 = vrot.slane %v9133_v47, %v22123_v7  ;;  %vm17039_vm7 = vcmask 195584  }
 0x30f   :  { %v6572_v13 = vpop.f32.mrf.mxu1  ;;  %v6794_v17 = vpop.f32.mrf.mxu0  ;;  %v9189_v0 = vsel %vm1701_vm1, %v22142_v29, -inf }
 0x310   :  { %v6573_v58 = vadd.f32 %v6572_v13, %v6497_v18  ;;  %9190 = vmax.xlane.f32.xlu1 %v9189_v0  ;;  %v5438_v18 = vrot.slane %v5430_v33, %v21125_v30  ;;  %v22173_v0 = vrot.slane %v5471_v39, %v22108_v15  ;;  %vm9173_vm11 = vcmp.eq.s32.totalorder %v9153_v41, 1 }
 0x311   :  { %v19809_v36 = vpop.f32.mrf.mxu1  ;;  %v19824_v27 = vpop.f32.mrf.mxu0 }
 0x312   :  { %v6647_v24 = vadd.f32 %v6646_v10, %v6573_v58  ;;  %v5406_v58 = vrot.slane %v5398_v19, %v21125_v30  ;;  %vm5510_vm12 = vcmp.ne.s32.totalorder %v22173_v0, 0 }
 0x313   :  { %v6720_v54 = vpop.f32.mrf.mxu1  ;;  %v6948_v35 = vpop.f32.mrf.mxu0  ;;  %v9134_v19 = vsel %vm5510_vm12, 1, %v20891_v2 }
 0x314   :  { %v6721_v63 = vadd.f32 %v6720_v54, %v6647_v24  ;;  %v6949_v51 = vadd.f32 %v6948_v35, %v5449_v12  ;;  %v5450_v24 = vcombine.low %v5406_v58, %v5438_v18  ;;  %v5451_v47 = vcombine.high %v5406_v58, %v5438_v18 }
 0x315   :  { %v19819_v43 = vpop.f32.mrf.mxu1  ;;  %v19834_v53 = vpop.f32.mrf.mxu0 }
 0x316   :  { %v6795_v5 = vadd.f32 %v6794_v17, %v6721_v63 }
 0x317   :  { %v6866_v25 = vpop.f32.mrf.mxu1  ;;  %v7098_v61 = vpop.f32.mrf.mxu0 }
 0x318   :  { %v6867_v55 = vadd.f32 %v6866_v25, %v6795_v5 }
 0x319   :  { %v19829_v32 = vpop.f32.mrf.mxu1  ;;  %v19844_v44 = vpop.f32.mrf.mxu0 }
 0x31a   :  { %v22162_v59 = vsel %vm9172_vm9, %v6867_v55, -1e+10  ;;  %v9157_v44 = vrot.slane %v9134_v19, %v22123_v7 }
 0x31b   :  { %v7024_v57 = vpop.f32.mrf.mxu1  ;;  %v7246_v46 = vpop.f32.mrf.mxu0  ;;  %v9192_v34 = vsel %vm1701_vm1, %v22162_v59, -inf }
 0x31c   :  { %v7025_v56 = vadd.f32 %v7024_v57, %v6949_v51  ;;  %9193 = vmax.xlane.f32.xlu0 %v9192_v34  ;;  %vm9174_vm13 = vcmp.eq.s32.totalorder %v9157_v44, 1 }
 0x31d   :  { %v19839_v49 = vpop.f32.mrf.mxu1  ;;  %v19854_v20 = vpop.f32.mrf.mxu0 }
 0x31e   :  { %v7099_v10 = vadd.f32 %v7098_v61, %v7025_v56  ;;  %v5473_v61 = vcombine.high %v5471_v39, %v5471_v39 }
 0x31f   :  { %v7172_v16 = vpop.f32.mrf.mxu1  ;;  %v7400_v45 = vpop.f32.mrf.mxu0 }
 0x320   :  { %v7173_v40 = vadd.f32 %v7172_v16, %v7099_v10  ;;  %v7401_v22 = vadd.f32 %v7400_v45, %v5450_v24 }
 0x321   :  { %v19849_v13 = vpop.f32.mrf.mxu1  ;;  %v19864_v17 = vpop.f32.mrf.mxu0 }
 0x322   :  { %v7247_v14 = vadd.f32 %v7246_v46, %v7173_v40  ;;  %v22187_v46 = vrot.slane %v5473_v61, %v22108_v15  ;;  %v5431_v13 = vcombine.high %v22160_v50, %v22155_v42  ;;  %v5413_v42 = vrot.slane %v5399_v3, %v21125_v30 }
 0x323   :  { %v7318_v36 = vpop.f32.mrf.mxu1  ;;  %v7550_v27 = vpop.f32.mrf.mxu0 }
 0x324   :  { %v7319_v54 = vadd.f32 %v7318_v36, %v7247_v14  ;;  %vm5511_vm14 = vcmp.ne.s32.totalorder %v22187_v46, 0 }
 0x325   :  { %v19859_v35 = vpop.f32.mrf.mxu1  ;;  %v19874_v31 = vpop.f32.mrf.mxu0  ;;  %v9135_v18 = vsel %vm5511_vm14, 1, %v20891_v2 }
 0x326   :  { %v22180_v63 = vsel %vm9173_vm11, %v7319_v54, -1e+10  ;;  %v9161_v24 = vrot.slane %v9135_v18, %v22123_v7  ;;  %v5445_v35 = vrot.slane %v5431_v13, %v21125_v30 }
 0x327   :  { %v7476_v43 = vpop.f32.mrf.mxu1  ;;  %v7698_v53 = vpop.f32.mrf.mxu0  ;;  %v9195_v6 = vsel %vm1701_vm1, %v22180_v63, -inf }
 0x328   :  { %v7477_v9 = vadd.f32 %v7476_v43, %v7401_v22  ;;  %9196 = vmax.xlane.f32.xlu0 %v9195_v6  ;;  %v5503_v43 = vcombine.high %v22173_v0, %v22173_v0  ;;  %vm9175_vm15 = vcmp.eq.s32.totalorder %v9161_v24, 1 }
 0x329   :  { %v19869_v5 = vpop.f32.mrf.mxu1  ;;  %v19884_v25 = vpop.f32.mrf.mxu0 }
 0x32a   :  { %v7551_v12 = vadd.f32 %v7550_v27, %v7477_v9  ;;  %v5452_v9 = vcombine.low %v5413_v42, %v5445_v35  ;;  %vm5512_vm3 = vcmp.ne.s32.totalorder %v5503_v43, 0 }
 0x32b   :  { %v7624_v55 = vpop.f32.mrf.mxu1  ;;  %v7852_v32 = vpop.f32.mrf.mxu0  ;;  %v9136_v11 = vsel %vm5512_vm3, 1, %v20891_v2 }
 0x32c   :  { %v7625_v48 = vadd.f32 %v7624_v55, %v7551_v12  ;;  %v7853_v39 = vadd.f32 %v7852_v32, %v5451_v47 }
 0x32d   :  { %v19879_v51 = vpop.f32.mrf.mxu1  ;;  %v19894_v57 = vpop.f32.mrf.mxu0 }
 0x32e   :  { %v7699_v34 = vadd.f32 %v7698_v53, %v7625_v48 }
 0x32f   :  { %v7770_v56 = vpop.f32.mrf.mxu1  ;;  %v8002_v33 = vpop.f32.mrf.mxu0 }
 0x330   :  { %v7771_v49 = vadd.f32 %v7770_v56, %v7699_v34  ;;  %v9165_v34 = vrot.slane %v9136_v11, %v22123_v7 }
 0x331   :  { %v19889_v20 = vpop.f32.mrf.mxu1  ;;  %v19904_v10 = vpop.f32.mrf.mxu0 }
 0x332   :  { %v22190_v16 = vsel %vm9174_vm13, %v7771_v49, -1e+10  ;;  %v5505_v49 = vcombine.high %v22187_v46, %v22187_v46  ;;  %vm9176_vm4 = vcmp.eq.s32.totalorder %v9165_v34, 1 }
 0x333   :  { %v7928_v45 = vpop.f32.mrf.mxu1  ;;  %v8150_v41 = vpop.f32.mrf.mxu0  ;;  %v9198_v40 = vsel %vm1701_vm1, %v22190_v16, -inf }
 0x334   :  { %v7929_v15 = vadd.f32 %v7928_v45, %v7853_v39  ;;  %9199 = vmax.xlane.f32.xlu1 %v9198_v40  ;;  %v5453_v45 = vcombine.high %v5413_v42, %v5445_v35  ;;  %vm5513_vm5 = vcmp.ne.s32.totalorder %v5505_v49, 0 }
 0x335   :  { %v19899_v17 = vpop.f32.mrf.mxu1  ;;  %v19914_v58 = vpop.f32.mrf.mxu0  ;;  %v9137_v46 = vsel %vm5513_vm5, 1, %v20891_v2 }
 0x336   :  { %v8003_v14 = vadd.f32 %v8002_v33, %v7929_v15 }
 0x337   :  { %v8076_v36 = vpop.f32.mrf.mxu1  ;;  %v8304_v27 = vpop.f32.mrf.mxu0 }
 0x338   :  { %v8077_v54 = vadd.f32 %v8076_v36, %v8003_v14  ;;  %v8305_v61 = vadd.f32 %v8304_v27, %v5452_v9 }
 0x339   :  { %v19909_v31 = vpop.f32.mrf.mxu1  ;;  %v19924_v22 = vpop.f32.mrf.mxu0 }
 0x33a   :  { %v8151_v50 = vadd.f32 %v8150_v41, %v8077_v54  ;;  %v9169_v31 = vrot.slane %v9137_v46, %v22123_v7 }
 0x33b   :  { %v8222_v53 = vpop.f32.mrf.mxu1  ;;  %v8454_v6 = vpop.f32.mrf.mxu0 }
 0x33c   :  { %v8223_v19 = vadd.f32 %v8222_v53, %v8151_v50  ;;  %vm9177_vm6 = vcmp.eq.s32.totalorder %v9169_v31, 1 }
 0x33d   :  { %v19919_v5 = vpop.f32.mrf.mxu1  ;;  %v19934_v25 = vpop.f32.mrf.mxu0 }
 0x33e   :  { %v22205_v12 = vsel %vm9175_vm15, %v8223_v19, -1e+10 }
 0x33f   :  { %v8380_v55 = vpop.f32.mrf.mxu1  ;;  %v8602_v32 = vpop.f32.mrf.mxu0  ;;  %v9201_v0 = vsel %vm1701_vm1, %v22205_v12, -inf }
 0x340   :  { %v8381_v44 = vadd.f32 %v8380_v55, %v8305_v61  ;;  %9202 = vmax.xlane.f32.xlu0 %v9201_v0 }
 0x341   :  { %v19929_v26 = vpop.f32.mrf.mxu1  ;;  %v19944_v3 = vpop.f32.mrf.mxu0 }
 0x342   :  { %v8455_v48 = vadd.f32 %v8454_v6, %v8381_v44 }
 0x343   :  { %v8528_v51 = vpop.f32.mrf.mxu1  ;;  %v8756_v57 = vpop.f32.mrf.mxu0 }
 0x344   :  { %v8529_v56 = vadd.f32 %v8528_v51, %v8455_v48  ;;  %v8757_v13 = vadd.f32 %v8756_v57, %v5453_v45 }
 0x345   :  { %v19939_v33 = vpop.f32.mrf.mxu1  ;;  %v19954_v47 = vpop.f32.mrf.mxu0 }
 0x346   :  { %v8603_v20 = vadd.f32 %v8602_v32, %v8529_v56 }
 0x347   :  { %v8674_v10 = vpop.f32.mrf.mxu1  ;;  %v8906_v39 = vpop.f32.mrf.mxu0 }
 0x348   :  { %v8675_v41 = vadd.f32 %v8674_v10, %v8603_v20 }
 0x349   :  { %v19949_v40 = vpop.f32.mrf.mxu1  ;;  %v19964_v15 = vpop.f32.mrf.mxu0 }
 0x34a   :  { %v22213_v18 = vsel %vm9176_vm4, %v8675_v41, -1e+10 }
 0x34b   :  { %v8832_v17 = vpop.f32.mrf.mxu1  ;;  %v9054_v58 = vpop.f32.mrf.mxu0  ;;  %v9204_v14 = vsel %vm1701_vm1, %v22213_v18, -inf }
 0x34c   :  { %v8833_v36 = vadd.f32 %v8832_v17, %v8757_v13  ;;  %9205 = vmax.xlane.f32.xlu1 %v9204_v14 }
 0x34d   :  { %v19959_v27 = vpop.f32.mrf.mxu1  ;;  %v19974_v24 = vpop.f32.mrf.mxu0 }
 0x34e   :  { %v8907_v54 = vadd.f32 %v8906_v39, %v8833_v36 }
 0x34f   :  { %v8980_v35 = vpop.f32.mrf.mxu1 }
 0x350   :  { %v8981_v22 = vadd.f32 %v8980_v35, %v8907_v54 }
 0x351   :  { %v19969_v43 = vpop.f32.mrf.mxu1 }
 0x352   :  { %v9055_v42 = vadd.f32 %v9054_v58, %v8981_v22 }
 0x353   :  { %v9126_v50 = vpop.f32.mrf.mxu1 }
 0x354   :  { %v9127_v53 = vadd.f32 %v9126_v50, %v9055_v42 }
 0x355   :  { %v19979_v6 = vpop.f32.mrf.mxu1 }
 0x356   :  { %v9185_v9 = vsel %vm9177_vm6, %v9127_v53, -1e+10 }
 0x357   :  { %v9207_v19 = vsel %vm1701_vm1, %v9185_v9, -inf }
 0x358   :  { %9208 = vmax.xlane.f32.xlu0 %v9207_v19 }
 0x38d   :  { %v9188_v5 = vpop.xlane.xlu0 %9187 }
 0x38e   :  { %v9210_v2 = vsub.f32 %v22131_v23, %v9188_v5 }
 0x390   :  { %v9218_v25 = vmul.f32 1.442695, %v9210_v2 }
 0x392   :  { %20726 = vpow2.f32 %v9218_v25 }
 0x399   :  { %v9191_v61 = vpop.xlane.xlu1 %9190 }
 0x39a   :  { %v9211_v55 = vsub.f32 %v22142_v29, %v9191_v61 }
 0x39c   :  { %v9220_v7 = vmul.f32 1.442695, %v9211_v55 }
 0x39e   :  { %20728 = vpow2.f32 %v9220_v7 }
 0x39f   :  { %v22222_v32 = vpop.eup %20726 }
 0x3a0   :  { %v9234_v0 = vsel %vm1701_vm1, %v22222_v32, 0.0 }
 0x3a1   :  { %9235 = vadd.xlane.f32.xlu1 %v9234_v0 }
 0x3a5   :  { %v9194_v44 = vpop.xlane.xlu0 %9193 }
 0x3a6   :  { %v9212_v11 = vsub.f32 %v22162_v59, %v9194_v44 }
 0x3a8   :  { %v9222_v26 = vmul.f32 1.442695, %v9212_v11 }
 0x3aa   :  { %20730 = vpow2.f32 %v9222_v26 }
 0x3ab   :  { %v22227_v3 = vpop.eup %20728 }
 0x3ac   :  { %v9237_v23 = vsel %vm1701_vm1, %v22227_v3, 0.0 }
 0x3ad   :  { %9238 = vadd.xlane.f32.xlu0 %v9237_v23 }
 0x3b1   :  { %v9197_v29 = vpop.xlane.xlu0 %9196 }
 0x3b2   :  { %v9213_v48 = vsub.f32 %v22180_v63, %v9197_v29 }
 0x3b4   :  { %v9224_v51 = vmul.f32 1.442695, %v9213_v48 }
 0x3b6   :  { %20732 = vpow2.f32 %v9224_v51  ;;  %v9411_v51 = vld [vmem:[#allocation7 + $0x8] sm:$0xff] }
 0x3b7   :  { %v22232_v57 = vpop.eup %20730 }
 0x3b8   :  { %v9240_v34 = vsel %vm1701_vm1, %v22232_v57, 0.0 }
 0x3b9   :  { %9241 = vadd.xlane.f32.xlu1 %v9240_v34 }
 0x3bd   :  { %v9200_v59 = vpop.xlane.xlu1 %9199 }
 0x3be   :  { %v9214_v56 = vsub.f32 %v22190_v16, %v9200_v59 }
 0x3c0   :  { %v9226_v33 = vmul.f32 1.442695, %v9214_v56  ;;  %v22307_v56 = vand.u32 4294901760, %v9411_v51 }
 0x3c2   :  { %20734 = vpow2.f32 %v9226_v33 }
 0x3c3   :  { %v22237_v47 = vpop.eup %20732 }
 0x3c4   :  { %v9243_v49 = vsel %vm1701_vm1, %v22237_v47, 0.0 }
 0x3c5   :  { %9244 = vadd.xlane.f32.xlu0 %v9243_v49 }
 0x3c9   :  { %v9203_v63 = vpop.xlane.xlu0 %9202 }
 0x3ca   :  { %v9215_v20 = vsub.f32 %v22205_v12, %v9203_v63  ;;  %v22312_v63 = vsub.f32 %v9411_v51, %v22307_v56 }
 0x3cc   :  { %v9228_v10 = vmul.f32 1.442695, %v9215_v20 }
 0x3ce   :  { %20736 = vpow2.f32 %v9228_v10 }
 0x3cf   :  { %v22242_v39 = vpop.eup %20734 }
 0x3d0   :  { %v9246_v45 = vsel %vm1701_vm1, %v22242_v39, 0.0 }
 0x3d1   :  { %9247 = vadd.xlane.f32.xlu1 %v9246_v45 }
 0x3d5   :  { %v9206_v16 = vpop.xlane.xlu1 %9205 }
 0x3d6   :  { %v9216_v41 = vsub.f32 %v22213_v18, %v9206_v16  ;;  %v9410_v18 = vld [vmem:[#allocation7] sm:$0xff]  ;;  %v9979_v16 = vand.u32 4294901760, %v22312_v63 }
 0x3d7   :  { %v22261_v24 = vand.u32 4294901760, %v9410_v18 }
 0x3d8   :  { %v9230_v40 = vmul.f32 1.442695, %v9216_v41 }
 0x3d9   :  { %v22264_v54 = vsub.f32 %v9410_v18, %v22261_v24  ;;  %19981 = vmatpush3.msra.mxu0 %v22261_v24 }
 0x3da   :  { %20738 = vpow2.f32 %v9230_v40  ;;  %19990 = vmatprep.subr.mxu0 %v20885_v4 }
 0x3db   :  { %v22247_v15 = vpop.eup %20736 }
 0x3dc   :  { %v9249_v13 = vsel %vm1701_vm1, %v22247_v15, 0.0 }
 0x3dd   :  { %9250 = vadd.xlane.f32.xlu0 %v9249_v13 }
 0x3e1   :  { %v9209_v12 = vpop.xlane.xlu0 %9208 }
 0x3e2   :  { %v9217_v17 = vsub.f32 %v9185_v9, %v9209_v12 }
 0x3e4   :  { %v9232_v58 = vmul.f32 1.442695, %v9217_v17 }
 0x3e6   :  { %20740 = vpow2.f32 %v9232_v58  ;;  %v9980_v58 = vsub.f32 %v22312_v63, %v9979_v16 }
 0x3e7   :  { %v20739_v14 = vpop.eup %20738 }
 0x3e8   :  { %v9252_v36 = vsel %vm1701_vm1, %v20739_v14, 0.0 }
 0x3e9   :  { %9253 = vadd.xlane.f32.xlu1 %v9252_v36 }
 0x3f3   :  { %v20741_v46 = vpop.eup %20740 }
 0x3f4   :  { %v9255_v27 = vsel %vm1701_vm1, %v20741_v46, 0.0 }
 0x3f5   :  { %9256 = vadd.xlane.f32.xlu0 %v9255_v27 }
 0x3fa   :  { %1261 = vrot.lane.b32.xlu1 %v21072_v62, %s20892_s1  ;;  %v9530_v62 = vand.u32 4294901760, %v22264_v54 }
 0x3fe   :  { %1269 = vrot.lane.b32.xlu1 %v21133_v37, %s20892_s1  ;;  %v9531_v37 = vsub.f32 %v22264_v54, %v9530_v62 }
 0x402   :  { %1273 = vrot.lane.b32.xlu1 %v21147_v52, %s20892_s1 }
 0x406   :  { %1267 = vrot.lane.b32.xlu1 %v21157_v1, %s20892_s1 }
 0x40a   :  { %1275 = vrot.lane.b32.xlu1 %v21187_v28, %s20892_s1 }
 0x40b   :  { %1265 = vrot.lane.b32.xlu0 %v21135_v38, %s20892_s1  ;;  %v9532_v38 = vand.u32 4294901760, %v9531_v37 }
 0x40d   :  { %19986 = vmatpush3.msra.mxu1 %v9532_v38  ;;  %v9981_v38 = vand.u32 4294901760, %v9980_v58  ;;  %v9415_v58 = vld [vmem:[#allocation7 + $0x28] sm:$0xff] }
 0x40e   :  { %19995 = vmatprep.subr.mxu1 %v20885_v4 }
 0x40f   :  { %1263 = vrot.lane.b32.xlu0 %v21070_v60, %s20892_s1 }
 0x413   :  { %1271 = vrot.lane.b32.xlu0 %v21162_v8, %s20892_s1 }
 0x42a   :  { %v9236_v60 = vpop.xlane.xlu1 %9235 }
 0x436   :  { %v9239_v52 = vpop.xlane.xlu0 %9238 }
 0x442   :  { %v9242_v1 = vpop.xlane.xlu1 %9241 }
 0x44e   :  { %v9245_v8 = vpop.xlane.xlu0 %9244 }
 0x44f   :  { %20742 = vrcp.f32 %v9245_v8 }
 0x450   :  { %20744 = vrcp.f32 %v9239_v52 }
 0x451   :  { %20746 = vrcp.f32 %v9242_v1 }
 0x452   :  { %20748 = vrcp.f32 %v9236_v60 }
 0x45a   :  { %v9248_v28 = vpop.xlane.xlu1 %9247 }
 0x45c   :  { %v20743_v43 = vpop.eup %20742 }
 0x45d   :  { %v20745_v42 = vpop.eup %20744  ;;  %v22274_v6 = vmul.f32 %v20743_v43, %v22237_v47 }
 0x45e   :  { %v20747_v50 = vpop.eup %20746  ;;  %v22277_v5 = vmul.f32 %v20745_v42, %v22227_v3 }
 0x45f   :  { %v20749_v53 = vpop.eup %20748  ;;  %v22280_v2 = vmul.f32 %v20747_v50, %v22232_v57 }
 0x460   :  { %v22283_v61 = vmul.f32 %v20749_v53, %v22222_v32  ;;  %v9290_v7 = vcombine.low %v22277_v5, %v22274_v6 }
 0x462   :  { %v9274_v3 = vcombine.low %v22283_v61, %v22280_v2  ;;  %v9298_v32 = vrot.slane %v9290_v7, %v21120_v21  ;;  %v9275_v7 = vcombine.high %v22283_v61, %v22280_v2 }
 0x464   :  { %v9282_v48 = vrot.slane %v9274_v3, %v21120_v21 }
 0x466   :  { %v9251_v31 = vpop.xlane.xlu0 %9250  ;;  %v9338_v59 = vcombine.low %v9282_v48, %v9298_v32  ;;  %v9339_v12 = vcombine.high %v9282_v48, %v9298_v32 }
 0x468   :  { %v9346_v47 = vrot.slane %v9338_v59, %v21125_v30  ;;  %v9353_v18 = vrot.slane %v9339_v12, %v21125_v30 }
 0x472   :  { %v9254_v35 = vpop.xlane.xlu1 %9253 }
 0x473   :  { %20750 = vrcp.f32 %v9254_v35  ;;  %v9413_v35 = vld [vmem:[#allocation7 + $0x18] sm:$0xff] }
 0x474   :  { %20752 = vrcp.f32 %v9248_v28  ;;  %v22363_v42 = vand.u32 4294901760, %v9413_v35 }
 0x475   :  { %20754 = vrcp.f32 %v9251_v31 }
 0x47e   :  { %v9257_v22 = vpop.xlane.xlu0 %9256 }
 0x47f   :  { %20756 = vrcp.f32 %v9257_v22 }
 0x480   :  { %v20751_v9 = vpop.eup %20750 }
 0x481   :  { %v20753_v19 = vpop.eup %20752  ;;  %v22285_v55 = vmul.f32 %v20751_v9, %v20739_v14 }
 0x482   :  { %v20755_v25 = vpop.eup %20754  ;;  %v22290_v44 = vmul.f32 %v20753_v19, %v22242_v39 }
 0x483   :  { %v22293_v11 = vmul.f32 %v20755_v25, %v22247_v15  ;;  %v9412_v15 = vld [vmem:[#allocation7 + $0x10] sm:$0xff]  ;;  %v22383_v25 = vsub.f32 %v9413_v35, %v22363_v42 }
 0x484   :  { %v9306_v23 = vcombine.low %v22290_v44, %v22285_v55  ;;  %v22326_v36 = vand.u32 4294901760, %v9412_v15  ;;  %v9307_v50 = vcombine.high %v22290_v44, %v22285_v55 }
 0x485   :  { %v10877_v48 = vand.u32 4294901760, %v22383_v25 }
 0x486   :  { %v9314_v57 = vrot.slane %v9306_v23, %v21120_v21  ;;  %v22338_v52 = vsub.f32 %v9412_v15, %v22326_v36  ;;  %v22401_v23 = vrot.slane %v9307_v50, %v21120_v21 }
 0x488   :  { %v10428_v8 = vand.u32 4294901760, %v22338_v52 }
 0x48a   :  { %v10429_v22 = vsub.f32 %v22338_v52, %v10428_v8 }
 0x48c   :  { %v20757_v0 = vpop.eup %20756  ;;  %v10430_v9 = vand.u32 4294901760, %v10429_v22 }
 0x48d   :  { %v22295_v26 = vmul.f32 %v20757_v0, %v20741_v46 }
 0x48f   :  { %v9322_v29 = vcombine.low %v22293_v11, %v22295_v26 }
 0x491   :  { %v9330_v34 = vrot.slane %v9322_v29, %v21120_v21 }
 0x493   :  { %v9370_v33 = vcombine.low %v9314_v57, %v9330_v34  ;;  %v9371_v41 = vcombine.high %v9314_v57, %v9330_v34  ;;  %v9414_v57 = vld [vmem:[#allocation7 + $0x20] sm:$0xff]  ;;  %v22411_v34 = vrot.slane %v9275_v7, %v21120_v21  ;;  %v9416_v7 = vld [vmem:[#allocation7 + $0x30] sm:$0xff] }
 0x495   :  { %v9378_v49 = vrot.slane %v9370_v33, %v21125_v30  ;;  %v22329_v46 = vrot.slane %v9371_v41, %v21125_v30 }
 0x497   :  { %v9402_v20 = vcombine.low %v9346_v47, %v9378_v49  ;;  %v9403_v10 = vcombine.high %v9346_v47, %v9378_v49  ;;  %v9404_v1 = vcombine.low %v9353_v18, %v22329_v46  ;;  %v9405_v0 = vcombine.high %v9353_v18, %v22329_v46 }
 0x498   :  { %v10878_v49 = vsub.f32 %v22383_v25, %v10877_v48 }
 0x499   :  { %v9419_v39 = vsel %vm1701_vm1, %v9402_v20, 0  ;;  %v9868_v40 = vsel %vm1701_vm1, %v9403_v10, 0  ;;  %v10317_v28 = vsel %vm1701_vm1, %v9404_v1, 0  ;;  %v10766_v51 = vsel %vm1701_vm1, %v9405_v0, 0 }
 0x49a   :  { %v9487_v45 = vand.u32 4294901760, %v9419_v39  ;;  %v22324_v14 = vand.u32 4294901760, %v9868_v40  ;;  %v22361_v43 = vand.u32 4294901760, %v10317_v28  ;;  %v22431_v20 = vand.u32 4294901760, %v10766_v51 }
 0x49c   :  { %v9488_v13 = vsub.f32 %v9419_v39, %v9487_v45  ;;  %19988 = vmatmul.mubr.f32.vlgmr.msra.gmra.mxu1 %v9487_v45  ;;  %v9937_v60 = vsub.f32 %v9868_v40, %v22324_v14  ;;  %v22380_v19 = vsub.f32 %v10317_v28, %v22361_v43  ;;  %v22451_v41 = vsub.f32 %v10766_v51, %v22431_v20 }
 0x49d   :  { %19996 = vmatpush3.msra.mxu1 %v22261_v24  ;;  %19997 = vmatprep.mubr.msk.f32.mxu1 %vm20886_vm2, %v20885_v4 }
 0x49e   :  { %v9489_v17 = vand.u32 4294901760, %v9488_v13  ;;  %20005 = vmatprep.subr.mxu1 %v20885_v4  ;;  %v10387_v29 = vand.u32 4294901760, %v22380_v19  ;;  %v10836_v12 = vand.u32 4294901760, %v22451_v41 }
 0x4a0   :  { %19998 = vmatmul.mubr.f32.vlgmr.msra.gmra.mxu1 %v9489_v17  ;;  %v9490_v27 = vsub.f32 %v9488_v13, %v9489_v17  ;;  %v10388_v47 = vsub.f32 %v22380_v19, %v10387_v29 }
 0x4a1   :  { %20006 = vmatpush3.msra.mxu1 %v22261_v24  ;;  %20007 = vmatprep.mubr.msk.f32.mxu1 %vm20886_vm2, %v20885_v4  ;;  %v9938_v24 = vand.u32 4294901760, %v9937_v60 }
 0x4a2   :  { %v9491_v37 = vand.u32 4294901760, %v9490_v27  ;;  %20015 = vmatprep.subr.mxu1 %v20885_v4  ;;  %v22477_v27 = vand.u32 4294901760, %v9415_v58 }
 0x4a3   :  { %v9939_v31 = vsub.f32 %v9937_v60, %v9938_v24 }
 0x4a4   :  { %19983 = vmatmul.mubr.f32.vlgmr.msra.gmra.mxu0 %v9491_v37  ;;  %20008 = vmatmul.mubr.f32.vlgmr.msra.gmra.mxu1 %v9487_v45  ;;  %v10837_v37 = vsub.f32 %v22451_v41, %v10836_v12 }
 0x4a5   :  { %19991 = vmatpush3.msra.mxu0 %v22264_v54  ;;  %19992 = vmatprep.mubr.msk.f32.mxu0 %vm20886_vm2, %v20885_v4  ;;  %v9323_v54 = vcombine.high %v22293_v11, %v22295_v26  ;;  %v9940_v53 = vand.u32 4294901760, %v9939_v31 }
 0x4a6   :  { %20016 = vmatpush3.msra.mxu1 %v9981_v38  ;;  %20017 = vmatprep.mubr.msk.f32.mxu1 %vm20886_vm2, %v20885_v4  ;;  %v10838_v35 = vand.u32 4294901760, %v10837_v37 }
 0x4a7   :  { %20000 = vmatprep.subr.mxu0 %v20885_v4  ;;  %20025 = vmatprep.subr.mxu1 %v20885_v4  ;;  %v22391_v3 = vrot.slane %v9323_v54, %v21120_v21 }
 0x4a8   :  { %19993 = vmatmul.mubr.f32.vlgmr.msra.gmra.mxu0 %v9488_v13  ;;  %20018 = vmatmul.mubr.f32.vlgmr.msra.gmra.mxu1 %v22324_v14 }
 0x4a9   :  { %20001 = vmatpush3.msra.mxu0 %v9530_v62  ;;  %20002 = vmatprep.mubr.msk.f32.mxu0 %vm20886_vm2, %v20885_v4  ;;  %v9291_v62 = vcombine.high %v22277_v5, %v22274_v6  ;;  %v9386_v59 = vcombine.low %v22401_v23, %v22391_v3 }
 0x4aa   :  { %20026 = vmatpush3.msra.mxu1 %v22307_v56  ;;  %20027 = vmatprep.mubr.msk.f32.mxu1 %vm20886_vm2, %v20885_v4 }
 0x4ab   :  { %20010 = vmatprep.subr.mxu0 %v20885_v4  ;;  %20035 = vmatprep.subr.mxu1 %v20885_v4  ;;  %v22398_v32 = vrot.slane %v9291_v62, %v21120_v21  ;;  %v22438_v10 = vrot.slane %v9386_v59, %v21125_v30 }
 0x4ac   :  { %20003 = vmatmul.mubr.f32.vlgmr.msra.gmra.mxu0 %v9487_v45  ;;  %20028 = vmatmul.mubr.f32.vlgmr.msra.gmra.mxu1 %v9938_v24  ;;  %v10389_v45 = vand.u32 4294901760, %v10388_v47 }
 0x4ad   :  { %20011 = vmatpush3.msra.mxu0 %v22307_v56  ;;  %20012 = vmatprep.mubr.msk.f32.mxu0 %vm20886_vm2, %v20885_v4  ;;  %v9354_v33 = vcombine.low %v22411_v34, %v22398_v32 }
 0x4ae   :  { %20036 = vmatpush3.msra.mxu1 %v22307_v56  ;;  %20037 = vmatprep.mubr.msk.f32.mxu1 %vm20886_vm2, %v20885_v4  ;;  %v22416_v56 = vpop.permute.xlu1 %1261 }
 0x4af   :  { %20020 = vmatprep.subr.mxu0 %v20885_v4  ;;  %20045 = vmatprep.subr.mxu1 %v20885_v4  ;;  %v22445_v39 = vrot.slane %v9354_v33, %v21125_v30  ;;  %v9355_v33 = vcombine.high %v22411_v34, %v22398_v32 }
 0x4b0   :  { %20013 = vmatmul.mubr.f32.vlgmr.msra.gmra.mxu0 %v9940_v53  ;;  %20038 = vmatmul.mubr.f32.vlgmr.msra.gmra.mxu1 %v22324_v14 }
 0x4b1   :  { %20021 = vmatpush3.msra.mxu0 %v22312_v63  ;;  %20022 = vmatprep.mubr.msk.f32.mxu0 %vm20886_vm2, %v20885_v4  ;;  %v22433_v63 = vand.u32 4294901760, %v9414_v57  ;;  %v9406_v13 = vcombine.low %v22445_v39, %v22438_v10  ;;  %v9407_v54 = vcombine.high %v22445_v39, %v22438_v10  ;;  %v22562_v39 = vrot.slane %v9355_v33, %v21125_v30 }
 0x4b2   :  { %20046 = vmatpush3.msra.mxu1 %v10430_v9  ;;  %20047 = vmatprep.mubr.msk.f32.mxu1 %vm20886_vm2, %v20885_v4  ;;  %v1270_v15 = vpop.permute.xlu1 %1269 }
 0x4b3   :  { %20030 = vmatprep.subr.mxu0 %v20885_v4  ;;  %20055 = vmatprep.subr.mxu1 %v20885_v4  ;;  %v22454_v40 = vsub.f32 %v9414_v57, %v22433_v63  ;;  %v1285_v1 = vcombine.low %v22416_v56, %v1270_v15  ;;  %v1286_v24 = vcombine.high %v22416_v56, %v1270_v15  ;;  %v11664_v51 = vsel %vm1701_vm1, %v9407_v54, 0 }
 0x4b4   :  { %20023 = vmatmul.mubr.f32.vlgmr.msra.gmra.mxu0 %v9937_v60  ;;  %20048 = vmatmul.mubr.f32.vlgmr.msra.gmra.mxu1 %v22361_v43  ;;  %v9387_v57 = vcombine.high %v22401_v23, %v22391_v3  ;;  %v22535_v56 = vand.u32 4294901760, %v9416_v7 }
 0x4b5   :  { %20031 = vmatpush3.msra.mxu0 %v9979_v16  ;;  %20032 = vmatprep.mubr.msk.f32.mxu0 %vm20886_vm2, %v20885_v4  ;;  %v10879_v16 = vand.u32 4294901760, %v10878_v49  ;;  %v11326_v17 = vand.u32 4294901760, %v22454_v40  ;;  %v1293_v62 = vrot.slane %v1285_v1, %v21120_v21 }
 0x4b6   :  { %20056 = vmatpush3.msra.mxu1 %v22326_v36  ;;  %20057 = vmatprep.mubr.msk.f32.mxu1 %vm20886_vm2, %v20885_v4  ;;  %v1274_v46 = vpop.permute.xlu1 %1273  ;;  %v22552_v32 = vrot.slane %v9387_v57, %v21125_v30  ;;  %v22559_v10 = vsub.f32 %v9416_v7, %v22535_v56 }
 0x4b7   :  { %20040 = vmatprep.subr.mxu0 %v20885_v4  ;;  %20065 = vmatprep.subr.mxu1 %v20885_v4  ;;  %v11327_v38 = vsub.f32 %v22454_v40, %v11326_v17 }
 0x4b8   :  { %20033 = vmatmul.mubr.f32.vlgmr.msra.gmra.mxu0 %v22324_v14  ;;  %20058 = vmatmul.mubr.f32.vlgmr.msra.gmra.mxu1 %v10387_v29  ;;  %v1266_v14 = vpop.permute.xlu0 %1265 }
 0x4b9   :  { %20041 = vmatpush3.msra.mxu0 %v22326_v36  ;;  %20042 = vmatprep.mubr.msk.f32.mxu0 %vm20886_vm2, %v20885_v4  ;;  %v1301_v18 = vcombine.low %v1266_v14, %v1274_v46  ;;  %v11328_v31 = vand.u32 4294901760, %v11327_v38  ;;  %v9417_v38 = vld [vmem:[#allocation7 + $0x38] sm:$0xff] }
 0x4ba   :  { %20066 = vmatpush3.msra.mxu1 %v22326_v36  ;;  %20067 = vmatprep.mubr.msk.f32.mxu1 %vm20886_vm2, %v20885_v4  ;;  %v11215_v36 = vsel %vm1701_vm1, %v9406_v13, 0 }
 0x4bb   :  { %20050 = vmatprep.subr.mxu0 %v20885_v4  ;;  %20075 = vmatprep.subr.mxu1 %v20885_v4  ;;  %v22486_v60 = vand.u32 4294901760, %v11215_v36  ;;  %v1309_v28 = vrot.slane %v1301_v18, %v21120_v21 }
 0x4bc   :  { %20043 = vmatmul.mubr.f32.vlgmr.msra.gmra.mxu0 %v10389_v45  ;;  %20068 = vmatmul.mubr.f32.vlgmr.msra.gmra.mxu1 %v22361_v43 }
 0x4bd   :  { %20051 = vmatpush3.msra.mxu0 %v22338_v52  ;;  %20052 = vmatprep.mubr.msk.f32.mxu0 %vm20886_vm2, %v20885_v4  ;;  %v1302_v52 = vcombine.high %v1266_v14, %v1274_v46  ;;  %v22504_v22 = vsub.f32 %v11215_v36, %v22486_v60  ;;  %v1317_v53 = vcombine.low %v1293_v62, %v1309_v28  ;;  %v12224_v14 = vand.u32 4294901760, %v22559_v10 }
 0x4be   :  { %20076 = vmatpush3.msra.mxu1 %v10879_v16  ;;  %20077 = vmatprep.mubr.msk.f32.mxu1 %vm20886_vm2, %v20885_v4  ;;  %v1318_v9 = vcombine.high %v1293_v62, %v1309_v28  ;;  %v22612_v28 = vand.u32 4294901760, %v9417_v38 }
 0x4bf   :  { %20060 = vmatprep.subr.mxu0 %v20885_v4  ;;  %20085 = vmatprep.subr.mxu1 %v20885_v4  ;;  %v1325_v3 = vrot.slane %v1317_v53, %v21125_v30  ;;  %v12225_v1 = vsub.f32 %v22559_v10, %v12224_v14 }
 0x4c0   :  { %20053 = vmatmul.mubr.f32.vlgmr.msra.gmra.mxu0 %v22380_v19  ;;  %20078 = vmatmul.mubr.f32.vlgmr.msra.gmra.mxu1 %v22431_v20  ;;  %v11285_v19 = vand.u32 4294901760, %v22504_v22  ;;  %v1332_v23 = vrot.slane %v1318_v9, %v21125_v30 }
 0x4c1   :  { %20061 = vmatpush3.msra.mxu0 %v10428_v8  ;;  %20062 = vmatprep.mubr.msk.f32.mxu0 %vm20886_vm2, %v20885_v4  ;;  %v22497_v8 = vsub.f32 %v9415_v58, %v22477_v27 }
 0x4c2   :  { %20086 = vmatpush3.msra.mxu1 %v22363_v42  ;;  %20087 = vmatprep.mubr.msk.f32.mxu1 %vm20886_vm2, %v20885_v4  ;;  %v1421_v45 = vcombine.low %v1325_v3, %v1332_v23  ;;  %v18859_v16 = vcombine.high %v1325_v3, %v1332_v23 }
 0x4c3   :  { %20070 = vmatprep.subr.mxu0 %v20885_v4  ;;  %20095 = vmatprep.subr.mxu1 %v20885_v4  ;;  %v11775_v50 = vand.u32 4294901760, %v22497_v8 }
 0x4c4   :  { %20063 = vmatmul.mubr.f32.vlgmr.msra.gmra.mxu0 %v22361_v43  ;;  %20088 = vmatmul.mubr.f32.vlgmr.msra.gmra.mxu1 %v10836_v12  ;;  %v1316_v43 = vrot.slane %v1302_v52, %v21120_v21  ;;  %v9408_v12 = vcombine.low %v22562_v39, %v22552_v32  ;;  %v22586_v36 = vrot.slane %v18859_v16, %v21120_v21 }
 0x4c5   :  { %20071 = vmatpush3.msra.mxu0 %v22363_v42  ;;  %20072 = vmatprep.mubr.msk.f32.mxu0 %vm20886_vm2, %v20885_v4  ;;  %v11776_v59 = vsub.f32 %v22497_v8, %v11775_v50 }
 0x4c6   :  { %20096 = vmatpush3.msra.mxu1 %v22363_v42  ;;  %20097 = vmatprep.mubr.msk.f32.mxu1 %vm20886_vm2, %v20885_v4  ;;  %v1300_v42 = vrot.slane %v1286_v24, %v21120_v21  ;;  %v12113_v37 = vsel %vm1701_vm1, %v9408_v12, 0 }
 0x4c7   :  { %20080 = vmatprep.subr.mxu0 %v20885_v4  ;;  %20105 = vmatprep.subr.mxu1 %v20885_v4  ;;  %v11777_v34 = vand.u32 4294901760, %v11776_v59  ;;  %v22610_v24 = vand.u32 4294901760, %v12113_v37  ;;  %v1268_v59 = vpop.permute.xlu1 %1267 }
 0x4c8   :  { %20073 = vmatmul.mubr.f32.vlgmr.msra.gmra.mxu0 %v10838_v35  ;;  %20098 = vmatmul.mubr.f32.vlgmr.msra.gmra.mxu1 %v22431_v20  ;;  %v1333_v0 = vcombine.low %v1300_v42, %v1316_v43  ;;  %v1334_v29 = vcombine.high %v1300_v42, %v1316_v43  ;;  %v22629_v43 = vsub.f32 %v9417_v38, %v22612_v28 }
 0x4c9   :  { %20081 = vmatpush3.msra.mxu0 %v22383_v25  ;;  %20082 = vmatprep.mubr.msk.f32.mxu0 %vm20886_vm2, %v20885_v4  ;;  %v11286_v25 = vsub.f32 %v22504_v22, %v11285_v19 }
 0x4ca   :  { %20106 = vmatpush3.msra.mxu1 %v11328_v31  ;;  %20107 = vmatprep.mubr.msk.f32.mxu1 %vm20886_vm2, %v20885_v4  ;;  %v1341_v47 = vrot.slane %v1333_v0, %v21125_v30  ;;  %v1348_v49 = vrot.slane %v1334_v29, %v21125_v30  ;;  %v12226_v31 = vand.u32 4294901760, %v12225_v1  ;;  %v12673_v42 = vand.u32 4294901760, %v22629_v43 }
 0x4cb   :  { %20090 = vmatprep.subr.mxu0 %v20885_v4  ;;  %20115 = vmatprep.subr.mxu1 %v20885_v4 }
 0x4cc   :  { %20083 = vmatmul.mubr.f32.vlgmr.msra.gmra.mxu0 %v22451_v41  ;;  %20108 = vmatmul.mubr.f32.vlgmr.msra.gmra.mxu1 %v22486_v60  ;;  %v1437_v15 = vcombine.low %v1341_v47, %v1348_v49  ;;  %v18860_v13 = vcombine.high %v1341_v47, %v1348_v49  ;;  %v12674_v7 = vsub.f32 %v22629_v43, %v12673_v42  ;;  %v1276_v47 = vpop.permute.xlu1 %1275 }
 0x4cd   :  { %20091 = vmatpush3.msra.mxu0 %v10877_v48  ;;  %20092 = vmatprep.mubr.msk.f32.mxu0 %vm20886_vm2, %v20885_v4  ;;  %v22545_v48 = vand.u32 4294901760, %v11664_v51 }
 0x4ce   :  { %20116 = vmatpush3.msra.mxu1 %v22433_v63  ;;  %20117 = vmatprep.mubr.msk.f32.mxu1 %vm20886_vm2, %v20885_v4  ;;  %v22589_v46 = vrot.slane %v1437_v15, %v21120_v21  ;;  %v22592_v18 = vrot.slane %v18860_v13, %v21120_v21 }
 0x4cf   :  { %20100 = vmatprep.subr.mxu0 %v20885_v4  ;;  %20125 = vmatprep.subr.mxu1 %v20885_v4  ;;  %v22568_v41 = vsub.f32 %v11664_v51, %v22545_v48  ;;  %v12675_v51 = vand.u32 4294901760, %v12674_v7 }
 0x4d0   :  { %20093 = vmatmul.mubr.f32.vlgmr.msra.gmra.mxu0 %v22431_v20  ;;  %20118 = vmatmul.mubr.f32.vlgmr.msra.gmra.mxu1 %v11285_v19  ;;  %v11287_v20 = vand.u32 4294901760, %v11286_v25  ;;  %v13147_v25 = vsel %vm1701_vm1, %v22283_v61, 0 }
 0x4d1   :  { %20101 = vmatpush3.msra.mxu0 %v22433_v63  ;;  %20102 = vmatprep.mubr.msk.f32.mxu0 %vm20886_vm2, %v20885_v4  ;;  %v11734_v58 = vand.u32 4294901760, %v22568_v41 }
 0x4d2   :  { %20126 = vmatpush3.msra.mxu1 %v22433_v63  ;;  %20127 = vmatprep.mubr.msk.f32.mxu1 %vm20886_vm2, %v20885_v4  ;;  %v22579_v63 = vrot.slane %v1421_v45, %v21120_v21 }
 0x4d3   :  { %20110 = vmatprep.subr.mxu0 %v20885_v4  ;;  %20135 = vmatprep.subr.mxu1 %v20885_v4  ;;  %v11735_v52 = vsub.f32 %v22568_v41, %v11734_v58 }
 0x4d4   :  { %20103 = vmatmul.mubr.f32.vlgmr.msra.gmra.mxu0 %v11287_v20  ;;  %20128 = vmatmul.mubr.f32.vlgmr.msra.gmra.mxu1 %v22486_v60  ;;  %v1369_v20 = vcombine.low %v1268_v59, %v1276_v47 }
 0x4d5   :  { %20111 = vmatpush3.msra.mxu0 %v22454_v40  ;;  %20112 = vmatprep.mubr.msk.f32.mxu0 %vm20886_vm2, %v20885_v4  ;;  %v1453_v40 = vcombine.low %v22579_v63, %v22586_v36  ;;  %v11736_v35 = vand.u32 4294901760, %v11735_v52 }
 0x4d6   :  { %20136 = vmatpush3.msra.mxu1 %v11777_v34  ;;  %20137 = vmatprep.mubr.msk.f32.mxu1 %vm20886_vm2, %v20885_v4  ;;  %v22701_v34 = vand.u32 4294901760, %v13147_v25 }
 0x4d7   :  { %20120 = vmatprep.subr.mxu0 %v20885_v4  ;;  %20145 = vmatprep.subr.mxu1 %v20885_v4 }
 0x4d8   :  { %20113 = vmatmul.mubr.f32.vlgmr.msra.gmra.mxu0 %v22504_v22  ;;  %20138 = vmatmul.mubr.f32.vlgmr.msra.gmra.mxu1 %v22545_v48  ;;  %v12182_v22 = vsub.f32 %v12113_v37, %v22610_v24 }
 0x4d9   :  { %20121 = vmatpush3.msra.mxu0 %v11326_v17  ;;  %20122 = vmatprep.mubr.msk.f32.mxu0 %vm20886_vm2, %v20885_v4  ;;  %v1469_v17 = vcombine.low %v22589_v46, %v22592_v18 }
 0x4da   :  { %20146 = vmatpush3.msra.mxu1 %v22477_v27  ;;  %20147 = vmatprep.mubr.msk.f32.mxu1 %vm20886_vm2, %v20885_v4  ;;  %v12183_v62 = vand.u32 4294901760, %v12182_v22 }
 0x4db   :  { %20130 = vmatprep.subr.mxu0 %v20885_v4  ;;  %20155 = vmatprep.subr.mxu1 %v20885_v4  ;;  %v1477_v54 = vrot.slane %v1469_v17, %v21125_v30 }
 0x4dc   :  { %20123 = vmatmul.mubr.f32.vlgmr.msra.gmra.mxu0 %v22486_v60  ;;  %20148 = vmatmul.mubr.f32.vlgmr.msra.gmra.mxu1 %v11734_v58  ;;  %v1461_v60 = vrot.slane %v1453_v40, %v21125_v30  ;;  %v12184_v19 = vsub.f32 %v12182_v22, %v12183_v62 }
 0x4dd   :  { %20131 = vmatpush3.msra.mxu0 %v22477_v27  ;;  %20132 = vmatprep.mubr.msk.f32.mxu0 %vm20886_vm2, %v20885_v4 }
 0x4de   :  { %20156 = vmatpush3.msra.mxu1 %v22477_v27  ;;  %20157 = vmatprep.mubr.msk.f32.mxu1 %vm20886_vm2, %v20885_v4  ;;  %v9409_v27 = vcombine.high %v22562_v39, %v22552_v32  ;;  %v1485_v9 = vcombine.low %v1461_v60, %v1477_v54  ;;  %v12185_v29 = vand.u32 4294901760, %v12184_v19  ;;  %v1454_v39 = vcombine.high %v22579_v63, %v22586_v36 }
 0x4df   :  { %20140 = vmatprep.subr.mxu0 %v20885_v4  ;;  %20165 = vmatprep.subr.mxu1 %v20885_v4  ;;  %v22724_v63 = vsub.f32 %v13147_v25, %v22701_v34 }
 0x4e0   :  { %20133 = vmatmul.mubr.f32.vlgmr.msra.gmra.mxu0 %v11736_v35  ;;  %20158 = vmatmul.mubr.f32.vlgmr.msra.gmra.mxu1 %v22545_v48  ;;  %v12562_v53 = vsel %vm1701_vm1, %v9409_v27, 0  ;;  %v22727_v58 = vrot.slane %v1454_v39, %v21125_v30 }
 0x4e1   :  { %20141 = vmatpush3.msra.mxu0 %v22497_v8  ;;  %20142 = vmatprep.mubr.msk.f32.mxu0 %vm20886_vm2, %v20885_v4  ;;  %v22659_v0 = vand.u32 4294901760, %v12562_v53  ;;  %v22663_v8 = vand.u32 4294901760, %v1485_v9  ;;  %v13217_v1 = vand.u32 4294901760, %v22724_v63 }
 0x4e2   :  { %20166 = vmatpush3.msra.mxu1 %v12226_v31  ;;  %20167 = vmatprep.mubr.msk.f32.mxu1 %vm20886_vm2, %v20885_v4 }
 0x4e3   :  { %20150 = vmatprep.subr.mxu0 %v20885_v4  ;;  %20175 = vmatprep.subr.mxu1 %v20885_v4  ;;  %v22673_v57 = vsub.f32 %v12562_v53, %v22659_v0  ;;  %v22678_v33 = vsub.f32 %v1485_v9, %v22663_v8 }
 0x4e4   :  { %20143 = vmatmul.mubr.f32.vlgmr.msra.gmra.mxu0 %v22568_v41  ;;  %20168 = vmatmul.mubr.f32.vlgmr.msra.gmra.mxu1 %v22610_v24  ;;  %v1370_v41 = vcombine.high %v1268_v59, %v1276_v47  ;;  %v14045_v59 = vsel %vm1701_vm1, %v22280_v2, 0 }
 0x4e5   :  { %20151 = vmatpush3.msra.mxu0 %v11775_v50  ;;  %20152 = vmatprep.mubr.msk.f32.mxu0 %vm20886_vm2, %v20885_v4  ;;  %v1264_v50 = vpop.permute.xlu0 %1263  ;;  %v13258_v23 = vand.u32 4294901760, %v22678_v33  ;;  %v22826_v47 = vand.u32 4294901760, %v14045_v59 }
 0x4e6   :  { %20176 = vmatpush3.msra.mxu1 %v22535_v56  ;;  %20177 = vmatprep.mubr.msk.f32.mxu1 %vm20886_vm2, %v20885_v4  ;;  %v1384_v37 = vrot.slane %v1370_v41, %v21120_v21 }
 0x4e7   :  { %20160 = vmatprep.subr.mxu0 %v20885_v4  ;;  %20185 = vmatprep.subr.mxu1 %v20885_v4  ;;  %v13259_v45 = vsub.f32 %v22678_v33, %v13258_v23  ;;  %v14114_v39 = vsub.f32 %v14045_v59, %v22826_v47  ;;  %v15841_v59 = vsel %vm1701_vm1, %v22285_v55, 0 }
 0x4e8   :  { %20153 = vmatmul.mubr.f32.vlgmr.msra.gmra.mxu0 %v22545_v48  ;;  %20178 = vmatmul.mubr.f32.vlgmr.msra.gmra.mxu1 %v12183_v62  ;;  %v1486_v48 = vcombine.high %v1461_v60, %v1477_v54 }
 0x4e9   :  { %20161 = vmatpush3.msra.mxu0 %v22535_v56  ;;  %20162 = vmatprep.mubr.msk.f32.mxu0 %vm20886_vm2, %v20885_v4  ;;  %v1272_v3 = vpop.permute.xlu0 %1271  ;;  %v13260_v36 = vand.u32 4294901760, %v13259_v45 }
 0x4ea   :  { %20186 = vmatpush3.msra.mxu1 %v22535_v56  ;;  %20187 = vmatprep.mubr.msk.f32.mxu1 %vm20886_vm2, %v20885_v4  ;;  %v12632_v56 = vand.u32 4294901760, %v22673_v57  ;;  %v1353_v49 = vcombine.low %v1264_v50, %v1272_v3  ;;  %v1354_v32 = vcombine.high %v1264_v50, %v1272_v3  ;;  %v22712_v16 = vand.u32 4294901760, %v1486_v48 }
 0x4eb   :  { %20170 = vmatprep.subr.mxu0 %v20885_v4  ;;  %20195 = vmatprep.subr.mxu1 %v20885_v4 }
 0x4ec   :  { %20163 = vmatmul.mubr.f32.vlgmr.msra.gmra.mxu0 %v12185_v29  ;;  %20188 = vmatmul.mubr.f32.vlgmr.msra.gmra.mxu1 %v22610_v24  ;;  %v12633_v61 = vsub.f32 %v22673_v57, %v12632_v56  ;;  %v1361_v15 = vrot.slane %v1353_v49, %v21120_v21  ;;  %v1368_v13 = vrot.slane %v1354_v32, %v21120_v21 }
 0x4ed   :  { %20171 = vmatpush3.msra.mxu0 %v22559_v10  ;;  %20172 = vmatprep.mubr.msk.f32.mxu0 %vm20886_vm2, %v20885_v4  ;;  %v1470_v10 = vcombine.high %v22589_v46, %v22592_v18  ;;  %v22735_v46 = vsub.f32 %v1486_v48, %v22712_v16  ;;  %v1377_v18 = vrot.slane %v1369_v20, %v21120_v21  ;;  %v14115_v20 = vand.u32 4294901760, %v14114_v39 }
 0x4ee   :  { %20196 = vmatpush3.msra.mxu1 %v12675_v51  ;;  %20197 = vmatprep.mubr.msk.f32.mxu1 %vm20886_vm2, %v20885_v4  ;;  %v12634_v12 = vand.u32 4294901760, %v12633_v61  ;;  %v1402_v40 = vcombine.high %v1368_v13, %v1384_v37 }
 0x4ef   :  { %20180 = vmatprep.subr.mxu0 %v20885_v4  ;;  %20205 = vmatprep.subr.mxu1 %v20885_v4  ;;  %v1385_v38 = vcombine.low %v1361_v15, %v1377_v18  ;;  %v1386_v52 = vcombine.high %v1361_v15, %v1377_v18  ;;  %v13707_v17 = vand.u32 4294901760, %v22735_v46  ;;  %v14494_v15 = vsel %vm1701_vm1, %v22274_v6, 0 }
 0x4f0   :  { %20173 = vmatmul.mubr.f32.vlgmr.msra.gmra.mxu0 %v12182_v22  ;;  %20198 = vmatmul.mubr.f32.vlgmr.msra.gmra.mxu1 %v22659_v0  ;;  %v13218_v22 = vsub.f32 %v22724_v63, %v13217_v1  ;;  %v1416_v27 = vrot.slane %v1402_v40, %v21125_v30 }
 0x4f1   :  { %20181 = vmatpush3.msra.mxu0 %v12224_v14  ;;  %20182 = vmatprep.mubr.msk.f32.mxu0 %vm20886_vm2, %v20885_v4  ;;  %v22730_v14 = vrot.slane %v1470_v10, %v21125_v30  ;;  %v1400_v31 = vrot.slane %v1386_v52, %v21125_v30  ;;  %v14943_v52 = vsel %vm1701_vm1, %v22290_v44, 0 }
 0x4f2   :  { %20206 = vmatpush3.msra.mxu1 %v22612_v28  ;;  %20207 = vmatprep.mubr.msk.f32.mxu1 %vm20886_vm2, %v20885_v4  ;;  %v13219_v9 = vand.u32 4294901760, %v13218_v22 }
 0x4f3   :  { %20190 = vmatprep.subr.mxu0 %v20885_v4  ;;  %20215 = vmatprep.subr.mxu1 %v20885_v4  ;;  %v1487_v35 = vcombine.low %v22727_v58, %v22730_v14  ;;  %v1488_v48 = vcombine.high %v22727_v58, %v22730_v14 }
 0x4f4   :  { %20183 = vmatmul.mubr.f32.vlgmr.msra.gmra.mxu0 %v22610_v24  ;;  %20208 = vmatmul.mubr.f32.vlgmr.msra.gmra.mxu1 %v12632_v56  ;;  %v13596_v24 = vsel %vm1701_vm1, %v22277_v5, 0  ;;  %v1393_v5 = vrot.slane %v1385_v38, %v21125_v30 }
 0x4f5   :  { %20191 = vmatpush3.msra.mxu0 %v22612_v28  ;;  %20216 = vmatpush3.msra.mxu1 %v22612_v28  ;;  %v1401_v28 = vcombine.low %v1368_v13, %v1384_v37  ;;  %v22764_v60 = vand.u32 4294901760, %v13596_v24  ;;  %v22774_v62 = vand.u32 4294901760, %v1487_v35 }
 0x4f6   :  { %20192 = vmatprep.mubr.msk.f32.mxu0 %vm20886_vm2, %v20885_v4  ;;  %20217 = vmatprep.mubr.msk.f32.mxu1 %vm20886_vm2, %v20885_v4  ;;  %v18861_v53 = vcombine.high %v1393_v5, %v1400_v31 }
 0x4f7   :  { %20225 = vmatprep.subr.mxu1 %v20885_v4  ;;  %20200 = vmatprep.subr.mxu0 %v20885_v4  ;;  %v1409_v54 = vrot.slane %v1401_v28, %v21125_v30  ;;  %v22783_v19 = vsub.f32 %v13596_v24, %v22764_v60  ;;  %v22915_v28 = vand.u32 4294901760, %v14943_v52 }
 0x4f8   :  { %20193 = vmatmul.mubr.f32.vlgmr.msra.gmra.mxu0 %v12634_v12  ;;  %20218 = vmatmul.mubr.f32.vlgmr.msra.gmra.mxu1 %v22659_v0  ;;  %v22797_v51 = vrot.slane %v18861_v53, %v21120_v21  ;;  %v14116_v12 = vsub.f32 %v14114_v39, %v14115_v20 }
 0x4f9   :  { %20226 = vmatpush3.msra.mxu1 %v13260_v36  ;;  %20201 = vmatpush3.msra.mxu0 %v22629_v43  ;;  %v13708_v43 = vsub.f32 %v22735_v46, %v13707_v17  ;;  %v1505_v7 = vcombine.low %v1409_v54, %v1416_v27  ;;  %v18862_v50 = vcombine.high %v1409_v54, %v1416_v27 }
 0x4fa   :  { %20202 = vmatprep.mubr.msk.f32.mxu0 %vm20886_vm2, %v20885_v4  ;;  %20227 = vmatprep.mubr.msk.f32.mxu1 %vm20886_vm2, %v20885_v4  ;;  %v14117_v14 = vand.u32 4294901760, %v14116_v12 }
 0x4fb   :  { %20235 = vmatprep.subr.mxu1 %v20885_v4  ;;  %20210 = vmatprep.subr.mxu0 %v20885_v4  ;;  %v22806_v56 = vrot.slane %v1505_v7, %v21120_v21  ;;  %v22809_v3 = vrot.slane %v18862_v50, %v21120_v21 }
 0x4fc   :  { %20203 = vmatmul.mubr.f32.vlgmr.msra.gmra.mxu0 %v22673_v57  ;;  %20228 = vmatmul.mubr.f32.vlgmr.msra.gmra.mxu1 %v22701_v34  ;;  %v13666_v57 = vand.u32 4294901760, %v22783_v19 }
 0x4fd   :  { %20236 = vmatpush3.msra.mxu1 %v22663_v8  ;;  %20211 = vmatpush3.msra.mxu0 %v12673_v42  ;;  %v1489_v42 = vcombine.low %v1393_v5, %v1400_v31  ;;  %v1537_v32 = vcombine.low %v22806_v56, %v22809_v3  ;;  %v1538_v40 = vcombine.high %v22806_v56, %v22809_v3 }
 0x4fe   :  { %20212 = vmatprep.mubr.msk.f32.mxu0 %vm20886_vm2, %v20885_v4  ;;  %20220 = vmatprep.subr.mxu0 %v20885_v4  ;;  %v13667_v2 = vsub.f32 %v22783_v19, %v13666_v57  ;;  %v15012_v31 = vsub.f32 %v14943_v52, %v22915_v28 }
 0x4ff   :  { %20237 = vmatprep.mubr.msk.f32.mxu1 %vm20886_vm2, %v20885_v4  ;;  %20245 = vmatprep.subr.mxu1 %v20885_v4  ;;  %v22794_v29 = vrot.slane %v1489_v42, %v21120_v21  ;;  %v1545_v45 = vrot.slane %v1537_v32, %v21125_v30  ;;  %v15392_v42 = vsel %vm1701_vm1, %v22293_v11, 0 }
 0x500   :  { %20213 = vmatmul.mubr.f32.vlgmr.msra.gmra.mxu0 %v22659_v0  ;;  %20238 = vmatmul.mubr.f32.vlgmr.msra.gmra.mxu1 %v13217_v1  ;;  %v13709_v0 = vand.u32 4294901760, %v13708_v43  ;;  %v13668_v61 = vand.u32 4294901760, %v13667_v2  ;;  %v15013_v43 = vand.u32 4294901760, %v15012_v31 }
 0x501   :  { %20221 = vmatpush3.msra.mxu0 %v22663_v8  ;;  %20246 = vmatpush3.msra.mxu1 %v22663_v8  ;;  %v22789_v8 = vsub.f32 %v1487_v35, %v22774_v62  ;;  %v1521_v49 = vcombine.low %v22794_v29, %v22797_v51  ;;  %v1522_v44 = vcombine.high %v22794_v29, %v22797_v51 }
 0x502   :  { %20222 = vmatprep.mubr.msk.f32.mxu0 %vm20886_vm2, %v20885_v4  ;;  %20230 = vmatprep.subr.mxu0 %v20885_v4 }
 0x503   :  { %20247 = vmatprep.mubr.msk.f32.mxu1 %vm20886_vm2, %v20885_v4  ;;  %20255 = vmatprep.subr.mxu1 %v20885_v4  ;;  %v14156_v25 = vand.u32 4294901760, %v22789_v8  ;;  %v1529_v10 = vrot.slane %v1521_v49, %v21125_v30  ;;  %v1536_v22 = vrot.slane %v1522_v44, %v21125_v30 }
 0x504   :  { %20223 = vmatmul.mubr.f32.vlgmr.msra.gmra.mxu0 %v13219_v9  ;;  %20248 = vmatmul.mubr.f32.vlgmr.msra.gmra.mxu1 %v22701_v34  ;;  %v15014_v9 = vsub.f32 %v15012_v31, %v15013_v43 }
 0x505   :  { %20231 = vmatpush3.msra.mxu0 %v22678_v33  ;;  %20256 = vmatpush3.msra.mxu1 %v13709_v0  ;;  %v14157_v33 = vsub.f32 %v22789_v8, %v14156_v25  ;;  %v1553_v13 = vcombine.low %v1529_v10, %v1545_v45  ;;  %v1554_v1 = vcombine.high %v1529_v10, %v1545_v45 }
 0x506   :  { %20232 = vmatprep.mubr.msk.f32.mxu0 %vm20886_vm2, %v20885_v4  ;;  %20240 = vmatprep.subr.mxu0 %v20885_v4  ;;  %v15015_v50 = vand.u32 4294901760, %v15014_v9 }
 0x507   :  { %20257 = vmatprep.mubr.msk.f32.mxu1 %vm20886_vm2, %v20885_v4  ;;  %20265 = vmatprep.subr.mxu1 %v20885_v4  ;;  %v22882_v58 = vand.u32 4294901760, %v1553_v13  ;;  %v22927_v35 = vand.u32 4294901760, %v1554_v1 }
 0x508   :  { %20233 = vmatmul.mubr.f32.vlgmr.msra.gmra.mxu0 %v22724_v63  ;;  %20258 = vmatmul.mubr.f32.vlgmr.msra.gmra.mxu1 %v22764_v60  ;;  %v22874_v63 = vand.u32 4294901760, %v14494_v15 }
 0x509   :  { %20241 = vmatpush3.msra.mxu0 %v13258_v23  ;;  %20266 = vmatpush3.msra.mxu1 %v22712_v16  ;;  %v22838_v23 = vand.u32 4294901760, %v1488_v48  ;;  %v22895_v18 = vsub.f32 %v1553_v13, %v22882_v58  ;;  %v22942_v27 = vsub.f32 %v1554_v1, %v22927_v35 }
 0x50a   :  { %20242 = vmatprep.mubr.msk.f32.mxu0 %vm20886_vm2, %v20885_v4  ;;  %20250 = vmatprep.subr.mxu0 %v20885_v4  ;;  %v14563_v36 = vsub.f32 %v14494_v15, %v22874_v63 }
 0x50b   :  { %20267 = vmatprep.mubr.msk.f32.mxu1 %vm20886_vm2, %v20885_v4  ;;  %20275 = vmatprep.subr.mxu1 %v20885_v4  ;;  %v15054_v38 = vand.u32 4294901760, %v22895_v18 }
 0x50c   :  { %20243 = vmatmul.mubr.f32.vlgmr.msra.gmra.mxu0 %v22701_v34  ;;  %20268 = vmatmul.mubr.f32.vlgmr.msra.gmra.mxu1 %v13666_v57  ;;  %v14158_v34 = vand.u32 4294901760, %v14157_v33  ;;  %v14564_v37 = vand.u32 4294901760, %v14563_v36 }
 0x50d   :  { %20251 = vmatpush3.msra.mxu0 %v22712_v16  ;;  %20276 = vmatpush3.msra.mxu1 %v22712_v16  ;;  %v22853_v16 = vsub.f32 %v1488_v48, %v22838_v23 }
 0x50e   :  { %20252 = vmatprep.mubr.msk.f32.mxu0 %vm20886_vm2, %v20885_v4  ;;  %20260 = vmatprep.subr.mxu0 %v20885_v4  ;;  %v14565_v24 = vsub.f32 %v14563_v36, %v14564_v37 }
 0x50f   :  { %20277 = vmatprep.mubr.msk.f32.mxu1 %vm20886_vm2, %v20885_v4  ;;  %20285 = vmatprep.subr.mxu1 %v20885_v4  ;;  %v14605_v41 = vand.u32 4294901760, %v22853_v16 }
 0x510   :  { %20253 = vmatmul.mubr.f32.vlgmr.msra.gmra.mxu0 %v13668_v61  ;;  %20278 = vmatmul.mubr.f32.vlgmr.msra.gmra.mxu1 %v22764_v60  ;;  %v14566_v5 = vand.u32 4294901760, %v14565_v24  ;;  %v16290_v61 = vsel %vm1701_vm1, %v22295_v26, 0 }
 0x511   :  { %20261 = vmatpush3.msra.mxu0 %v22735_v46  ;;  %20286 = vmatpush3.msra.mxu1 %v14158_v34  ;;  %v14606_v6 = vsub.f32 %v22853_v16, %v14605_v41  ;;  %v16358_v10 = vand.u32 4294901760, %v16290_v61 }
 0x512   :  { %20262 = vmatprep.mubr.msk.f32.mxu0 %vm20886_vm2, %v20885_v4  ;;  %20270 = vmatprep.subr.mxu0 %v20885_v4 }
 0x513   :  { %20287 = vmatprep.mubr.msk.f32.mxu1 %vm20886_vm2, %v20885_v4  ;;  %20295 = vmatprep.subr.mxu1 %v20885_v4  ;;  %v14607_v46 = vand.u32 4294901760, %v14606_v6  ;;  %v16359_v34 = vsub.f32 %v16290_v61, %v16358_v10 }
 0x514   :  { %20263 = vmatmul.mubr.f32.vlgmr.msra.gmra.mxu0 %v22783_v19  ;;  %20288 = vmatmul.mubr.f32.vlgmr.msra.gmra.mxu1 %v22826_v47  ;;  %v22962_v19 = vand.u32 4294901760, %v15392_v42 }
 0x515   :  { %20271 = vmatpush3.msra.mxu0 %v13707_v17  ;;  %20296 = vmatpush3.msra.mxu1 %v22774_v62  ;;  %v15055_v17 = vsub.f32 %v22895_v18, %v15054_v38 }
 0x516   :  { %20272 = vmatprep.mubr.msk.f32.mxu0 %vm20886_vm2, %v20885_v4  ;;  %20280 = vmatprep.subr.mxu0 %v20885_v4  ;;  %v15461_v0 = vsub.f32 %v15392_v42, %v22962_v19 }
 0x517   :  { %20297 = vmatprep.mubr.msk.f32.mxu1 %vm20886_vm2, %v20885_v4  ;;  %20305 = vmatprep.subr.mxu1 %v20885_v4  ;;  %v15056_v54 = vand.u32 4294901760, %v15055_v17 }
 0x518   :  { %20273 = vmatmul.mubr.f32.vlgmr.msra.gmra.mxu0 %v22764_v60  ;;  %20298 = vmatmul.mubr.f32.vlgmr.msra.gmra.mxu1 %v14115_v20  ;;  %v1552_v60 = vrot.slane %v1538_v40, %v21125_v30  ;;  %v15462_v51 = vand.u32 4294901760, %v15461_v0  ;;  %v16360_v20 = vand.u32 4294901760, %v16359_v34 }
 0x519   :  { %20281 = vmatpush3.msra.mxu0 %v22774_v62  ;;  %20306 = vmatpush3.msra.mxu1 %v22774_v62  ;;  %v15503_v62 = vand.u32 4294901760, %v22942_v27 }
 0x51a   :  { %20282 = vmatprep.mubr.msk.f32.mxu0 %vm20886_vm2, %v20885_v4  ;;  %20290 = vmatprep.subr.mxu0 %v20885_v4  ;;  %v1555_v53 = vcombine.low %v1536_v22, %v1552_v60  ;;  %v1556_v56 = vcombine.high %v1536_v22, %v1552_v60  ;;  %v15463_v3 = vsub.f32 %v15461_v0, %v15462_v51 }
 0x51b   :  { %20307 = vmatprep.mubr.msk.f32.mxu1 %vm20886_vm2, %v20885_v4  ;;  %20315 = vmatprep.subr.mxu1 %v20885_v4  ;;  %v15504_v11 = vsub.f32 %v22942_v27, %v15503_v62 }
 0x51c   :  { %20283 = vmatmul.mubr.f32.vlgmr.msra.gmra.mxu0 %v14117_v14  ;;  %20308 = vmatmul.mubr.f32.vlgmr.msra.gmra.mxu1 %v22826_v47  ;;  %v22970_v7 = vand.u32 4294901760, %v1555_v53  ;;  %v23011_v48 = vand.u32 4294901760, %v1556_v56  ;;  %v15464_v2 = vand.u32 4294901760, %v15463_v3 }
 0x51d   :  { %20291 = vmatpush3.msra.mxu0 %v22789_v8  ;;  %20316 = vmatpush3.msra.mxu1 %v14607_v46  ;;  %v15505_v8 = vand.u32 4294901760, %v15504_v11 }
 0x51e   :  { %20292 = vmatprep.mubr.msk.f32.mxu0 %vm20886_vm2, %v20885_v4  ;;  %20300 = vmatprep.subr.mxu0 %v20885_v4  ;;  %v22983_v29 = vsub.f32 %v1555_v53, %v22970_v7  ;;  %v23024_v32 = vsub.f32 %v1556_v56, %v23011_v48 }
 0x51f   :  { %20317 = vmatprep.mubr.msk.f32.mxu1 %vm20886_vm2, %v20885_v4  ;;  %20325 = vmatprep.subr.mxu1 %v20885_v4 }
 0x520   :  { %20293 = vmatmul.mubr.f32.vlgmr.msra.gmra.mxu0 %v14114_v39  ;;  %20318 = vmatmul.mubr.f32.vlgmr.msra.gmra.mxu1 %v22874_v63  ;;  %v15952_v57 = vand.u32 4294901760, %v22983_v29 }
 0x521   :  { %20301 = vmatpush3.msra.mxu0 %v14156_v25  ;;  %20326 = vmatpush3.msra.mxu1 %v22838_v23  ;;  %v23003_v25 = vand.u32 4294901760, %v15841_v59 }
 0x522   :  { %20302 = vmatprep.mubr.msk.f32.mxu0 %vm20886_vm2, %v20885_v4  ;;  %20310 = vmatprep.subr.mxu0 %v20885_v4  ;;  %v15953_v55 = vsub.f32 %v22983_v29, %v15952_v57 }
 0x523   :  { %20327 = vmatprep.mubr.msk.f32.mxu1 %vm20886_vm2, %v20885_v4  ;;  %20335 = vmatprep.subr.mxu1 %v20885_v4 }
 0x524   :  { %20303 = vmatmul.mubr.f32.vlgmr.msra.gmra.mxu0 %v22826_v47  ;;  %20328 = vmatmul.mubr.f32.vlgmr.msra.gmra.mxu1 %v14564_v37  ;;  %v15910_v47 = vsub.f32 %v15841_v59, %v23003_v25  ;;  %v15954_v49 = vand.u32 4294901760, %v15953_v55 }
 0x525   :  { %20311 = vmatpush3.msra.mxu0 %v22838_v23  ;;  %20336 = vmatpush3.msra.mxu1 %v22838_v23  ;;  %v16401_v23 = vand.u32 4294901760, %v23024_v32 }
 0x526   :  { %20312 = vmatprep.mubr.msk.f32.mxu0 %vm20886_vm2, %v20885_v4  ;;  %20320 = vmatprep.subr.mxu0 %v20885_v4  ;;  %v15911_v33 = vand.u32 4294901760, %v15910_v47 }
 0x527   :  { %20337 = vmatprep.mubr.msk.f32.mxu1 %vm20886_vm2, %v20885_v4  ;;  %20345 = vmatprep.subr.mxu1 %v20885_v4  ;;  %v16402_v26 = vsub.f32 %v23024_v32, %v16401_v23 }
 0x528   :  { %20313 = vmatmul.mubr.f32.vlgmr.msra.gmra.mxu0 %v14566_v5  ;;  %20338 = vmatmul.mubr.f32.vlgmr.msra.gmra.mxu1 %v22874_v63  ;;  %v15912_v39 = vsub.f32 %v15910_v47, %v15911_v33 }
 0x529   :  { %20321 = vmatpush3.msra.mxu0 %v22853_v16  ;;  %20346 = vmatpush3.msra.mxu1 %v15056_v54  ;;  %v16403_v16 = vand.u32 4294901760, %v16402_v26 }
 0x52a   :  { %20322 = vmatprep.mubr.msk.f32.mxu0 %vm20886_vm2, %v20885_v4  ;;  %20330 = vmatprep.subr.mxu0 %v20885_v4  ;;  %v15913_v45 = vand.u32 4294901760, %v15912_v39 }
 0x52b   :  { %20347 = vmatprep.mubr.msk.f32.mxu1 %vm20886_vm2, %v20885_v4  ;;  %20355 = vmatprep.subr.mxu1 %v20885_v4 }
 0x52c   :  { %20323 = vmatmul.mubr.f32.vlgmr.msra.gmra.mxu0 %v14563_v36  ;;  %20348 = vmatmul.mubr.f32.vlgmr.msra.gmra.mxu1 %v22915_v28 }
 0x52d   :  { %20331 = vmatpush3.msra.mxu0 %v14605_v41  ;;  %20356 = vmatpush3.msra.mxu1 %v22882_v58  ;;  %v16361_v41 = vsub.f32 %v16359_v34, %v16360_v20 }
 0x52e   :  { %20332 = vmatprep.mubr.msk.f32.mxu0 %vm20886_vm2, %v20885_v4  ;;  %20340 = vmatprep.subr.mxu0 %v20885_v4 }
 0x52f   :  { %20357 = vmatprep.mubr.msk.f32.mxu1 %vm20886_vm2, %v20885_v4  ;;  %20365 = vmatprep.subr.mxu1 %v20885_v4  ;;  %v16362_v15 = vand.u32 4294901760, %v16361_v41 }
 0x530   :  { %20333 = vmatmul.mubr.f32.vlgmr.msra.gmra.mxu0 %v22874_v63  ;;  %20358 = vmatmul.mubr.f32.vlgmr.msra.gmra.mxu1 %v15013_v43 }
 0x531   :  { %20341 = vmatpush3.msra.mxu0 %v22882_v58  ;;  %20366 = vmatpush3.msra.mxu1 %v22882_v58 }
 0x532   :  { %20342 = vmatprep.mubr.msk.f32.mxu0 %vm20886_vm2, %v20885_v4  ;;  %20350 = vmatprep.subr.mxu0 %v20885_v4 }
 0x533   :  { %20367 = vmatprep.mubr.msk.f32.mxu1 %vm20886_vm2, %v20885_v4  ;;  %20375 = vmatprep.subr.mxu1 %v20885_v4 }
 0x534   :  { %20343 = vmatmul.mubr.f32.vlgmr.msra.gmra.mxu0 %v15015_v50  ;;  %20368 = vmatmul.mubr.f32.vlgmr.msra.gmra.mxu1 %v22915_v28 }
 0x535   :  { %20351 = vmatpush3.msra.mxu0 %v22895_v18  ;;  %20376 = vmatpush3.msra.mxu1 %v15505_v8 }
 0x536   :  { %20352 = vmatprep.mubr.msk.f32.mxu0 %vm20886_vm2, %v20885_v4  ;;  %20360 = vmatprep.subr.mxu0 %v20885_v4 }
 0x537   :  { %20377 = vmatprep.mubr.msk.f32.mxu1 %vm20886_vm2, %v20885_v4  ;;  %20385 = vmatprep.subr.mxu1 %v20885_v4 }
 0x538   :  { %20353 = vmatmul.mubr.f32.vlgmr.msra.gmra.mxu0 %v15012_v31  ;;  %20378 = vmatmul.mubr.f32.vlgmr.msra.gmra.mxu1 %v22962_v19 }
 0x539   :  { %20361 = vmatpush3.msra.mxu0 %v15054_v38  ;;  %20386 = vmatpush3.msra.mxu1 %v22927_v35 }
 0x53a   :  { %20362 = vmatprep.mubr.msk.f32.mxu0 %vm20886_vm2, %v20885_v4  ;;  %20370 = vmatprep.subr.mxu0 %v20885_v4 }
 0x53b   :  { %20387 = vmatprep.mubr.msk.f32.mxu1 %vm20886_vm2, %v20885_v4  ;;  %20395 = vmatprep.subr.mxu1 %v20885_v4 }
 0x53c   :  { %20363 = vmatmul.mubr.f32.vlgmr.msra.gmra.mxu0 %v22915_v28  ;;  %20388 = vmatmul.mubr.f32.vlgmr.msra.gmra.mxu1 %v15462_v51 }
 0x53d   :  { %20371 = vmatpush3.msra.mxu0 %v22927_v35  ;;  %20396 = vmatpush3.msra.mxu1 %v22927_v35 }
 0x53e   :  { %20372 = vmatprep.mubr.msk.f32.mxu0 %vm20886_vm2, %v20885_v4  ;;  %20380 = vmatprep.subr.mxu0 %v20885_v4 }
 0x53f   :  { %20397 = vmatprep.mubr.msk.f32.mxu1 %vm20886_vm2, %v20885_v4  ;;  %20405 = vmatprep.subr.mxu1 %v20885_v4 }
 0x540   :  { %20373 = vmatmul.mubr.f32.vlgmr.msra.gmra.mxu0 %v15464_v2  ;;  %20398 = vmatmul.mubr.f32.vlgmr.msra.gmra.mxu1 %v22962_v19 }
 0x541   :  { %20381 = vmatpush3.msra.mxu0 %v22942_v27  ;;  %20406 = vmatpush3.msra.mxu1 %v15954_v49 }
 0x542   :  { %20382 = vmatprep.mubr.msk.f32.mxu0 %vm20886_vm2, %v20885_v4  ;;  %20390 = vmatprep.subr.mxu0 %v20885_v4 }
 0x543   :  { %20407 = vmatprep.mubr.msk.f32.mxu1 %vm20886_vm2, %v20885_v4  ;;  %20415 = vmatprep.subr.mxu1 %v20885_v4 }
 0x544   :  { %20383 = vmatmul.mubr.f32.vlgmr.msra.gmra.mxu0 %v15461_v0  ;;  %20408 = vmatmul.mubr.f32.vlgmr.msra.gmra.mxu1 %v23003_v25 }
 0x545   :  { %20391 = vmatpush3.msra.mxu0 %v15503_v62  ;;  %20416 = vmatpush3.msra.mxu1 %v22970_v7 }
 0x546   :  { %20392 = vmatprep.mubr.msk.f32.mxu0 %vm20886_vm2, %v20885_v4  ;;  %20400 = vmatprep.subr.mxu0 %v20885_v4 }
 0x547   :  { %20417 = vmatprep.mubr.msk.f32.mxu1 %vm20886_vm2, %v20885_v4  ;;  %20425 = vmatprep.subr.mxu1 %v20885_v4 }
 0x548   :  { %20393 = vmatmul.mubr.f32.vlgmr.msra.gmra.mxu0 %v22962_v19  ;;  %20418 = vmatmul.mubr.f32.vlgmr.msra.gmra.mxu1 %v15911_v33 }
 0x549   :  { %20401 = vmatpush3.msra.mxu0 %v22970_v7  ;;  %20426 = vmatpush3.msra.mxu1 %v22970_v7 }
 0x54a   :  { %20402 = vmatprep.mubr.msk.f32.mxu0 %vm20886_vm2, %v20885_v4  ;;  %20410 = vmatprep.subr.mxu0 %v20885_v4 }
 0x54b   :  { %20427 = vmatprep.mubr.msk.f32.mxu1 %vm20886_vm2, %v20885_v4  ;;  %20435 = vmatprep.subr.mxu1 %v20885_v4 }
 0x54c   :  { %20403 = vmatmul.mubr.f32.vlgmr.msra.gmra.mxu0 %v15913_v45  ;;  %20428 = vmatmul.mubr.f32.vlgmr.msra.gmra.mxu1 %v23003_v25 }
 0x54d   :  { %20411 = vmatpush3.msra.mxu0 %v22983_v29  ;;  %20436 = vmatpush3.msra.mxu1 %v16403_v16 }
 0x54e   :  { %20412 = vmatprep.mubr.msk.f32.mxu0 %vm20886_vm2, %v20885_v4  ;;  %20420 = vmatprep.subr.mxu0 %v20885_v4 }
 0x54f   :  { %20437 = vmatprep.mubr.msk.f32.mxu1 %vm20886_vm2, %v20885_v4  ;;  %20445 = vmatprep.subr.mxu1 %v20885_v4 }
 0x550   :  { %20413 = vmatmul.mubr.f32.vlgmr.msra.gmra.mxu0 %v15910_v47  ;;  %20438 = vmatmul.mubr.f32.vlgmr.msra.gmra.mxu1 %v16358_v10 }
 0x551   :  { %20421 = vmatpush3.msra.mxu0 %v15952_v57  ;;  %20446 = vmatpush3.msra.mxu1 %v23011_v48 }
 0x552   :  { %20422 = vmatprep.mubr.msk.f32.mxu0 %vm20886_vm2, %v20885_v4  ;;  %20430 = vmatprep.subr.mxu0 %v20885_v4 }
 0x553   :  { %20447 = vmatprep.mubr.msk.f32.mxu1 %vm20886_vm2, %v20885_v4  ;;  %20455 = vmatprep.subr.mxu1 %v20885_v4 }
 0x554   :  { %20423 = vmatmul.mubr.f32.vlgmr.msra.gmra.mxu0 %v23003_v25  ;;  %20448 = vmatmul.mubr.f32.vlgmr.msra.gmra.mxu1 %v16360_v20 }
 0x555   :  { %20431 = vmatpush3.msra.mxu0 %v23011_v48  ;;  %20456 = vmatpush3.msra.mxu1 %v23011_v48 }
 0x556   :  { %20432 = vmatprep.mubr.msk.f32.mxu0 %vm20886_vm2, %v20885_v4  ;;  %20440 = vmatprep.subr.mxu0 %v20885_v4 }
 0x557   :  { %20457 = vmatprep.mubr.msk.f32.mxu1 %vm20886_vm2, %v20885_v4 }
 0x558   :  { %20433 = vmatmul.mubr.f32.vlgmr.msra.gmra.mxu0 %v16362_v15  ;;  %20458 = vmatmul.mubr.f32.vlgmr.msra.gmra.mxu1 %v16358_v10 }
 0x559   :  { %20441 = vmatpush3.msra.mxu0 %v23024_v32  ;;  %20442 = vmatprep.mubr.msk.f32.mxu0 %vm20886_vm2, %v20885_v4 }
 0x55a   :  { %20450 = vmatprep.subr.mxu0 %v20885_v4 }
 0x55c   :  { %v9569_v13 = vpop.f32.mrf.mxu1  ;;  %20443 = vmatmul.mubr.f32.vlgmr.msra.gmra.mxu0 %v16359_v34 }
 0x55d   :  { %20451 = vmatpush3.msra.mxu0 %v16401_v23  ;;  %20452 = vmatprep.mubr.msk.f32.mxu0 %vm20886_vm2, %v20885_v4  ;;  %vm17036_vm2 = vcmask 130048  }
 0x55e   :  { %v19989_v12 = vpop.f32.mrf.mxu1 }
 0x560   :  { %v9717_v63 = vpop.f32.mrf.mxu1  ;;  %20453 = vmatmul.mubr.f32.vlgmr.msra.gmra.mxu0 %v16358_v10 }
 0x562   :  { %v19999_v6 = vpop.f32.mrf.mxu1 }
 0x564   :  { %v9493_v58 = vpop.f32.mrf.mxu0  ;;  %v9863_v14 = vpop.f32.mrf.mxu1 }
 0x565   :  { %v9570_v36 = vadd.f32 %v9569_v13, %v9493_v58 }
 0x566   :  { %v19984_v46 = vpop.f32.mrf.mxu0  ;;  %v20009_v18 = vpop.f32.mrf.mxu1 }
 0x568   :  { %v9643_v37 = vpop.f32.mrf.mxu0  ;;  %v10018_v38 = vpop.f32.mrf.mxu1 }
 0x569   :  { %v9644_v52 = vadd.f32 %v9643_v37, %v9570_v36 }
 0x56a   :  { %v19994_v1 = vpop.f32.mrf.mxu0  ;;  %v20019_v24 = vpop.f32.mrf.mxu1 }
 0x56b   :  { %v9718_v28 = vadd.f32 %v9717_v63, %v9644_v52 }
 0x56c   :  { %v9791_v44 = vpop.f32.mrf.mxu0  ;;  %v10166_v40 = vpop.f32.mrf.mxu1 }
 0x56d   :  { %v9792_v17 = vadd.f32 %v9791_v44, %v9718_v28 }
 0x56e   :  { %v20004_v35 = vpop.f32.mrf.mxu0  ;;  %v20029_v4 = vpop.f32.mrf.mxu1 }
 0x56f   :  { %v23088_v5 = vadd.f32 %v9863_v14, %v9792_v17 }
 0x570   :  { %v9942_v31 = vpop.f32.mrf.mxu0  ;;  %v10312_v22 = vpop.f32.mrf.mxu1 }
 0x571   :  { %v10019_v60 = vadd.f32 %v10018_v38, %v9942_v31 }
 0x572   :  { %v20014_v54 = vpop.f32.mrf.mxu0  ;;  %v20039_v27 = vpop.f32.mrf.mxu1 }
 0x574   :  { %v10092_v43 = vpop.f32.mrf.mxu0  ;;  %v10467_v62 = vpop.f32.mrf.mxu1 }
 0x575   :  { %v10093_v42 = vadd.f32 %v10092_v43, %v10019_v60 }
 0x576   :  { %v20024_v53 = vpop.f32.mrf.mxu0  ;;  %v20049_v9 = vpop.f32.mrf.mxu1 }
 0x577   :  { %v10167_v19 = vadd.f32 %v10166_v40, %v10093_v42 }
 0x578   :  { %v10240_v11 = vpop.f32.mrf.mxu0  ;;  %v10615_v7 = vpop.f32.mrf.mxu1 }
 0x579   :  { %v10241_v50 = vadd.f32 %v10240_v11, %v10167_v19 }
 0x57a   :  { %v20034_v0 = vpop.f32.mrf.mxu0  ;;  %v20059_v8 = vpop.f32.mrf.mxu1 }
 0x57b   :  { %v10313_v29 = vadd.f32 %v10312_v22, %v10241_v50 }
 0x57c   :  { %v10391_v51 = vpop.f32.mrf.mxu0  ;;  %v10761_v57 = vpop.f32.mrf.mxu1 }
 0x57d   :  { %v10468_v59 = vadd.f32 %v10467_v62, %v10391_v51 }
 0x57e   :  { %v20044_v56 = vpop.f32.mrf.mxu0  ;;  %v20069_v3 = vpop.f32.mrf.mxu1 }
 0x580   :  { %v10541_v25 = vpop.f32.mrf.mxu0  ;;  %v10916_v55 = vpop.f32.mrf.mxu1 }
 0x581   :  { %v10542_v48 = vadd.f32 %v10541_v25, %v10468_v59 }
 0x582   :  { %v20054_v2 = vpop.f32.mrf.mxu0  ;;  %v20079_v47 = vpop.f32.mrf.mxu1 }
 0x583   :  { %v10616_v49 = vadd.f32 %v10615_v7, %v10542_v48 }
 0x584   :  { %v10689_v32 = vpop.f32.mrf.mxu0  ;;  %v11064_v33 = vpop.f32.mrf.mxu1 }
 0x585   :  { %v10690_v23 = vadd.f32 %v10689_v32, %v10616_v49 }
 0x586   :  { %v20064_v61 = vpop.f32.mrf.mxu0  ;;  %v20089_v39 = vpop.f32.mrf.mxu1 }
 0x587   :  { %v10762_v10 = vadd.f32 %v10761_v57, %v10690_v23 }
 0x588   :  { %v10840_v26 = vpop.f32.mrf.mxu0  ;;  %v11210_v45 = vpop.f32.mrf.mxu1 }
 0x589   :  { %v13010_v34 = vcombine.low %v23088_v5, %v10762_v10  ;;  %v13011_v16 = vcombine.high %v23088_v5, %v10762_v10  ;;  %v10917_v20 = vadd.f32 %v10916_v55, %v10840_v26 }
 0x58a   :  { %v20074_v41 = vpop.f32.mrf.mxu0  ;;  %v20099_v15 = vpop.f32.mrf.mxu1 }
 0x58b   :  { %v23093_v4 = vrot.slane %v13010_v34, %v21120_v21  ;;  %v23096_v5 = vrot.slane %v13011_v16, %v21120_v21 }
 0x58c   :  { %v10990_v13 = vpop.f32.mrf.mxu0  ;;  %v11365_v12 = vpop.f32.mrf.mxu1 }
 0x58d   :  { %v10991_v63 = vadd.f32 %v10990_v13, %v10917_v20 }
 0x58e   :  { %v20084_v6 = vpop.f32.mrf.mxu0  ;;  %v20109_v58 = vpop.f32.mrf.mxu1 }
 0x58f   :  { %v11065_v14 = vadd.f32 %v11064_v33, %v10991_v63 }
 0x590   :  { %v11138_v36 = vpop.f32.mrf.mxu0  ;;  %v11513_v46 = vpop.f32.mrf.mxu1 }
 0x591   :  { %v11139_v18 = vadd.f32 %v11138_v36, %v11065_v14 }
 0x592   :  { %v20094_v37 = vpop.f32.mrf.mxu0  ;;  %v20119_v38 = vpop.f32.mrf.mxu1 }
 0x593   :  { %v11211_v52 = vadd.f32 %v11210_v45, %v11139_v18 }
 0x594   :  { %v11289_v1 = vpop.f32.mrf.mxu0  ;;  %v11659_v24 = vpop.f32.mrf.mxu1 }
 0x595   :  { %v13026_v28 = vcombine.low %v10313_v29, %v11211_v52  ;;  %v13027_v44 = vcombine.high %v10313_v29, %v11211_v52  ;;  %v11366_v40 = vadd.f32 %v11365_v12, %v11289_v1 }
 0x596   :  { %v20104_v17 = vpop.f32.mrf.mxu0  ;;  %v20129_v35 = vpop.f32.mrf.mxu1 }
 0x597   :  { %v23099_v31 = vrot.slane %v13026_v28, %v21120_v21  ;;  %v23102_v22 = vrot.slane %v13027_v44, %v21120_v21 }
 0x598   :  { %v11439_v60 = vpop.f32.mrf.mxu0  ;;  %v11814_v54 = vpop.f32.mrf.mxu1 }
 0x599   :  { %v11440_v27 = vadd.f32 %v11439_v60, %v11366_v40  ;;  %v13074_v43 = vcombine.low %v23093_v4, %v23099_v31  ;;  %v13075_v62 = vcombine.high %v23093_v4, %v23099_v31  ;;  %v13090_v42 = vcombine.low %v23096_v5, %v23102_v22 }
 0x59a   :  { %v20114_v53 = vpop.f32.mrf.mxu0  ;;  %v20139_v9 = vpop.f32.mrf.mxu1  ;;  %v13091_v19 = vcombine.high %v23096_v5, %v23102_v22 }
 0x59b   :  { %v11514_v11 = vadd.f32 %v11513_v46, %v11440_v27 }
 0x59c   :  { %v11587_v7 = vpop.f32.mrf.mxu0  ;;  %v11962_v50 = vpop.f32.mrf.mxu1  ;;  %v23150_v4 = vrot.slane %v13091_v19, %v21125_v30 }
 0x59d   :  { %v11588_v0 = vadd.f32 %v11587_v7, %v11514_v11 }
 0x59e   :  { %v20124_v8 = vpop.f32.mrf.mxu0  ;;  %v20149_v29 = vpop.f32.mrf.mxu1 }
 0x59f   :  { %v11660_v51 = vadd.f32 %v11659_v24, %v11588_v0 }
 0x5a0   :  { %v11738_v57 = vpop.f32.mrf.mxu0  ;;  %v12108_v59 = vpop.f32.mrf.mxu1 }
 0x5a1   :  { %v11815_v12 = vadd.f32 %v11814_v54, %v11738_v57 }
 0x5a2   :  { %v20134_v56 = vpop.f32.mrf.mxu0  ;;  %v20159_v3 = vpop.f32.mrf.mxu1 }
 0x5a4   :  { %v11888_v25 = vpop.f32.mrf.mxu0  ;;  %v12263_v55 = vpop.f32.mrf.mxu1 }
 0x5a5   :  { %v11889_v58 = vadd.f32 %v11888_v25, %v11815_v12  ;;  %v23144_v12 = vrot.slane %v13090_v42, %v21125_v30 }
 0x5a6   :  { %v20144_v48 = vpop.f32.mrf.mxu0  ;;  %v20169_v2 = vpop.f32.mrf.mxu1 }
 0x5a7   :  { %v11963_v38 = vadd.f32 %v11962_v50, %v11889_v58 }
 0x5a8   :  { %v12036_v47 = vpop.f32.mrf.mxu0  ;;  %v12411_v49 = vpop.f32.mrf.mxu1 }
 0x5a9   :  { %v12037_v35 = vadd.f32 %v12036_v47, %v11963_v38 }
 0x5aa   :  { %v20154_v32 = vpop.f32.mrf.mxu0  ;;  %v20179_v33 = vpop.f32.mrf.mxu1 }
 0x5ab   :  { %v12109_v0 = vadd.f32 %v12108_v59, %v12037_v35 }
 0x5ac   :  { %v12187_v23 = vpop.f32.mrf.mxu0  ;;  %v12557_v61 = vpop.f32.mrf.mxu1 }
 0x5ad   :  { %v12264_v34 = vadd.f32 %v12263_v55, %v12187_v23 }
 0x5ae   :  { %v20164_v39 = vpop.f32.mrf.mxu0  ;;  %v20189_v10 = vpop.f32.mrf.mxu1 }
 0x5af   :  { %v13082_v10 = vrot.slane %v13074_v43, %v21125_v30 }
 0x5b0   :  { %v12337_v26 = vpop.f32.mrf.mxu0  ;;  %v12712_v45 = vpop.f32.mrf.mxu1 }
 0x5b1   :  { %v12338_v41 = vadd.f32 %v12337_v26, %v12264_v34  ;;  %v23130_v34 = vrot.slane %v13075_v62, %v21125_v30 }
 0x5b2   :  { %v20174_v16 = vpop.f32.mrf.mxu0  ;;  %v20199_v20 = vpop.f32.mrf.mxu1 }
 0x5b3   :  { %v12412_v14 = vadd.f32 %v12411_v49, %v12338_v41 }
 0x5b4   :  { %v12485_v15 = vpop.f32.mrf.mxu0  ;;  %v12860_v13 = vpop.f32.mrf.mxu1 }
 0x5b5   :  { %v12486_v52 = vadd.f32 %v12485_v15, %v12412_v14 }
 0x5b6   :  { %v20184_v63 = vpop.f32.mrf.mxu0  ;;  %v20209_v6 = vpop.f32.mrf.mxu1 }
 0x5b7   :  { %v12558_v60 = vadd.f32 %v12557_v61, %v12486_v52 }
 0x5b8   :  { %v12636_v36 = vpop.f32.mrf.mxu0  ;;  %v13006_v46 = vpop.f32.mrf.mxu1 }
 0x5b9   :  { %v12713_v1 = vadd.f32 %v12712_v45, %v12636_v36  ;;  %v13042_v8 = vcombine.low %v11660_v51, %v12558_v60  ;;  %v13043_v50 = vcombine.high %v11660_v51, %v12558_v60 }
 0x5ba   :  { %v20194_v18 = vpop.f32.mrf.mxu0  ;;  %v20219_v37 = vpop.f32.mrf.mxu1 }
 0x5bb   :  { %v13050_v2 = vrot.slane %v13042_v8, %v21120_v21  ;;  %v13057_v47 = vrot.slane %v13043_v50, %v21120_v21 }
 0x5bc   :  { %v12786_v24 = vpop.f32.mrf.mxu0  ;;  %v23112_v28 = vpop.f32.mrf.mxu1 }
 0x5bd   :  { %v12787_v44 = vadd.f32 %v12786_v24, %v12713_v1 }
 0x5be   :  { %v20204_v40 = vpop.f32.mrf.mxu0  ;;  %v20229_v17 = vpop.f32.mrf.mxu1 }
 0x5bf   :  { %v12861_v54 = vadd.f32 %v12860_v13, %v12787_v44 }
 0x5c0   :  { %v12934_v27 = vpop.f32.mrf.mxu0  ;;  %v23114_v53 = vpop.f32.mrf.mxu1 }
 0x5c1   :  { %v12935_v9 = vadd.f32 %v12934_v27, %v12861_v54 }
 0x5c2   :  { %v20214_v11 = vpop.f32.mrf.mxu0  ;;  %v20239_v7 = vpop.f32.mrf.mxu1 }
 0x5c3   :  { %v13007_v29 = vadd.f32 %v13006_v46, %v12935_v9 }
 0x5c4   :  { %v13221_v57 = vpop.f32.mrf.mxu0  ;;  %v23116_v56 = vpop.f32.mrf.mxu1 }
 0x5c5   :  { %v13058_v3 = vcombine.low %v12109_v0, %v13007_v29  ;;  %v13059_v25 = vcombine.high %v12109_v0, %v13007_v29 }
 0x5c6   :  { %v20224_v55 = vpop.f32.mrf.mxu0  ;;  %v20249_v48 = vpop.f32.mrf.mxu1 }
 0x5c7   :  { %v13066_v49 = vrot.slane %v13058_v3, %v21120_v21  ;;  %v13073_v32 = vrot.slane %v13059_v25, %v21120_v21 }
 0x5c8   :  { %v13371_v33 = vpop.f32.mrf.mxu0  ;;  %v13746_v59 = vpop.f32.mrf.mxu1 }
 0x5c9   :  { %v13106_v23 = vcombine.low %v13050_v2, %v13066_v49  ;;  %v13107_v51 = vcombine.high %v13050_v2, %v13066_v49  ;;  %v13122_v61 = vcombine.low %v13057_v47, %v13073_v32  ;;  %v13123_v39 = vcombine.high %v13057_v47, %v13073_v32 }
 0x5ca   :  { %v20234_v26 = vpop.f32.mrf.mxu0  ;;  %v20259_v45 = vpop.f32.mrf.mxu1 }
 0x5cb   :  { %v13114_v16 = vrot.slane %v13106_v23, %v21125_v30  ;;  %v13121_v20 = vrot.slane %v13107_v51, %v21125_v30  ;;  %v23135_v41 = vrot.slane %v13122_v61, %v21125_v30  ;;  %v23138_v15 = vrot.slane %v13123_v39, %v21125_v30 }
 0x5cc   :  { %v13519_v13 = vpop.f32.mrf.mxu0  ;;  %v13894_v43 = vpop.f32.mrf.mxu1 }
 0x5cd   :  { %v13138_v31 = vcombine.low %v13082_v10, %v13114_v16  ;;  %v13139_v62 = vcombine.high %v13082_v10, %v13114_v16  ;;  %v13140_v63 = vcombine.low %v23130_v34, %v13121_v20  ;;  %v13141_v6 = vcombine.high %v23130_v34, %v13121_v20 }
 0x5ce   :  { %v20244_v58 = vpop.f32.mrf.mxu0  ;;  %v20269_v14 = vpop.f32.mrf.mxu1  ;;  %v13142_v36 = vcombine.low %v23144_v12, %v23135_v41  ;;  %v13143_v42 = vcombine.high %v23144_v12, %v23135_v41  ;;  %v13144_v46 = vcombine.low %v23150_v4, %v23138_v15  ;;  %v13145_v5 = vcombine.high %v23150_v4, %v23138_v15 }
 0x5cf   :  { %v13222_v38 = vadd.f32 %v13221_v57, %v13138_v31 }
 0x5d0   :  { %v13670_v22 = vpop.f32.mrf.mxu0  ;;  %v14040_v19 = vpop.f32.mrf.mxu1 }
 0x5d1   :  { %v13298_v40 = vadd.f32 %v23112_v28, %v13222_v38  ;;  %v13671_v29 = vadd.f32 %v13670_v22, %v13139_v62 }
 0x5d2   :  { %v20254_v18 = vpop.f32.mrf.mxu0  ;;  %v20279_v37 = vpop.f32.mrf.mxu1 }
 0x5d3   :  { %v13372_v27 = vadd.f32 %v13371_v33, %v13298_v40  ;;  %v13747_v47 = vadd.f32 %v13746_v59, %v13671_v29 }
 0x5d4   :  { %v13820_v52 = vpop.f32.mrf.mxu0  ;;  %v14195_v1 = vpop.f32.mrf.mxu1 }
 0x5d5   :  { %v13446_v50 = vadd.f32 %v23114_v53, %v13372_v27  ;;  %v13821_v10 = vadd.f32 %v13820_v52, %v13747_v47 }
 0x5d6   :  { %v20264_v24 = vpop.f32.mrf.mxu0  ;;  %v20289_v44 = vpop.f32.mrf.mxu1 }
 0x5d7   :  { %v13520_v28 = vadd.f32 %v13519_v13, %v13446_v50 }
 0x5d8   :  { %v13968_v17 = vpop.f32.mrf.mxu0  ;;  %v14343_v35 = vpop.f32.mrf.mxu1 }
 0x5d9   :  { %v13592_v39 = vadd.f32 %v23116_v56, %v13520_v28 }
 0x5da   :  { %v20274_v60 = vpop.f32.mrf.mxu0  ;;  %v20299_v54 = vpop.f32.mrf.mxu1 }
 0x5dc   :  { %v14119_v9 = vpop.f32.mrf.mxu0  ;;  %v14489_v11 = vpop.f32.mrf.mxu1 }
 0x5dd   :  { %v14120_v7 = vadd.f32 %v14119_v9, %v13140_v63  ;;  %v13895_v63 = vadd.f32 %v13894_v43, %v13821_v10 }
 0x5de   :  { %v20284_v0 = vpop.f32.mrf.mxu0  ;;  %v20309_v8 = vpop.f32.mrf.mxu1 }
 0x5df   :  { %v14196_v57 = vadd.f32 %v14195_v1, %v14120_v7  ;;  %v13969_v37 = vadd.f32 %v13968_v17, %v13895_v63 }
 0x5e0   :  { %v14269_v3 = vpop.f32.mrf.mxu0  ;;  %v14644_v25 = vpop.f32.mrf.mxu1 }
 0x5e1   :  { %v14270_v55 = vadd.f32 %v14269_v3, %v14196_v57  ;;  %v14041_v40 = vadd.f32 %v14040_v19, %v13969_v37 }
 0x5e2   :  { %v20294_v48 = vpop.f32.mrf.mxu0  ;;  %v20319_v2 = vpop.f32.mrf.mxu1 }
 0x5e3   :  { %v14344_v49 = vadd.f32 %v14343_v35, %v14270_v55 }
 0x5e4   :  { %v14417_v32 = vpop.f32.mrf.mxu0  ;;  %v14792_v23 = vpop.f32.mrf.mxu1 }
 0x5e5   :  { %v14418_v33 = vadd.f32 %v14417_v32, %v14344_v49 }
 0x5e6   :  { %v20304_v51 = vpop.f32.mrf.mxu0  ;;  %v20329_v61 = vpop.f32.mrf.mxu1 }
 0x5e7   :  { %v14490_v26 = vadd.f32 %v14489_v11, %v14418_v33 }
 0x5e8   :  { %v14568_v53 = vpop.f32.mrf.mxu0  ;;  %v14938_v45 = vpop.f32.mrf.mxu1 }
 0x5e9   :  { %v16738_v34 = vcombine.low %v13592_v39, %v14490_v26  ;;  %v16739_v16 = vcombine.high %v13592_v39, %v14490_v26  ;;  %v14569_v20 = vadd.f32 %v14568_v53, %v13141_v6 }
 0x5ea   :  { %v20314_v31 = vpop.f32.mrf.mxu0  ;;  %v20339_v62 = vpop.f32.mrf.mxu1 }
 0x5eb   :  { %v14645_v13 = vadd.f32 %v14644_v25, %v14569_v20  ;;  %v16746_v11 = vrot.slane %v16738_v34, %v21120_v21  ;;  %v16753_v17 = vrot.slane %v16739_v16, %v21120_v21 }
 0x5ec   :  { %v14718_v59 = vpop.f32.mrf.mxu0  ;;  %v23165_v58 = vpop.f32.mrf.mxu1 }
 0x5ed   :  { %v14719_v14 = vadd.f32 %v14718_v59, %v14645_v13 }
 0x5ee   :  { %v20324_v22 = vpop.f32.mrf.mxu0  ;;  %v20349_v18 = vpop.f32.mrf.mxu1 }
 0x5ef   :  { %v14793_v38 = vadd.f32 %v14792_v23, %v14719_v14 }
 0x5f0   :  { %v14866_v56 = vpop.f32.mrf.mxu0  ;;  %v23167_v52 = vpop.f32.mrf.mxu1 }
 0x5f1   :  { %v14867_v1 = vadd.f32 %v14866_v56, %v14793_v38 }
 0x5f2   :  { %v20334_v24 = vpop.f32.mrf.mxu0  ;;  %v20359_v44 = vpop.f32.mrf.mxu1 }
 0x5f3   :  { %v14939_v6 = vadd.f32 %v14938_v45, %v14867_v1 }
 0x5f4   :  { %v15017_v35 = vpop.f32.mrf.mxu0  ;;  %v23169_v60 = vpop.f32.mrf.mxu1 }
 0x5f5   :  { %v16754_v43 = vcombine.low %v14041_v40, %v14939_v6  ;;  %v16755_v54 = vcombine.high %v14041_v40, %v14939_v6  ;;  %v15018_v22 = vadd.f32 %v15017_v35, %v13142_v36 }
 0x5f6   :  { %v20344_v27 = vpop.f32.mrf.mxu0  ;;  %v20369_v9 = vpop.f32.mrf.mxu1 }
 0x5f7   :  { %v16762_v7 = vrot.slane %v16754_v43, %v21120_v21  ;;  %v16769_v0 = vrot.slane %v16755_v54, %v21120_v21  ;;  %v15094_v54 = vadd.f32 %v23165_v58, %v15018_v22 }
 0x5f8   :  { %v15167_v8 = vpop.f32.mrf.mxu0  ;;  %v23175_v50 = vpop.f32.mrf.mxu1 }
 0x5f9   :  { %v16770_v19 = vcombine.low %v16746_v11, %v16762_v7  ;;  %v16771_v29 = vcombine.high %v16746_v11, %v16762_v7  ;;  %v16786_v57 = vcombine.low %v16753_v17, %v16769_v0  ;;  %v16787_v3 = vcombine.high %v16753_v17, %v16769_v0 }
 0x5fa   :  { %v20354_v25 = vpop.f32.mrf.mxu0  ;;  %v20379_v55 = vpop.f32.mrf.mxu1  ;;  %v15168_v7 = vadd.f32 %v15167_v8, %v15094_v54 }
 0x5fb   :  { %v16778_v48 = vrot.slane %v16770_v19, %v21125_v30  ;;  %v16785_v2 = vrot.slane %v16771_v29, %v21125_v30  ;;  %v16794_v28 = vrot.slane %v16786_v57, %v21125_v30  ;;  %v16801_v47 = vrot.slane %v16787_v3, %v21125_v30 }
 0x5fc   :  { %v15315_v49 = vpop.f32.mrf.mxu0  ;;  %v23181_v32 = vpop.f32.mrf.mxu1  ;;  %v15242_v58 = vadd.f32 %v23167_v52, %v15168_v7 }
 0x5fd   :  { %v16874_v23 = vcombine.low %v16778_v48, %v16785_v2  ;;  %v18871_v33 = vcombine.high %v16778_v48, %v16785_v2  ;;  %v16890_v51 = vcombine.low %v16794_v28, %v16801_v47  ;;  %v18872_v61 = vcombine.high %v16794_v28, %v16801_v47 }
 0x5fe   :  { %v20364_v39 = vpop.f32.mrf.mxu0  ;;  %v20389_v10 = vpop.f32.mrf.mxu1 }
 0x5ff   :  { %v16881_v26 = vrot.slane %v16874_v23, %v21120_v21  ;;  %v16889_v53 = vrot.slane %v18871_v33, %v21120_v21  ;;  %v16897_v45 = vrot.slane %v16890_v51, %v21120_v21  ;;  %v16905_v34 = vrot.slane %v18872_v61, %v21120_v21 }
 0x600   :  { %v15466_v16 = vpop.f32.mrf.mxu0  ;;  %v23187_v20 = vpop.f32.mrf.mxu1  ;;  %v15316_v23 = vadd.f32 %v15315_v49, %v15242_v58  ;;  %v17044_v58 = vld [vmem:[#allocation5 + $0x10] sm:$0xff] }
 0x601   :  { %v16906_v31 = vcombine.low %v16881_v26, %v16889_v53  ;;  %v16922_v62 = vcombine.low %v16897_v45, %v16905_v34  ;;  %v16907_v63 = vcombine.high %v16881_v26, %v16889_v53  ;;  %v16923_v14 = vcombine.high %v16897_v45, %v16905_v34 }
 0x602   :  { %v20374_v13 = vpop.f32.mrf.mxu0  ;;  %v20399_v59 = vpop.f32.mrf.mxu1  ;;  %v15467_v25 = vadd.f32 %v15466_v16, %v13143_v42  ;;  %v15388_v41 = vadd.f32 %v23169_v60, %v15316_v23 }
 0x603   :  { %v23193_v18 = vrot.slane %v16906_v31, %v21125_v30  ;;  %v23196_v37 = vrot.slane %v16922_v62, %v21125_v30  ;;  %v16921_v38 = vrot.slane %v16907_v63, %v21125_v30  ;;  %v16937_v24 = vrot.slane %v16923_v14, %v21125_v30 }
 0x604   :  { %v15616_v56 = vpop.f32.mrf.mxu0  ;;  %v15991_v1 = vpop.f32.mrf.mxu1 }
 0x605   :  { %v16939_v44 = vcombine.high %v23193_v18, %v23196_v37  ;;  %v16938_v40 = vcombine.low %v23193_v18, %v23196_v37  ;;  %v16940_v35 = vcombine.low %v16921_v38, %v16937_v24  ;;  %v16941_v43 = vcombine.high %v16921_v38, %v16937_v24 }
 0x606   :  { %v20384_v6 = vpop.f32.mrf.mxu0  ;;  %v20409_v36 = vpop.f32.mrf.mxu1 }
 0x607   :  { %17012 = vrot.lane.b32.xlu0 %v16939_v44, %s20879_s27 }
 0x608   :  { %v15764_v27 = vpop.f32.mrf.mxu0  ;;  %v16139_v9 = vpop.f32.mrf.mxu1 }
 0x60a   :  { %v20394_v11 = vpop.f32.mrf.mxu0  ;;  %v20419_v17 = vpop.f32.mrf.mxu1 }
 0x60b   :  { %17020 = vrot.lane.b32.xlu0 %v16940_v35, %s20893_s22 }
 0x60c   :  { %v15915_v0 = vpop.f32.mrf.mxu0  ;;  %v16285_v19 = vpop.f32.mrf.mxu1 }
 0x60d   :  { %v15916_v29 = vadd.f32 %v15915_v0, %v13144_v46  ;;  %v15543_v46 = vadd.f32 %v23175_v50, %v15467_v25  ;;  %v17043_v25 = vld [vmem:[#allocation5 + $0x8] sm:$0xff] }
 0x60e   :  { %v20404_v57 = vpop.f32.mrf.mxu0  ;;  %v20429_v3 = vpop.f32.mrf.mxu1  ;;  %v23246_v23 = vand.u32 4294901760, %v17043_v25 }
 0x60f   :  { %17028 = vrot.lane.b32.xlu0 %v16941_v43, %s20894_s25  ;;  %v15992_v8 = vadd.f32 %v15991_v1, %v15916_v29  ;;  %v15617_v12 = vadd.f32 %v15616_v56, %v15543_v46 }
 0x610   :  { %v16065_v55 = vpop.f32.mrf.mxu0  ;;  %v16440_v48 = vpop.f32.mrf.mxu1 }
 0x611   :  { %v16066_v2 = vadd.f32 %v16065_v55, %v15992_v8  ;;  %v15691_v31 = vadd.f32 %v23181_v32, %v15617_v12 }
 0x612   :  { %v20414_v28 = vpop.f32.mrf.mxu0  ;;  %v20439_v47 = vpop.f32.mrf.mxu1 }
 0x613   :  { %v16140_v33 = vadd.f32 %v16139_v9, %v16066_v2  ;;  %v15765_v14 = vadd.f32 %v15764_v27, %v15691_v31  ;;  %v17045_v27 = vld [vmem:[#allocation5 + $0x18] sm:$0xff]  ;;  %v23244_v47 = vand.u32 4294901760, %v17044_v58 }
 0x614   :  { %v16213_v51 = vpop.f32.mrf.mxu0  ;;  %v16588_v61 = vpop.f32.mrf.mxu1  ;;  %v23230_v7 = vand.u32 4294901760, %v17045_v27 }
 0x615   :  { %v16214_v52 = vadd.f32 %v16213_v51, %v16140_v33  ;;  %v15837_v1 = vadd.f32 %v23187_v20, %v15765_v14 }
 0x616   :  { %v20424_v39 = vpop.f32.mrf.mxu0  ;;  %v20449_v10 = vpop.f32.mrf.mxu1  ;;  %v23233_v3 = vsub.f32 %v17045_v27, %v23230_v7  ;;  %20460 = vmatprep.subr.mxu0 %v23230_v7 }
 0x617   :  { %v16286_v42 = vadd.f32 %v16285_v19, %v16214_v52  ;;  %20461 = vmatpush3.msra.mxu0 %v23230_v7  ;;  %v23251_v39 = vsub.f32 %v17044_v58, %v23244_v47 }
 0x618   :  { %v16364_v26 = vpop.f32.mrf.mxu0  ;;  %v16734_v53 = vpop.f32.mrf.mxu1  ;;  %v23242_v28 = vand.u32 4294901760, %v23233_v3  ;;  %20462 = vmatprep.subr.mxu0 %v23244_v47 }
 0x619   :  { %v16806_v45 = vcombine.low %v15388_v41, %v16286_v42  ;;  %v16807_v34 = vcombine.high %v15388_v41, %v16286_v42  ;;  %v16365_v49 = vadd.f32 %v16364_v26, %v13145_v5  ;;  %20463 = vmatpush3.msra.mxu0 %v23244_v47 }
 0x61a   :  { %v20434_v16 = vpop.f32.mrf.mxu0  ;;  %v20459_v50 = vpop.f32.mrf.mxu1  ;;  %v17176_v52 = vsub.f32 %v23233_v3, %v23242_v28  ;;  %20464 = vmatprep.subr.mxu0 %v23246_v23 }
 0x61b   :  { %v16441_v62 = vadd.f32 %v16440_v48, %v16365_v49  ;;  %v16814_v15 = vrot.slane %v16806_v45, %v21120_v21  ;;  %v16821_v4 = vrot.slane %v16807_v34, %v21120_v21  ;;  %20465 = vmatpush3.msra.mxu0 %v23246_v23 }
 0x61c   :  { %v16514_v63 = vpop.f32.mrf.mxu0  ;;  %v17177_v26 = vand.u32 4294901760, %v17176_v52 }
 0x61d   :  { %v16515_v13 = vadd.f32 %v16514_v63, %v16441_v62 }
 0x61e   :  { %v20444_v59 = vpop.f32.mrf.mxu0  ;;  %20471 = vmatprep.subr.mxu1 %v17177_v26 }
 0x61f   :  { %v16589_v60 = vadd.f32 %v16588_v61, %v16515_v13  ;;  %20472 = vmatpush3.msra.mxu1 %v17177_v26  ;;  %v17042_v13 = vld [vmem:[#allocation5] sm:$0xff] }
 0x620   :  { %v16662_v22 = vpop.f32.mrf.mxu0  ;;  %v23276_v59 = vand.u32 4294901760, %v17042_v13 }
 0x621   :  { %v16663_v38 = vadd.f32 %v16662_v22, %v16589_v60 }
 0x622   :  { %v20454_v56 = vpop.f32.mrf.mxu0  ;;  %v23280_v14 = vsub.f32 %v17042_v13, %v23276_v59  ;;  %20466 = vmatprep.subr.mxu0 %v23276_v59 }
 0x623   :  { %v16735_v24 = vadd.f32 %v16734_v53, %v16663_v38  ;;  %v23263_v53 = vand.u32 4294901760, %v23251_v39  ;;  %20467 = vmatpush3.msra.mxu0 %v23276_v59 }
 0x624   :  { %v23285_v60 = vand.u32 4294901760, %v23280_v14  ;;  %20482 = vmatprep.subr.mxu0 %v23233_v3 }
 0x625   :  { %v16822_v44 = vcombine.low %v15837_v1, %v16735_v24  ;;  %v16823_v6 = vcombine.high %v15837_v1, %v16735_v24 }
 0x626   :  { %v17197_v22 = vsub.f32 %v23280_v14, %v23285_v60 }
 0x627   :  { %v16830_v5 = vrot.slane %v16822_v44, %v21120_v21  ;;  %v16837_v32 = vrot.slane %v16823_v6, %v21120_v21 }
 0x628   :  { %v17198_v38 = vand.u32 4294901760, %v17197_v22 }
 0x629   :  { %v16838_v36 = vcombine.low %v16814_v15, %v16830_v5  ;;  %v16839_v35 = vcombine.high %v16814_v15, %v16830_v5  ;;  %v16854_v43 = vcombine.low %v16821_v4, %v16837_v32  ;;  %v16855_v54 = vcombine.high %v16821_v4, %v16837_v32 }
 0x62b   :  { %v16846_v9 = vrot.slane %v16838_v36, %v21125_v30  ;;  %v16853_v20 = vrot.slane %v16839_v35, %v21125_v30  ;;  %v16862_v11 = vrot.slane %v16854_v43, %v21125_v30  ;;  %v16869_v17 = vrot.slane %v16855_v54, %v21125_v30 }
 0x62d   :  { %v16942_v0 = vcombine.low %v16846_v9, %v16853_v20  ;;  %v18873_v19 = vcombine.high %v16846_v9, %v16853_v20  ;;  %v16958_v29 = vcombine.low %v16862_v11, %v16869_v17  ;;  %v18874_v57 = vcombine.high %v16862_v11, %v16869_v17 }
 0x62f   :  { %v16949_v8 = vrot.slane %v16942_v0, %v21120_v21  ;;  %v16957_v55 = vrot.slane %v18873_v19, %v21120_v21  ;;  %v16965_v48 = vrot.slane %v16958_v29, %v21120_v21  ;;  %v16973_v2 = vrot.slane %v18874_v57, %v21120_v21  ;;  %v18875_v57 = vld [vmem:[%s23659_s5] ss:$0 sm:$0xff] }
 0x630   :  { %v23254_v21 = vsub.f32 %v17043_v25, %v23246_v23 }
 0x631   :  { %v16974_v46 = vcombine.low %v16949_v8, %v16957_v55  ;;  %v16990_v33 = vcombine.low %v16965_v48, %v16973_v2  ;;  %v16975_v51 = vcombine.high %v16949_v8, %v16957_v55  ;;  %v16991_v61 = vcombine.high %v16965_v48, %v16973_v2 }
 0x632   :  { %v23266_v45 = vand.u32 4294901760, %v23254_v21 }
 0x633   :  { %v16982_v10 = vrot.slane %v16974_v46, %v21125_v30  ;;  %v16998_v41 = vrot.slane %v16990_v33, %v21125_v30  ;;  %v16989_v12 = vrot.slane %v16975_v51, %v21125_v30  ;;  %v17005_v42 = vrot.slane %v16991_v61, %v21125_v30 }
 0x634   :  { %v17183_v30 = vsub.f32 %v23251_v39, %v23263_v53  ;;  %v17190_v31 = vsub.f32 %v23254_v21, %v23266_v45 }
 0x635   :  { %v17007_v34 = vcombine.high %v16982_v10, %v16998_v41  ;;  %v17006_v49 = vcombine.low %v16982_v10, %v16998_v41  ;;  %v17008_v16 = vcombine.low %v16989_v12, %v17005_v42  ;;  %v17009_v50 = vcombine.high %v16989_v12, %v17005_v42 }
 0x636   :  { %v17184_v62 = vand.u32 4294901760, %v17183_v30  ;;  %v17191_v63 = vand.u32 4294901760, %v17190_v31 }
 0x637   :  { %17014 = vrot.lane.b32.xlu1 %v17007_v34, %s20879_s27 }
 0x638   :  { %20473 = vmatprep.subr.mxu1 %v17184_v62 }
 0x639   :  { %20474 = vmatpush3.msra.mxu1 %v17184_v62 }
 0x63a   :  { %20475 = vmatprep.subr.mxu1 %v17191_v63 }
 0x63b   :  { %17022 = vrot.lane.b32.xlu1 %v17008_v16, %s20893_s22  ;;  %20476 = vmatpush3.msra.mxu1 %v17191_v63  ;;  %v20767_v16 = vld [vmem:[#allocation2] sm:$0xff] }
 0x63c   :  { %20477 = vmatprep.subr.mxu1 %v17198_v38 }
 0x63d   :  { %20478 = vmatpush3.msra.mxu1 %v17198_v38 }
 0x63e   :  { %20493 = vmatprep.subr.mxu1 %v23230_v7 }
 0x63f   :  { %17030 = vrot.lane.b32.xlu1 %v17009_v50, %s20894_s25 }
 0x679   :  { %v17013_v56 = vpop.permute.xlu0 %17012 }
 0x67a   :  { %v17034_v24 = vsel %vm1701_vm1, %v16938_v40, %v17013_v56 }
 0x67d   :  { %v17021_v1 = vpop.permute.xlu0 %17020 }
 0x67e   :  { %v17037_v44 = vsel %vm17036_vm2, %v17034_v24, %v17021_v1  ;;  %v17637_v1 = vld [vmem:[#allocation8 + $0x18] sm:$0xff]  ;;  %v17636_v24 = vld [vmem:[#allocation8 + $0x10] sm:$0xff] }
 0x681   :  { %v17029_v6 = vpop.permute.xlu0 %17028 }
 0x682   :  { %v17040_v15 = vsel %vm17039_vm7, %v17037_v44, %v17029_v6  ;;  %v17635_v44 = vld [vmem:[#allocation8 + $0x8] sm:$0xff]  ;;  %v23343_v6 = vand.u32 4294901760, %v17637_v1 }
 0x683   :  { %v17054_v4 = vsel %vm122_vm0, %v17040_v15, 0  ;;  %v23345_v15 = vand.u32 4294901760, %v17636_v24 }
 0x684   :  { %v17128_v5 = vand.u32 4294901760, %v17054_v4 }
 0x686   :  { %v17129_v32 = vsub.f32 %v17054_v4, %v17128_v5  ;;  %20479 = vmatprep.mubr.f32.mxu1 %v17128_v5  ;;  %v23347_v4 = vand.u32 4294901760, %v17635_v44 }
 0x688   :  { %v17130_v36 = vand.u32 4294901760, %v17129_v32 }
 0x68a   :  { %v17131_v35 = vsub.f32 %v17129_v32, %v17130_v36 }
 0x68c   :  { %v17132_v43 = vand.u32 4294901760, %v17131_v35 }
 0x68e   :  { %20468 = vmatprep.mubr.f32.mxu0 %v17132_v43 }
 0x6a9   :  { %v17015_v54 = vpop.permute.xlu1 %17014 }
 0x6aa   :  { %v17035_v18 = vsel %vm1701_vm1, %v17006_v49, %v17015_v54  ;;  %vm18196_vm1 = vcmask 523264  }
 0x6ad   :  { %v17023_v27 = vpop.permute.xlu1 %17022 }
 0x6ae   :  { %v17038_v37 = vsel %vm17036_vm2, %v17035_v18, %v17023_v27  ;;  %v17634_v27 = vld [vmem:[#allocation8] sm:$0xff] }
 0x6af   :  { %v23370_v18 = vand.u32 4294901760, %v17634_v27 }
 0x6b1   :  { %v17031_v40 = vpop.permute.xlu1 %17030 }
 0x6b2   :  { %v17041_v9 = vsel %vm17039_vm7, %v17038_v37, %v17031_v40 }
 0x6b3   :  { %v17057_v20 = vsel %vm122_vm0, %v17041_v9, 0 }
 0x6b4   :  { %v17138_v11 = vand.u32 4294901760, %v17057_v20 }
 0x6b6   :  { %v17139_v17 = vsub.f32 %v17057_v20, %v17138_v11  ;;  %20480 = vmatmul.mubr.f32.vlgmr.msra.gmra.mxu1 %v17138_v11  ;;  %v23381_v20 = vsub.f32 %v17634_v27, %v23370_v18 }
 0x6b7   :  { %20494 = vmatpush3.msra.mxu1 %v23230_v7  ;;  %20501 = vmatprep.mubr.f32.mxu1 %v17130_v36  ;;  %v23356_v36 = vsub.f32 %v17635_v44, %v23347_v4  ;;  %v18185_v44 = vld [vmem:[%s23666_s12 + $0x20] sm:$0xff] }
 0x6b8   :  { %v17140_v0 = vand.u32 4294901760, %v17139_v17  ;;  %20495 = vmatprep.subr.mxu1 %v23244_v47 }
 0x6b9   :  { %20496 = vmatpush3.msra.mxu1 %v23244_v47  ;;  %v23367_v54 = vand.u32 4294901760, %v23356_v36 }
 0x6ba   :  { %v17141_v19 = vsub.f32 %v17139_v17, %v17140_v0  ;;  %20497 = vmatprep.subr.mxu1 %v23246_v23 }
 0x6bb   :  { %20498 = vmatpush3.msra.mxu1 %v23246_v23  ;;  %v17782_v9 = vsub.f32 %v23356_v36, %v23367_v54 }
 0x6bc   :  { %v17142_v29 = vand.u32 4294901760, %v17141_v19  ;;  %20499 = vmatprep.subr.mxu1 %v23276_v59 }
 0x6bd   :  { %20500 = vmatpush3.msra.mxu1 %v23276_v59  ;;  %v17783_v19 = vand.u32 4294901760, %v17782_v9 }
 0x6be   :  { %20502 = vmatmul.mubr.f32.vlgmr.msra.gmra.mxu1 %v17140_v0  ;;  %20515 = vmatprep.subr.mxu1 %v23230_v7  ;;  %v23386_v0 = vand.u32 4294901760, %v23381_v20 }
 0x6bf   :  { %20469 = vmatmul.mubr.f32.vlgmr.msra.gmra.mxu0 %v17142_v29  ;;  %20516 = vmatpush3.msra.mxu1 %v23230_v7 }
 0x6c0   :  { %20483 = vmatpush3.msra.mxu0 %v23233_v3  ;;  %20523 = vmatprep.mubr.f32.mxu1 %v17128_v5  ;;  %v17789_v29 = vsub.f32 %v23381_v20, %v23386_v0 }
 0x6c1   :  { %20484 = vmatprep.subr.mxu0 %v23251_v39  ;;  %20490 = vmatprep.mubr.f32.mxu0 %v17129_v32  ;;  %v23353_v32 = vsub.f32 %v17636_v24, %v23345_v15 }
 0x6c2   :  { %20517 = vmatprep.subr.mxu1 %v23244_v47  ;;  %20485 = vmatpush3.msra.mxu0 %v23251_v39 }
 0x6c3   :  { %20518 = vmatpush3.msra.mxu1 %v23244_v47  ;;  %20486 = vmatprep.subr.mxu0 %v23254_v21  ;;  %v23364_v43 = vand.u32 4294901760, %v23353_v32 }
 0x6c4   :  { %20519 = vmatprep.subr.mxu1 %v23246_v23  ;;  %20487 = vmatpush3.msra.mxu0 %v23254_v21 }
 0x6c5   :  { %20520 = vmatpush3.msra.mxu1 %v23246_v23  ;;  %20488 = vmatprep.subr.mxu0 %v23280_v14  ;;  %v17775_v40 = vsub.f32 %v23353_v32, %v23364_v43 }
 0x6c6   :  { %20521 = vmatprep.subr.mxu1 %v23276_v59  ;;  %20489 = vmatpush3.msra.mxu0 %v23280_v14 }
 0x6c7   :  { %20522 = vmatpush3.msra.mxu1 %v23276_v59  ;;  %20491 = vmatmul.mubr.f32.vlgmr.msra.gmra.mxu0 %v17139_v17  ;;  %v17776_v17 = vand.u32 4294901760, %v17775_v40 }
 0x6c8   :  { %20504 = vmatprep.subr.mxu0 %v23242_v28  ;;  %20524 = vmatmul.mubr.f32.vlgmr.msra.gmra.mxu1 %v17138_v11 }
 0x6c9   :  { %20505 = vmatpush3.msra.mxu0 %v23242_v28  ;;  %20512 = vmatprep.mubr.f32.mxu0 %v17128_v5  ;;  %v23350_v5 = vsub.f32 %v17637_v1, %v23343_v6  ;;  %v18186_v1 = vld [vmem:[%s23666_s12 + $0x28] sm:$0xff] }
 0x6ca   :  { %20506 = vmatprep.subr.mxu0 %v23263_v53  ;;  %v23471_v24 = vand.u32 4294901760, %v18186_v1 }
 0x6cb   :  { %20507 = vmatpush3.msra.mxu0 %v23263_v53  ;;  %v23361_v35 = vand.u32 4294901760, %v23350_v5 }
 0x6cc   :  { %20508 = vmatprep.subr.mxu0 %v23266_v45 }
 0x6cd   :  { %20509 = vmatpush3.msra.mxu0 %v23266_v45  ;;  %v20766_v45 = vld [vmem:[#allocation2 + $0x8] sm:$0xff]  ;;  %v17768_v37 = vsub.f32 %v23350_v5, %v23361_v35 }
 0x6ce   :  { %20510 = vmatprep.subr.mxu0 %v23285_v60 }
 0x6cf   :  { %20511 = vmatpush3.msra.mxu0 %v23285_v60 }
 0x6d0   :  { %20513 = vmatmul.mubr.f32.vlgmr.msra.gmra.mxu0 %v17138_v11  ;;  %20526 = vmatprep.subr.mxu0 %v23343_v6  ;;  %v17769_v11 = vand.u32 4294901760, %v17768_v37 }
 0x6d1   :  { %20527 = vmatpush3.msra.mxu0 %v23343_v6 }
 0x6d2   :  { %20528 = vmatprep.subr.mxu0 %v23345_v15  ;;  %20537 = vmatprep.subr.mxu1 %v17769_v11 }
 0x6d3   :  { %20529 = vmatpush3.msra.mxu0 %v23345_v15  ;;  %20538 = vmatpush3.msra.mxu1 %v17769_v11 }
 0x6d4   :  { %20530 = vmatprep.subr.mxu0 %v23347_v4  ;;  %20539 = vmatprep.subr.mxu1 %v17776_v17 }
 0x6d5   :  { %20531 = vmatpush3.msra.mxu0 %v23347_v4  ;;  %20540 = vmatpush3.msra.mxu1 %v17776_v17 }
 0x6d6   :  { %20532 = vmatprep.subr.mxu0 %v23370_v18  ;;  %20541 = vmatprep.subr.mxu1 %v17783_v19 }
 0x6d7   :  { %20533 = vmatpush3.msra.mxu0 %v23370_v18  ;;  %20542 = vmatpush3.msra.mxu1 %v17783_v19 }
 0x6d8   :  { %20548 = vmatprep.subr.mxu0 %v23350_v5 }
 0x776   :  { %v20481_v3 = vpop.f32.mrf.mxu1 }
 0x778   :  { %v17235_v48 = vpop.f32.mrf.mxu1 }
 0x77e   :  { %v20503_v28 = vpop.f32.mrf.mxu1 }
 0x77f   :  { %v20470_v7 = vpop.f32.mrf.mxu0 }
 0x780   :  { %v17145_v25 = vadd.f32 %v20470_v7, %v18875_v57  ;;  %v17405_v51 = vpop.f32.mrf.mxu1  ;;  %v17790_v7 = vand.u32 4294901760, %v17789_v29 }
 0x781   :  { %v17134_v58 = vpop.f32.mrf.mxu0 }
 0x782   :  { %v17135_v8 = vadd.f32 %v18875_v57, %v17134_v58  ;;  %v17242_v2 = vadd.f32 %v20481_v3, %v17145_v25  ;;  %20543 = vmatprep.subr.mxu1 %v17790_v7 }
 0x783   :  { %20544 = vmatpush3.msra.mxu1 %v17790_v7 }
 0x784   :  { %v17236_v46 = vadd.f32 %v17235_v48, %v17135_v8  ;;  %20559 = vmatprep.subr.mxu1 %v23343_v6 }
 0x787   :  { %v20492_v55 = vpop.f32.mrf.mxu0 }
 0x788   :  { %v17329_v23 = vadd.f32 %v20492_v55, %v17242_v2  ;;  %v20525_v52 = vpop.f32.mrf.mxu1  ;;  %v18876_v2 = vld [vmem:[%s23662_s8] ss:$0 sm:$0xff]  ;;  %s20848_s8 = scalar_lea.vmem %s18837_s30, 256 }
 0x789   :  { %v17321_v47 = vpop.f32.mrf.mxu0  ;;  %p20849_p6 = scmp.ne.s32.totalorder %s18837_s30, %s20848_s8  ;;  %p20854_p8 = scmp.lt.s32.totalorder %s20848_s8, %s20848_s8 }
 0x78a   :  { %v17322_v33 = vadd.f32 %v17321_v47, %v17236_v46  ;;  %v17414_v61 = vadd.f32 %v20503_v28, %v17329_v23  ;;  %v17577_v26 = vpop.f32.mrf.mxu1  ;;  %v18877_v47 = vld [vmem:[%s23663_s9] ss:$0 sm:$0xff] }
 0x78b   :  { %p20855_p9 = por %p20854_p8, %p20853_p7 }
 0x78c   :  { %v17406_v10 = vadd.f32 %v17405_v51, %v17322_v33 }
 0x78d   :  { %p20856_p10 = pnand %p20855_p9, %p20849_p6 }
 0x790   :  { %v20514_v39 = vpop.f32.mrf.mxu0 }
 0x791   :  { %v17503_v21 = vadd.f32 %v20514_v39, %v17414_v61 }
 0x792   :  { %v17496_v41 = vpop.f32.mrf.mxu0 }
 0x793   :  { %v17584_v12 = vadd.f32 %v20525_v52, %v17503_v21  ;;  %v17497_v42 = vadd.f32 %v17496_v41, %v17406_v10 }
 0x795   :  { %v17578_v53 = vadd.f32 %v17577_v26, %v17497_v42  ;;  %v17588_v34 = vadd.f32 %v20766_v45, %v17584_v12 }
 0x797   :  { %v17594_v49 = vsel %vm122_vm0, %v17588_v34, 0.0  ;;  %v17587_v50 = vadd.f32 %v20767_v16, %v17578_v53 }
 0x798   :  { %17595 = vadd.xlane.f32.xlu1 %v17594_v49 }
 0x799   :  { %v17591_v30 = vsel %vm122_vm0, %v17587_v50, 0.0 }
 0x79a   :  { %17592 = vadd.xlane.f32.xlu0 %v17591_v30  ;;  %v18187_v30 = vld [vmem:[%s23666_s12 + $0x30] sm:$0xff] }
 0x821   :  { %v17596_v31 = vpop.xlane.xlu1 %17595 }
 0x822   :  { %v17599_v62 = vmul.f32 0.03125, %v17596_v31 }
 0x823   :  { %v17593_v63 = vpop.xlane.xlu0 %17592 }
 0x824   :  { %v17598_v13 = vmul.f32 0.03125, %v17593_v63  ;;  %v23337_v59 = vsub.f32 %v17588_v34, %v17599_v62  ;;  %v23446_v62 = vand.u32 4294901760, %v18187_v30 }
 0x826   :  { %v17600_v14 = vsub.f32 %v17587_v50, %v17598_v13  ;;  %v17603_v38 = vmul.f32 %v23337_v59, %v23337_v59  ;;  %v18188_v50 = vld [vmem:[%s23666_s12 + $0x38] sm:$0xff]  ;;  %v23452_v13 = vsub.f32 %v18187_v30, %v23446_v62 }
 0x827   :  { %v23444_v31 = vand.u32 4294901760, %v18188_v50 }
 0x828   :  { %v17602_v60 = vmul.f32 %v17600_v14, %v17600_v14  ;;  %v17607_v56 = vsel %vm122_vm0, %v17603_v38, 0.0 }
 0x829   :  { %v23449_v63 = vsub.f32 %v18188_v50, %v23444_v31 }
 0x82a   :  { %v17604_v22 = vsel %vm122_vm0, %v17602_v60, 0.0 }
 0x82b   :  { %17605 = vadd.xlane.f32.xlu0 %v17604_v22 }
 0x82f   :  { %17608 = vadd.xlane.f32.xlu0 %v17607_v56 }
 0x8b4   :  { %v17606_v57 = vpop.xlane.xlu0 %17605 }
 0x8b5   :  { %v17610_v3 = vmul.f32 0.03125, %v17606_v57 }
 0x8b7   :  { %v17612_v58 = vadd.f32 1e-05, %v17610_v3 }
 0x8b8   :  { %v17609_v25 = vpop.xlane.xlu0 %17608 }
 0x8b9   :  { %20758 = vrsqrt.f32 %v17612_v58  ;;  %v17611_v8 = vmul.f32 0.03125, %v17609_v25 }
 0x8bb   :  { %v17613_v55 = vadd.f32 1e-05, %v17611_v8 }
 0x8bd   :  { %20760 = vrsqrt.f32 %v17613_v55 }
 0x8c6   :  { %v20759_v48 = vpop.eup %20758 }
 0x8c7   :  { %v17616_v28 = vmul.f32 %v20759_v48, %v17600_v14  ;;  %v23460_v14 = vand.u32 4294901760, %v23452_v13 }
 0x8c9   :  { %v17624_v23 = vmul.f32 %v18876_v2, %v17616_v28  ;;  %v18323_v22 = vsub.f32 %v23452_v13, %v23460_v14 }
 0x8ca   :  { %v20761_v46 = vpop.eup %20760 }
 0x8cb   :  { %v17617_v33 = vmul.f32 %v20761_v46, %v23337_v59  ;;  %v23400_v51 = vadd.f32 %v18877_v47, %v17624_v23  ;;  %v23457_v59 = vand.u32 4294901760, %v23449_v63  ;;  %v18324_v56 = vand.u32 4294901760, %v18323_v22 }
 0x8cd   :  { %v17625_v61 = vmul.f32 %v18876_v2, %v17617_v33  ;;  %v17646_v52 = vsel %vm122_vm0, %v23400_v51, 0  ;;  %v18316_v60 = vsub.f32 %v23449_v63, %v23457_v59 }
 0x8ce   :  { %v17720_v39 = vand.u32 4294901760, %v17646_v52 }
 0x8cf   :  { %v23404_v21 = vadd.f32 %v18877_v47, %v17625_v61  ;;  %v18317_v38 = vand.u32 4294901760, %v18316_v60  ;;  %v18878_v61 = vld [vmem:[%s23665_s11] ss:$0 sm:$0xff] }
 0x8d0   :  { %20545 = vmatprep.mubr.f32.mxu1 %v17720_v39  ;;  %v17721_v10 = vsub.f32 %v17646_v52, %v17720_v39 }
 0x8d1   :  { %v17649_v41 = vsel %vm122_vm0, %v23404_v21, 0 }
 0x8d2   :  { %v17730_v12 = vand.u32 4294901760, %v17649_v41  ;;  %v17722_v42 = vand.u32 4294901760, %v17721_v10 }
 0x8d4   :  { %v17731_v26 = vsub.f32 %v17649_v41, %v17730_v12  ;;  %20546 = vmatmul.mubr.f32.vlgmr.msra.gmra.mxu1 %v17730_v12  ;;  %v17723_v53 = vsub.f32 %v17721_v10, %v17722_v42 }
 0x8d5   :  { %20560 = vmatpush3.msra.mxu1 %v23343_v6  ;;  %20567 = vmatprep.mubr.f32.mxu1 %v17722_v42 }
 0x8d6   :  { %20561 = vmatprep.subr.mxu1 %v23345_v15  ;;  %v17724_v45 = vand.u32 4294901760, %v17723_v53  ;;  %v17732_v34 = vand.u32 4294901760, %v17731_v26 }
 0x8d7   :  { %20562 = vmatpush3.msra.mxu1 %v23345_v15 }
 0x8d8   :  { %20563 = vmatprep.subr.mxu1 %v23347_v4  ;;  %20534 = vmatprep.mubr.f32.mxu0 %v17724_v45  ;;  %v17733_v49 = vsub.f32 %v17731_v26, %v17732_v34 }
 0x8d9   :  { %20564 = vmatpush3.msra.mxu1 %v23347_v4 }
 0x8da   :  { %20565 = vmatprep.subr.mxu1 %v23370_v18  ;;  %v17734_v16 = vand.u32 4294901760, %v17733_v49 }
 0x8db   :  { %20566 = vmatpush3.msra.mxu1 %v23370_v18 }
 0x8dc   :  { %20568 = vmatmul.mubr.f32.vlgmr.msra.gmra.mxu1 %v17732_v34  ;;  %20581 = vmatprep.subr.mxu1 %v23343_v6 }
 0x8dd   :  { %20535 = vmatmul.mubr.f32.vlgmr.msra.gmra.mxu0 %v17734_v16  ;;  %20582 = vmatpush3.msra.mxu1 %v23343_v6  ;;  %v18184_v6 = vld [vmem:[%s23666_s12 + $0x18] sm:$0xff] }
 0x8de   :  { %20549 = vmatpush3.msra.mxu0 %v23350_v5  ;;  %20589 = vmatprep.mubr.f32.mxu1 %v17720_v39  ;;  %v23484_v5 = vand.u32 4294901760, %v18184_v6 }
 0x8df   :  { %20550 = vmatprep.subr.mxu0 %v23353_v32  ;;  %20556 = vmatprep.mubr.f32.mxu0 %v17721_v10 }
 0x8e0   :  { %20583 = vmatprep.subr.mxu1 %v23345_v15  ;;  %20551 = vmatpush3.msra.mxu0 %v23353_v32  ;;  %v23506_v37 = vsub.f32 %v18184_v6, %v23484_v5 }
 0x8e1   :  { %20584 = vmatpush3.msra.mxu1 %v23345_v15  ;;  %20552 = vmatprep.subr.mxu0 %v23356_v36  ;;  %v18183_v15 = vld [vmem:[%s23666_s12 + $0x10] sm:$0xff] }
 0x8e2   :  { %20585 = vmatprep.subr.mxu1 %v23347_v4  ;;  %20553 = vmatpush3.msra.mxu0 %v23356_v36  ;;  %v23486_v32 = vand.u32 4294901760, %v18183_v15  ;;  %v18182_v36 = vld [vmem:[%s23666_s12 + $0x8] sm:$0xff] }
 0x8e3   :  { %20586 = vmatpush3.msra.mxu1 %v23347_v4  ;;  %20554 = vmatprep.subr.mxu0 %v23381_v20  ;;  %v23482_v4 = vand.u32 4294901760, %v18185_v44 }
 0x8e4   :  { %20587 = vmatprep.subr.mxu1 %v23370_v18  ;;  %20555 = vmatpush3.msra.mxu0 %v23381_v20  ;;  %v23509_v40 = vsub.f32 %v18183_v15, %v23486_v32 }
 0x8e5   :  { %20588 = vmatpush3.msra.mxu1 %v23370_v18  ;;  %20557 = vmatmul.mubr.f32.vlgmr.msra.gmra.mxu0 %v17731_v26  ;;  %v23503_v18 = vsub.f32 %v18185_v44, %v23482_v4 }
 0x8e6   :  { %20570 = vmatprep.subr.mxu0 %v23361_v35  ;;  %20590 = vmatmul.mubr.f32.vlgmr.msra.gmra.mxu1 %v17730_v12  ;;  %v23529_v19 = vand.u32 4294901760, %v23509_v40 }
 0x8e7   :  { %20571 = vmatpush3.msra.mxu0 %v23361_v35  ;;  %20578 = vmatprep.mubr.f32.mxu0 %v17720_v39  ;;  %v18181_v35 = vld [vmem:[%s23666_s12] sm:$0xff]  ;;  %v23523_v17 = vand.u32 4294901760, %v23503_v18 }
 0x8e8   :  { %20572 = vmatprep.subr.mxu0 %v23364_v43  ;;  %20611 = vmatprep.subr.mxu1 %v18317_v38  ;;  %v23500_v27 = vand.u32 4294901760, %v18181_v35  ;;  %v18351_v25 = vsub.f32 %v23509_v40, %v23529_v19 }
 0x8e9   :  { %20573 = vmatpush3.msra.mxu0 %v23364_v43  ;;  %20612 = vmatpush3.msra.mxu1 %v18317_v38  ;;  %v23495_v43 = vsub.f32 %v18186_v1, %v23471_v24  ;;  %v18337_v57 = vsub.f32 %v23503_v18, %v23523_v17 }
 0x8ea   :  { %20574 = vmatprep.subr.mxu0 %v23367_v54  ;;  %20613 = vmatprep.subr.mxu1 %v18324_v56  ;;  %v23520_v11 = vsub.f32 %v18181_v35, %v23500_v27  ;;  %v18352_v28 = vand.u32 4294901760, %v18351_v25 }
 0x8eb   :  { %20575 = vmatpush3.msra.mxu0 %v23367_v54  ;;  %20614 = vmatpush3.msra.mxu1 %v18324_v56  ;;  %v23498_v54 = vand.u32 4294901760, %v18182_v36  ;;  %v23513_v9 = vand.u32 4294901760, %v23495_v43  ;;  %v18338_v55 = vand.u32 4294901760, %v18337_v57 }
 0x8ec   :  { %20576 = vmatprep.subr.mxu0 %v23386_v0  ;;  %v23546_v8 = vand.u32 4294901760, %v23520_v11 }
 0x8ed   :  { %20577 = vmatpush3.msra.mxu0 %v23386_v0  ;;  %v23516_v20 = vsub.f32 %v18182_v36, %v23498_v54  ;;  %v23526_v0 = vand.u32 4294901760, %v23506_v37  ;;  %v18330_v29 = vsub.f32 %v23495_v43, %v23513_v9 }
 0x8ee   :  { %20579 = vmatmul.mubr.f32.vlgmr.msra.gmra.mxu0 %v17730_v12  ;;  %20592 = vmatprep.subr.mxu0 %v23444_v31  ;;  %v18365_v47 = vsub.f32 %v23520_v11, %v23546_v8 }
 0x8ef   :  { %20593 = vmatpush3.msra.mxu0 %v23444_v31  ;;  %v23535_v7 = vand.u32 4294901760, %v23516_v20  ;;  %v18344_v3 = vsub.f32 %v23506_v37, %v23526_v0  ;;  %v18331_v58 = vand.u32 4294901760, %v18330_v29 }
 0x8f0   :  { %20594 = vmatprep.subr.mxu0 %v23446_v62  ;;  %v18366_v46 = vand.u32 4294901760, %v18365_v47 }
 0x8f1   :  { %20595 = vmatpush3.msra.mxu0 %v23446_v62  ;;  %20615 = vmatprep.subr.mxu1 %v18331_v58  ;;  %v18345_v48 = vand.u32 4294901760, %v18344_v3  ;;  %v18358_v2 = vsub.f32 %v23516_v20, %v23535_v7 }
 0x8f2   :  { %20596 = vmatprep.subr.mxu0 %v23471_v24  ;;  %20616 = vmatpush3.msra.mxu1 %v18331_v58 }
 0x8f3   :  { %20597 = vmatpush3.msra.mxu0 %v23471_v24  ;;  %20617 = vmatprep.subr.mxu1 %v18338_v55  ;;  %v18359_v23 = vand.u32 4294901760, %v18358_v2 }
 0x8f4   :  { %20598 = vmatprep.subr.mxu0 %v23482_v4  ;;  %20618 = vmatpush3.msra.mxu1 %v18338_v55 }
 0x8f5   :  { %20599 = vmatpush3.msra.mxu0 %v23482_v4  ;;  %20619 = vmatprep.subr.mxu1 %v18345_v48 }
 0x8f6   :  { %20600 = vmatprep.subr.mxu0 %v23484_v5  ;;  %20620 = vmatpush3.msra.mxu1 %v18345_v48 }
 0x8f7   :  { %20601 = vmatpush3.msra.mxu0 %v23484_v5  ;;  %20621 = vmatprep.subr.mxu1 %v18352_v28 }
 0x8f8   :  { %20602 = vmatprep.subr.mxu0 %v23486_v32  ;;  %20622 = vmatpush3.msra.mxu1 %v18352_v28 }
 0x8f9   :  { %20603 = vmatpush3.msra.mxu0 %v23486_v32  ;;  %20623 = vmatprep.subr.mxu1 %v18359_v23 }
 0x8fa   :  { %20604 = vmatprep.subr.mxu0 %v23498_v54  ;;  %20624 = vmatpush3.msra.mxu1 %v18359_v23 }
 0x8fb   :  { %20605 = vmatpush3.msra.mxu0 %v23498_v54  ;;  %20625 = vmatprep.subr.mxu1 %v18366_v46 }
 0x8fc   :  { %20606 = vmatprep.subr.mxu0 %v23500_v27  ;;  %20626 = vmatpush3.msra.mxu1 %v18366_v46 }
 0x8fd   :  { %20607 = vmatpush3.msra.mxu0 %v23500_v27  ;;  %20649 = vmatprep.subr.mxu1 %v23444_v31 }
 0x8fe   :  { %20630 = vmatprep.subr.mxu0 %v23449_v63 }
 0x994   :  { %v20547_v52 = vpop.f32.mrf.mxu1 }
 0x996   :  { %v17827_v42 = vpop.f32.mrf.mxu1 }
 0x99c   :  { %v20569_v53 = vpop.f32.mrf.mxu1 }
 0x99d   :  { %v20536_v33 = vpop.f32.mrf.mxu0 }
 0x99e   :  { %v17737_v10 = vadd.f32 %v20536_v33, %v18878_v61  ;;  %v17997_v50 = vpop.f32.mrf.mxu1 }
 0x99f   :  { %v17726_v39 = vpop.f32.mrf.mxu0 }
 0x9a0   :  { %v17727_v41 = vadd.f32 %v18878_v61, %v17726_v39  ;;  %v17834_v26 = vadd.f32 %v20547_v52, %v17737_v10 }
 0x9a2   :  { %v17828_v49 = vadd.f32 %v17827_v42, %v17727_v41 }
 0x9a5   :  { %v20558_v12 = vpop.f32.mrf.mxu0 }
 0x9a6   :  { %v17921_v34 = vadd.f32 %v20558_v12, %v17834_v26  ;;  %v20591_v60 = vpop.f32.mrf.mxu1 }
 0x9a7   :  { %v17913_v45 = vpop.f32.mrf.mxu0 }
 0x9a8   :  { %v17914_v16 = vadd.f32 %v17913_v45, %v17828_v49  ;;  %v18006_v30 = vadd.f32 %v20569_v53, %v17921_v34  ;;  %v18169_v15 = vpop.f32.mrf.mxu1 }
 0x9aa   :  { %v17998_v56 = vadd.f32 %v17997_v50, %v17914_v16 }
 0x9ae   :  { %v20580_v22 = vpop.f32.mrf.mxu0 }
 0x9af   :  { %v18095_v38 = vadd.f32 %v20580_v22, %v18006_v30 }
 0x9b0   :  { %v18088_v1 = vpop.f32.mrf.mxu0 }
 0x9b1   :  { %v18176_v44 = vadd.f32 %v20591_v60, %v18095_v38  ;;  %v18089_v6 = vadd.f32 %v18088_v1, %v17998_v56 }
 0x9b3   :  { %v18180_v36 = vmax.f32 %v18176_v44, 0.0  ;;  %v18170_v35 = vadd.f32 %v18169_v15, %v18089_v6  ;;  %v18880_v44 = vld [vmem:[%s23668_s14] ss:$0 sm:$0xff] }
 0x9b5   :  { %v18201_v29 = vsel %vm18196_vm1, %v18180_v36, 0  ;;  %v18179_v57 = vmax.f32 %v18170_v35, 0.0  ;;  %v18881_v36 = vld [vmem:[%s23669_s15] ss:$0 sm:$0xff] }
 0x9b6   :  { %v23563_v3 = vand.u32 4294901760, %v18201_v29 }
 0x9b7   :  { %v18198_v58 = vsel %vm18196_vm1, %v18179_v57, 0 }
 0x9b8   :  { %v18287_v25 = vsub.f32 %v18201_v29, %v23563_v3  ;;  %v18276_v55 = vand.u32 4294901760, %v18198_v58 }
 0x9ba   :  { %v18288_v48 = vand.u32 4294901760, %v18287_v25  ;;  %v18277_v2 = vsub.f32 %v18198_v58, %v18276_v55  ;;  %20627 = vmatprep.mubr.f32.mxu1 %v18276_v55 }
 0x9bb   :  { %20628 = vmatmul.mubr.f32.vlgmr.msra.gmra.mxu1 %v23563_v3 }
 0x9bc   :  { %20650 = vmatpush3.msra.mxu1 %v23444_v31  ;;  %v18278_v28 = vand.u32 4294901760, %v18277_v2  ;;  %v18289_v47 = vsub.f32 %v18287_v25, %v18288_v48 }
 0x9bd   :  { %20651 = vmatprep.subr.mxu1 %v23446_v62 }
 0x9be   :  { %20652 = vmatpush3.msra.mxu1 %v23446_v62  ;;  %20665 = vmatprep.mubr.f32.mxu1 %v18278_v28  ;;  %v18279_v23 = vsub.f32 %v18277_v2, %v18278_v28  ;;  %v18290_v33 = vand.u32 4294901760, %v18289_v47 }
 0x9bf   :  { %20653 = vmatprep.subr.mxu1 %v23471_v24 }
 0x9c0   :  { %20654 = vmatpush3.msra.mxu1 %v23471_v24  ;;  %v18280_v46 = vand.u32 4294901760, %v18279_v23 }
 0x9c1   :  { %20655 = vmatprep.subr.mxu1 %v23482_v4 }
 0x9c2   :  { %20656 = vmatpush3.msra.mxu1 %v23482_v4  ;;  %20608 = vmatprep.mubr.f32.mxu0 %v18280_v46 }
 0x9c3   :  { %20657 = vmatprep.subr.mxu1 %v23484_v5  ;;  %20609 = vmatmul.mubr.f32.vlgmr.msra.gmra.mxu0 %v18290_v33 }
 0x9c4   :  { %20631 = vmatpush3.msra.mxu0 %v23449_v63  ;;  %20658 = vmatpush3.msra.mxu1 %v23484_v5 }
 0x9c5   :  { %20632 = vmatprep.subr.mxu0 %v23452_v13  ;;  %20646 = vmatprep.mubr.f32.mxu0 %v18277_v2 }
 0x9c6   :  { %20659 = vmatprep.subr.mxu1 %v23486_v32  ;;  %20633 = vmatpush3.msra.mxu0 %v23452_v13 }
 0x9c7   :  { %20660 = vmatpush3.msra.mxu1 %v23486_v32  ;;  %20634 = vmatprep.subr.mxu0 %v23495_v43 }
 0x9c8   :  { %20661 = vmatprep.subr.mxu1 %v23498_v54  ;;  %20635 = vmatpush3.msra.mxu0 %v23495_v43 }
 0x9c9   :  { %20662 = vmatpush3.msra.mxu1 %v23498_v54  ;;  %20636 = vmatprep.subr.mxu0 %v23503_v18 }
 0x9ca   :  { %20663 = vmatprep.subr.mxu1 %v23500_v27  ;;  %20637 = vmatpush3.msra.mxu0 %v23503_v18 }
 0x9cb   :  { %20664 = vmatpush3.msra.mxu1 %v23500_v27  ;;  %20638 = vmatprep.subr.mxu0 %v23506_v37 }
 0x9cc   :  { %20666 = vmatmul.mubr.f32.vlgmr.msra.gmra.mxu1 %v18288_v48  ;;  %20687 = vmatprep.subr.mxu1 %v23444_v31 }
 0x9cd   :  { %20639 = vmatpush3.msra.mxu0 %v23506_v37  ;;  %20688 = vmatpush3.msra.mxu1 %v23444_v31 }
 0x9ce   :  { %20703 = vmatprep.mubr.f32.mxu1 %v18276_v55  ;;  %20640 = vmatprep.subr.mxu0 %v23509_v40 }
 0x9cf   :  { %20689 = vmatprep.subr.mxu1 %v23446_v62  ;;  %20641 = vmatpush3.msra.mxu0 %v23509_v40 }
 0x9d0   :  { %20690 = vmatpush3.msra.mxu1 %v23446_v62  ;;  %20642 = vmatprep.subr.mxu0 %v23516_v20  ;;  %v18879_v62 = vld [vmem:[%s23667_s13] ss:$0 sm:$0xff] }
 0x9d1   :  { %20691 = vmatprep.subr.mxu1 %v23471_v24  ;;  %20643 = vmatpush3.msra.mxu0 %v23516_v20 }
 0x9d2   :  { %20692 = vmatpush3.msra.mxu1 %v23471_v24  ;;  %20644 = vmatprep.subr.mxu0 %v23520_v11 }
 0x9d3   :  { %20693 = vmatprep.subr.mxu1 %v23482_v4  ;;  %20645 = vmatpush3.msra.mxu0 %v23520_v11 }
 0x9d4   :  { %20694 = vmatpush3.msra.mxu1 %v23482_v4  ;;  %20647 = vmatmul.mubr.f32.vlgmr.msra.gmra.mxu0 %v18287_v25 }
 0x9d5   :  { %20668 = vmatprep.subr.mxu0 %v23457_v59  ;;  %20695 = vmatprep.subr.mxu1 %v23484_v5 }
 0x9d6   :  { %20669 = vmatpush3.msra.mxu0 %v23457_v59  ;;  %20684 = vmatprep.mubr.f32.mxu0 %v18276_v55 }
 0x9d7   :  { %20696 = vmatpush3.msra.mxu1 %v23484_v5  ;;  %20670 = vmatprep.subr.mxu0 %v23460_v14 }
 0x9d8   :  { %20697 = vmatprep.subr.mxu1 %v23486_v32  ;;  %20671 = vmatpush3.msra.mxu0 %v23460_v14 }
 0x9d9   :  { %20698 = vmatpush3.msra.mxu1 %v23486_v32  ;;  %20672 = vmatprep.subr.mxu0 %v23513_v9 }
 0x9da   :  { %20699 = vmatprep.subr.mxu1 %v23498_v54  ;;  %20673 = vmatpush3.msra.mxu0 %v23513_v9 }
 0x9db   :  { %20700 = vmatpush3.msra.mxu1 %v23498_v54  ;;  %20674 = vmatprep.subr.mxu0 %v23523_v17 }
 0x9dc   :  { %20701 = vmatprep.subr.mxu1 %v23500_v27  ;;  %20675 = vmatpush3.msra.mxu0 %v23523_v17 }
 0x9dd   :  { %20702 = vmatpush3.msra.mxu1 %v23500_v27  ;;  %20676 = vmatprep.subr.mxu0 %v23526_v0 }
 0x9de   :  { %20704 = vmatmul.mubr.f32.vlgmr.msra.gmra.mxu1 %v23563_v3  ;;  %20677 = vmatpush3.msra.mxu0 %v23526_v0 }
 0x9df   :  { %20678 = vmatprep.subr.mxu0 %v23529_v19 }
 0x9e0   :  { %20679 = vmatpush3.msra.mxu0 %v23529_v19 }
 0x9e1   :  { %20680 = vmatprep.subr.mxu0 %v23535_v7 }
 0x9e2   :  { %20681 = vmatpush3.msra.mxu0 %v23535_v7 }
 0x9e3   :  { %20682 = vmatprep.subr.mxu0 %v23546_v8 }
 0x9e4   :  { %20683 = vmatpush3.msra.mxu0 %v23546_v8 }
 0x9e5   :  { %20685 = vmatmul.mubr.f32.vlgmr.msra.gmra.mxu0 %v23563_v3 }
 0xa7b   :  { %v20629_v63 = vpop.f32.mrf.mxu1 }
 0xa7d   :  { %v18403_v4 = vpop.f32.mrf.mxu1 }
 0xa83   :  { %v20610_v31 = vpop.f32.mrf.mxu0 }
 0xa84   :  { %v18293_v59 = vadd.f32 %v20610_v31, %v18879_v62 }
 0xa85   :  { %v18282_v13 = vpop.f32.mrf.mxu0 }
 0xa86   :  { %v18283_v24 = vadd.f32 %v18879_v62, %v18282_v13  ;;  %v18410_v5 = vadd.f32 %v20629_v63, %v18293_v59 }
 0xa88   :  { %v18404_v27 = vadd.f32 %v18403_v4, %v18283_v24 }
 0xa8c   :  { %v20667_v32 = vpop.f32.mrf.mxu1 }
 0xa8e   :  { %v18585_v37 = vpop.f32.mrf.mxu1 }
 0xa94   :  { %v20648_v14 = vpop.f32.mrf.mxu0 }
 0xa95   :  { %v18505_v54 = vadd.f32 %v20648_v14, %v18410_v5 }
 0xa96   :  { %v18497_v43 = vpop.f32.mrf.mxu0 }
 0xa97   :  { %v18498_v18 = vadd.f32 %v18497_v43, %v18404_v27  ;;  %v18594_v40 = vadd.f32 %v20667_v32, %v18505_v54 }
 0xa99   :  { %v18586_v17 = vadd.f32 %v18585_v37, %v18498_v18 }
 0xa9e   :  { %v20705_v9 = vpop.f32.mrf.mxu1 }
 0xaa0   :  { %v18773_v8 = vpop.f32.mrf.mxu1 }
 0xaa5   :  { %v20686_v20 = vpop.f32.mrf.mxu0 }
 0xaa6   :  { %v18695_v11 = vadd.f32 %v20686_v20, %v18594_v40 }
 0xaa7   :  { %v18688_v0 = vpop.f32.mrf.mxu0 }
 0xaa8   :  { %v18780_v19 = vadd.f32 %v20705_v9, %v18695_v11  ;;  %v18689_v7 = vadd.f32 %v18688_v0, %v18586_v17 }
 0xaaa   :  { %v18774_v61 = vadd.f32 %v18773_v8, %v18689_v7  ;;  %v18784_v52 = vadd.f32 %v18780_v19, %v23404_v21 }
 0xaac   :  { %v18790_v39 = vsel %vm122_vm0, %v18784_v52, 0.0  ;;  %v18783_v10 = vadd.f32 %v18774_v61, %v23400_v51 }
 0xaad   :  { %18791 = vadd.xlane.f32.xlu0 %v18790_v39 }
 0xaae   :  { %v18787_v41 = vsel %vm122_vm0, %v18783_v10, 0.0 }
 0xaaf   :  { %18788 = vadd.xlane.f32.xlu1 %v18787_v41 }
 0xb36   :  { %v18792_v12 = vpop.xlane.xlu0 %18791 }
 0xb37   :  { %v18794_v42 = vmul.f32 0.03125, %v18792_v12 }
 0xb38   :  { %v18789_v26 = vpop.xlane.xlu1 %18788 }
 0xb39   :  { %v18796_v53 = vsub.f32 %v18784_v52, %v18794_v42  ;;  %v18793_v45 = vmul.f32 0.03125, %v18789_v26 }
 0xb3b   :  { %v18795_v34 = vsub.f32 %v18783_v10, %v18793_v45  ;;  %v18798_v49 = vmul.f32 %v18796_v53, %v18796_v53 }
 0xb3d   :  { %v18802_v16 = vsel %vm122_vm0, %v18798_v49, 0.0  ;;  %v18797_v50 = vmul.f32 %v18795_v34, %v18795_v34 }
 0xb3e   :  { %18803 = vadd.xlane.f32.xlu0 %v18802_v16 }
 0xb3f   :  { %v18799_v21 = vsel %vm122_vm0, %v18797_v50, 0.0 }
 0xb40   :  { %18800 = vadd.xlane.f32.xlu1 %v18799_v21 }
 0xbc7   :  { %v18804_v30 = vpop.xlane.xlu0 %18803 }
 0xbc8   :  { %v18806_v51 = vmul.f32 0.03125, %v18804_v30 }
 0xbc9   :  { %v18801_v60 = vpop.xlane.xlu1 %18800 }
 0xbca   :  { %v18808_v22 = vadd.f32 1e-05, %v18806_v51  ;;  %v18805_v38 = vmul.f32 0.03125, %v18801_v60 }
 0xbcc   :  { %20762 = vrsqrt.f32 %v18808_v22  ;;  %v18807_v56 = vadd.f32 1e-05, %v18805_v38 }
 0xbce   :  { %20764 = vrsqrt.f32 %v18807_v56 }
 0xbd9   :  { %v20763_v1 = vpop.eup %20762 }
 0xbda   :  { %v18812_v6 = vmul.f32 %v20763_v1, %v18796_v53 }
 0xbdb   :  { %v20765_v15 = vpop.eup %20764 }
 0xbdc   :  { %v18811_v35 = vmul.f32 %v20765_v15, %v18795_v34  ;;  %v18820_v29 = vmul.f32 %v18880_v44, %v18812_v6 }
 0xbde   :  { %v18819_v57 = vmul.f32 %v18880_v44, %v18811_v35  ;;  %v18828_v3 = vadd.f32 %v18881_v36, %v18820_v29 }
 0xbe0   :  { %v18827_v58 = vadd.f32 %v18881_v36, %v18819_v57  ;;  %18830 = vst.msk [vmem:[#allocation10 + $0x8] sm:$0xff] %vm122_vm0, %v18828_v3 }
 0xbe2   :  { %18829 = vst.msk [vmem:[#allocation10] sm:$0xff] %vm122_vm0, %v18827_v58 }
 0xbe3   :  { %20859 = shalt.err (!%p20856_p10)
}
 0xbe4   :  { %18842 = dma.vmem_to_hbm [thread:$0]  %s18837_s30, 256, %s23670_s16, [#allocation4], %s20878_s26, %s20878_s26, %s20879_s27  }
 0xbe5   :  { %20874 = dma.done.wait [#allocation4], 256  }
 0xbe6   :  { %20875 = vsyncadd [#allocation4], 4294967040 }
 0xbe7   :  { %18846 = vsyncpa [#allocation3], 1 }
 0xbe8   :  { %18847 = vsyncpa [#allocation6], 1 }
 0xbe9   :  { %18848 = vsyncpa [#allocation9], 1 }
 0xbea   :  { %18849 = vsyncpa [#allocation4], 1 }

</bundles_post_ra>
